<compile_context>
chip_gen: v7x
topology: tpu7x:2x2x1
jax: 0.10.0
libtpu: 0.0.40
codegen_flags: <defaults>
</compile_context>

<pallas_src>
import functools

import jax
import jax.numpy as jnp
from jax.experimental import pallas as pl
from jax.experimental.pallas import tpu as pltpu

LANE = 128
SUBLANE = 8


def _round_up(x, m):
    return ((x + m - 1) // m) * m


# ----------------------------------------------------------------------------
# Kernel
# ----------------------------------------------------------------------------
def ae_kernel(x_ref,
              w1_ref, b1_ref, w2_ref, b2_ref, w3_ref, b3_ref, wz_ref, bz_ref,
              d1_ref, db1_ref, d2_ref, db2_ref, d3_ref, db3_ref, wx_ref, bx_ref,
              xbar_ref, z_ref):
    """One batch tile of the full auto-encoder. Weights are VMEM-resident.

    Activations flow in bf16 (MXU bf16 x bf16 -> f32); bias-add/ReLU in f32,
    result cast back to bf16 for the next layer and for the output stores.
    """

    def linear(h_bf16, w_ref, b_ref, relu):
        y = jnp.dot(h_bf16, w_ref[...],
                    preferred_element_type=jnp.float32) + b_ref[...]
        return jnp.maximum(y, 0.0) if relu else y

    h = x_ref[...]                                              # bf16 tile
    h = linear(h, w1_ref, b1_ref, True).astype(jnp.bfloat16)    # enc_1 + relu
    h = linear(h, w2_ref, b2_ref, True).astype(jnp.bfloat16)    # enc_2 + relu
    h = linear(h, w3_ref, b3_ref, True).astype(jnp.bfloat16)    # enc_3 + relu
    z = linear(h, wz_ref, bz_ref, False).astype(jnp.bfloat16)   # z_layer (no relu)
    z_ref[...] = z                                              # lane-dense bf16 store
    h = linear(z, d1_ref, db1_ref, True).astype(jnp.bfloat16)   # dec_1 + relu
    h = linear(h, d2_ref, db2_ref, True).astype(jnp.bfloat16)   # dec_2 + relu
    h = linear(h, d3_ref, db3_ref, True).astype(jnp.bfloat16)   # dec_3 + relu
    xbar_ref[...] = linear(h, wx_ref, bx_ref, False).astype(xbar_ref.dtype)


# ----------------------------------------------------------------------------
# One-time parameter preprocessing (hoisted out of the forward pass)
# ----------------------------------------------------------------------------
def prepare_params(params):
    """params: 8 (W, b) pairs in PyTorch layout W:(out,in), b:(out,).

    Returns lane-padded, pre-transposed bf16 weights (in_pad, out_pad) and
    f32 bias rows (1, out_pad)."""
    prepared = []
    for w, b in params:
        w = jnp.asarray(w, jnp.float32)
        b = jnp.asarray(b, jnp.float32)
        out_f, in_f = w.shape
        in_p, out_p = _round_up(in_f, LANE), _round_up(out_f, LANE)
        wt = jnp.zeros((in_p, out_p), jnp.bfloat16)
        wt = wt.at[:in_f, :out_f].set(w.T.astype(jnp.bfloat16))
        bp = jnp.zeros((1, out_p), jnp.float32)
        bp = bp.at[:, :out_f].set(b)
        prepared.append((wt, bp))
    return prepared


# ----------------------------------------------------------------------------
# Batch-tile selection
# ----------------------------------------------------------------------------
def _choose_tile(B, block_b):
    """Pick the batch tile (tb) and padded batch (B_pad).

    Prefers a big tile (>=256 rows feeds the 256-wide MXU in M and amortizes
    per-grid-step overhead), but keeps the grid length >= 2 whenever the
    batch allows it so v7x's two TensorCores both get work."""
    tb = _round_up(min(block_b, _round_up(B, SUBLANE)), SUBLANE)
    B_pad = _round_up(B, tb)
    if B_pad // tb < 2 and B > SUBLANE:
        tb = _round_up((B + 1) // 2, SUBLANE)   # split into 2 even-ish tiles
        B_pad = _round_up(B, tb)
    return tb, B_pad


# ----------------------------------------------------------------------------
# Forward wrapper
# ----------------------------------------------------------------------------
@functools.partial(jax.jit,
                   static_argnames=("n_z", "block_b", "single_buffer_weights"))
def _ae_forward_impl(x, prepared, *, n_z, block_b, single_buffer_weights):
    B, n_input = x.shape

    in_p0 = prepared[0][0].shape[0]        # padded n_input (encoder in)
    nz_p = prepared[3][0].shape[1]         # padded n_z
    out_p_last = prepared[7][0].shape[1]   # padded n_input (decoder out)

    tb, B_pad = _choose_tile(B, block_b)
    grid = (B_pad // tb,)

    # Zero-pad + cast input to bf16: halves the per-step HBM->VMEM DMA.
    # TODO(synk): for very large B, fuse this pad/cast into the upstream
    # producer to avoid the extra HBM pass.
    if (B_pad, in_p0) != (B, n_input):
        x_pad = (jnp.zeros((B_pad, in_p0), jnp.bfloat16)
                 .at[:B, :n_input].set(x.astype(jnp.bfloat16)))
    else:
        x_pad = x.astype(jnp.bfloat16)

    def resident_spec(shape):
        # Constant index map -> DMA'd once, stays resident in VMEM.
        if single_buffer_weights:
            return pl.BlockSpec(shape, lambda i: (0, 0),
                                pipeline_mode=pl.Buffered(1))
        return pl.BlockSpec(shape, lambda i: (0, 0))

    flat_args = [x_pad]
    in_specs = [pl.BlockSpec((tb, in_p0), lambda i: (i, 0))]
    for wt, bp in prepared:
        flat_args.append(wt)
        flat_args.append(bp)
        in_specs.append(resident_spec(wt.shape))
        in_specs.append(resident_spec(bp.shape))

    out_shapes = (jax.ShapeDtypeStruct((B_pad, out_p_last), jnp.bfloat16),
                  jax.ShapeDtypeStruct((B_pad, nz_p), jnp.bfloat16))
    out_specs = (pl.BlockSpec((tb, out_p_last), lambda i: (i, 0)),
                 pl.BlockSpec((tb, nz_p), lambda i: (i, 0)))

    # Cost estimate so XLA can schedule around the custom call.
    flops = 2 * B_pad * sum(wt.shape[0] * wt.shape[1] for wt, _ in prepared)
    param_bytes = sum(wt.size * wt.dtype.itemsize + bp.size * bp.dtype.itemsize
                      for wt, bp in prepared)
    bytes_accessed = (x_pad.size * 2 + param_bytes
                      + B_pad * (out_p_last + nz_p) * 2)
    cost = pl.CostEstimate(flops=flops, transcendentals=0,
                           bytes_accessed=bytes_accessed)

    # VMEM budget: resident params (+double buffer if not single-buffered)
    # plus double-buffered bf16 activation tiles, with margin.
    param_vmem = param_bytes * (1 if single_buffer_weights else 2)
    tile_bytes = tb * (in_p0 + out_p_last + nz_p) * 2
    vmem_needed = param_vmem + 2 * tile_bytes + (2 << 20)
    cp_kwargs = {}
    if vmem_needed > (16 << 20):
        # Cap at 40 MiB: safe on v7x (64 MiB physical VMEM) as well as v5e/v6e.
        cp_kwargs["vmem_limit_bytes"] = min(int(vmem_needed), 40 << 20)

    xbar_pad, z_pad = pl.pallas_call(
        ae_kernel,
        out_shape=out_shapes,
        grid=grid,
        in_specs=in_specs,
        out_specs=out_specs,
        cost_estimate=cost,
        compiler_params=pltpu.CompilerParams(
            dimension_semantics=("parallel",), **cp_kwargs),
    )(*flat_args)

    x_bar = xbar_pad[:B, :n_input].astype(jnp.float32)
    z = z_pad[:B, :n_z].astype(jnp.float32)
    return x_bar, z


def ae_forward(x, prepared, *, n_z, block_b=256):
    try:
        return _ae_forward_impl(x, prepared, n_z=n_z, block_b=block_b,
                                single_buffer_weights=True)
    except Exception:
        # Fallback if pl.Buffered(1) isn't accepted by this jax/Mosaic version.
        return _ae_forward_impl(x, prepared, n_z=n_z, block_b=block_b,
                                single_buffer_weights=False)


# ----------------------------------------------------------------------------
# Test helpers
# ----------------------------------------------------------------------------
def make_params(key, dims):
    """dims: list of (in_features, out_features) for the 8 Linear layers."""
    params = []
    for (fan_in, fan_out) in dims:
        key, kw, kb = jax.random.split(key, 3)
        bound = 1.0 / jnp.sqrt(fan_in)
        w = jax.random.uniform(kw, (fan_out, fan_in), jnp.float32, -bound, bound)
        b = jax.random.uniform(kb, (fan_out,), jnp.float32, -bound, bound)
        params.append((w, b))
    return params


def ae_reference_f32(x, params):
    """Pure f32 reference matching the PyTorch AE.forward semantics."""
    h = x
    z = None
    for i, (w, b) in enumerate(params):
        y = h @ jnp.asarray(w, jnp.float32).T + jnp.asarray(b, jnp.float32)
        if i == 3:
            z = y
            h = y
        elif i == 7:
            return y, z
        else:
            h = jnp.maximum(y, 0.0)


def ae_reference_bf16(x, params):
    """Reference mimicking the kernel's bf16-weight/activation, f32-accum math."""
    h = x.astype(jnp.bfloat16)
    z = None
    for i, (w, b) in enumerate(params):
        wt = jnp.asarray(w, jnp.float32).T.astype(jnp.bfloat16)
        y = jnp.dot(h, wt, preferred_element_type=jnp.float32) \
            + jnp.asarray(b, jnp.float32)
        if i == 3:
            zb = y.astype(jnp.bfloat16)
            z = zb.astype(jnp.float32)
            h = zb
        elif i == 7:
            return y.astype(jnp.bfloat16).astype(jnp.float32), z
        else:
            h = jnp.maximum(y, 0.0).astype(jnp.bfloat16)


if __name__ == "__main__":
    # AE config: n_input=64, encoder 128/64/32, z=16, decoder 32/64/128.
    B = 512                                  # 2 batch tiles of 256 rows
    n_input, n_enc_1, n_enc_2, n_enc_3 = 64, 128, 64, 32
    n_z, n_dec_1, n_dec_2, n_dec_3 = 16, 32, 64, 128

    layer_dims = [
        (n_input, n_enc_1), (n_enc_1, n_enc_2), (n_enc_2, n_enc_3),
        (n_enc_3, n_z),
        (n_z, n_dec_1), (n_dec_1, n_dec_2), (n_dec_2, n_dec_3),
        (n_dec_3, n_input),
    ]

    key = jax.random.PRNGKey(0)
    key, kx = jax.random.split(key)
    x = jax.random.normal(kx, (B, n_input), jnp.float32)
    params = make_params(key, layer_dims)

    prepared = prepare_params(params)        # one-time preprocessing
    x_bar, z = ae_forward(x, prepared, n_z=n_z, block_b=256)
    jax.block_until_ready((x_bar, z))

    assert x_bar.shape == (B, n_input) and z.shape == (B, n_z)

    # Tight check vs. a reference that mimics the kernel's bf16 math.
    xb_m, z_m = ae_reference_bf16(x, params)
    assert jnp.allclose(x_bar, xb_m, atol=2e-2, rtol=2e-2)
    assert jnp.allclose(z, z_m, atol=2e-2, rtol=2e-2)

    # Looser check vs. the true f32 PyTorch-equivalent forward pass.
    xb_f, z_f = ae_reference_f32(x, params)
    assert jnp.allclose(x_bar, xb_f, atol=1e-1, rtol=1e-1)
    assert jnp.allclose(z, z_f, atol=1e-1, rtol=1e-1)

    print("KERNEL_OK")
</pallas_src>

<mosaic_0001>
module attributes {stable_mosaic.version = 11 : i64} {
  func.func @ae_kernel(%arg0: i32, %arg1: memref<256x128xbf16, #tpu.memory_space<vmem>>, %arg2: memref<128x128xbf16, #tpu.memory_space<vmem>>, %arg3: memref<1x128xf32, #tpu.memory_space<vmem>>, %arg4: memref<128x128xbf16, #tpu.memory_space<vmem>>, %arg5: memref<1x128xf32, #tpu.memory_space<vmem>>, %arg6: memref<128x128xbf16, #tpu.memory_space<vmem>>, %arg7: memref<1x128xf32, #tpu.memory_space<vmem>>, %arg8: memref<128x128xbf16, #tpu.memory_space<vmem>>, %arg9: memref<1x128xf32, #tpu.memory_space<vmem>>, %arg10: memref<128x128xbf16, #tpu.memory_space<vmem>>, %arg11: memref<1x128xf32, #tpu.memory_space<vmem>>, %arg12: memref<128x128xbf16, #tpu.memory_space<vmem>>, %arg13: memref<1x128xf32, #tpu.memory_space<vmem>>, %arg14: memref<128x128xbf16, #tpu.memory_space<vmem>>, %arg15: memref<1x128xf32, #tpu.memory_space<vmem>>, %arg16: memref<128x128xbf16, #tpu.memory_space<vmem>>, %arg17: memref<1x128xf32, #tpu.memory_space<vmem>>, %arg18: memref<256x128xbf16, #tpu.memory_space<vmem>>, %arg19: memref<256x128xbf16, #tpu.memory_space<vmem>>) attributes {dimension_semantics = [#tpu.dimension_semantics<parallel>], iteration_bounds = array<i64: 2>, scalar_prefetch = 0 : i64, scratch_operands = 0 : i64, tpu.core_type = #tpu.core_type<tc>, window_params = [{transform_indices = @transform_0, window_bounds = array<i64: 256, 128>}, {pipeline_mode = #tpu.pipeline_mode<synchronous>, transform_indices = @transform_1, window_bounds = array<i64: 128, 128>}, {pipeline_mode = #tpu.pipeline_mode<synchronous>, transform_indices = @transform_2, window_bounds = array<i64: 1, 128>}, {pipeline_mode = #tpu.pipeline_mode<synchronous>, transform_indices = @transform_3, window_bounds = array<i64: 128, 128>}, {pipeline_mode = #tpu.pipeline_mode<synchronous>, transform_indices = @transform_4, window_bounds = array<i64: 1, 128>}, {pipeline_mode = #tpu.pipeline_mode<synchronous>, transform_indices = @transform_5, window_bounds = array<i64: 128, 128>}, {pipeline_mode = #tpu.pipeline_mode<synchronous>, transform_indices = @transform_6, window_bounds = array<i64: 1, 128>}, {pipeline_mode = #tpu.pipeline_mode<synchronous>, transform_indices = @transform_7, window_bounds = array<i64: 128, 128>}, {pipeline_mode = #tpu.pipeline_mode<synchronous>, transform_indices = @transform_8, window_bounds = array<i64: 1, 128>}, {pipeline_mode = #tpu.pipeline_mode<synchronous>, transform_indices = @transform_9, window_bounds = array<i64: 128, 128>}, {pipeline_mode = #tpu.pipeline_mode<synchronous>, transform_indices = @transform_10, window_bounds = array<i64: 1, 128>}, {pipeline_mode = #tpu.pipeline_mode<synchronous>, transform_indices = @transform_11, window_bounds = array<i64: 128, 128>}, {pipeline_mode = #tpu.pipeline_mode<synchronous>, transform_indices = @transform_12, window_bounds = array<i64: 1, 128>}, {pipeline_mode = #tpu.pipeline_mode<synchronous>, transform_indices = @transform_13, window_bounds = array<i64: 128, 128>}, {pipeline_mode = #tpu.pipeline_mode<synchronous>, transform_indices = @transform_14, window_bounds = array<i64: 1, 128>}, {pipeline_mode = #tpu.pipeline_mode<synchronous>, transform_indices = @transform_15, window_bounds = array<i64: 128, 128>}, {pipeline_mode = #tpu.pipeline_mode<synchronous>, transform_indices = @transform_16, window_bounds = array<i64: 1, 128>}, {transform_indices = @transform_17, window_bounds = array<i64: 256, 128>}, {transform_indices = @transform_18, window_bounds = array<i64: 256, 128>}]} {
    %c0 = arith.constant 0 : index
    %c0_0 = arith.constant 0 : index
    %0 = vector.load %arg1[%c0, %c0_0] : memref<256x128xbf16, #tpu.memory_space<vmem>>, vector<256x128xbf16>
    %c0_1 = arith.constant 0 : index
    %c0_2 = arith.constant 0 : index
    %1 = vector.load %arg2[%c0_1, %c0_2] : memref<128x128xbf16, #tpu.memory_space<vmem>>, vector<128x128xbf16>
    %cst = arith.constant dense<0.000000e+00> : vector<256x128xf32>
    %2 = tpu.matmul %0, %1, %cst {dimension_numbers = #tpu.dot_dimension_numbers<[1], [0], [0], [1], [0, 0, 1, 1], [], []>} : vector<256x128xbf16>, vector<128x128xbf16>, vector<256x128xf32> -> vector<256x128xf32>
    %c0_3 = arith.constant 0 : index
    %c0_4 = arith.constant 0 : index
    %3 = vector.load %arg3[%c0_3, %c0_4] : memref<1x128xf32, #tpu.memory_space<vmem>>, vector<1x128xf32>
    %4 = vector.broadcast %3 : vector<1x128xf32> to vector<256x128xf32>
    %5 = arith.addf %2, %4 : vector<256x128xf32>
    %cst_5 = arith.constant 0.000000e+00 : f32
    %6 = vector.broadcast %cst_5 : f32 to vector<256x128xf32>
    %7 = arith.maximumf %5, %6 : vector<256x128xf32>
    %8 = arith.truncf %7 : vector<256x128xf32> to vector<256x128xbf16>
    %c0_6 = arith.constant 0 : index
    %c0_7 = arith.constant 0 : index
    %9 = vector.load %arg4[%c0_6, %c0_7] : memref<128x128xbf16, #tpu.memory_space<vmem>>, vector<128x128xbf16>
    %cst_8 = arith.constant dense<0.000000e+00> : vector<256x128xf32>
    %10 = tpu.matmul %8, %9, %cst_8 {dimension_numbers = #tpu.dot_dimension_numbers<[1], [0], [0], [1], [0, 0, 1, 1], [], []>} : vector<256x128xbf16>, vector<128x128xbf16>, vector<256x128xf32> -> vector<256x128xf32>
    %c0_9 = arith.constant 0 : index
    %c0_10 = arith.constant 0 : index
    %11 = vector.load %arg5[%c0_9, %c0_10] : memref<1x128xf32, #tpu.memory_space<vmem>>, vector<1x128xf32>
    %12 = vector.broadcast %11 : vector<1x128xf32> to vector<256x128xf32>
    %13 = arith.addf %10, %12 : vector<256x128xf32>
    %cst_11 = arith.constant 0.000000e+00 : f32
    %14 = vector.broadcast %cst_11 : f32 to vector<256x128xf32>
    %15 = arith.maximumf %13, %14 : vector<256x128xf32>
    %16 = arith.truncf %15 : vector<256x128xf32> to vector<256x128xbf16>
    %c0_12 = arith.constant 0 : index
    %c0_13 = arith.constant 0 : index
    %17 = vector.load %arg6[%c0_12, %c0_13] : memref<128x128xbf16, #tpu.memory_space<vmem>>, vector<128x128xbf16>
    %cst_14 = arith.constant dense<0.000000e+00> : vector<256x128xf32>
    %18 = tpu.matmul %16, %17, %cst_14 {dimension_numbers = #tpu.dot_dimension_numbers<[1], [0], [0], [1], [0, 0, 1, 1], [], []>} : vector<256x128xbf16>, vector<128x128xbf16>, vector<256x128xf32> -> vector<256x128xf32>
    %c0_15 = arith.constant 0 : index
    %c0_16 = arith.constant 0 : index
    %19 = vector.load %arg7[%c0_15, %c0_16] : memref<1x128xf32, #tpu.memory_space<vmem>>, vector<1x128xf32>
    %20 = vector.broadcast %19 : vector<1x128xf32> to vector<256x128xf32>
    %21 = arith.addf %18, %20 : vector<256x128xf32>
    %cst_17 = arith.constant 0.000000e+00 : f32
    %22 = vector.broadcast %cst_17 : f32 to vector<256x128xf32>
    %23 = arith.maximumf %21, %22 : vector<256x128xf32>
    %24 = arith.truncf %23 : vector<256x128xf32> to vector<256x128xbf16>
    %c0_18 = arith.constant 0 : index
    %c0_19 = arith.constant 0 : index
    %25 = vector.load %arg8[%c0_18, %c0_19] : memref<128x128xbf16, #tpu.memory_space<vmem>>, vector<128x128xbf16>
    %cst_20 = arith.constant dense<0.000000e+00> : vector<256x128xf32>
    %26 = tpu.matmul %24, %25, %cst_20 {dimension_numbers = #tpu.dot_dimension_numbers<[1], [0], [0], [1], [0, 0, 1, 1], [], []>} : vector<256x128xbf16>, vector<128x128xbf16>, vector<256x128xf32> -> vector<256x128xf32>
    %c0_21 = arith.constant 0 : index
    %c0_22 = arith.constant 0 : index
    %27 = vector.load %arg9[%c0_21, %c0_22] : memref<1x128xf32, #tpu.memory_space<vmem>>, vector<1x128xf32>
    %28 = vector.broadcast %27 : vector<1x128xf32> to vector<256x128xf32>
    %29 = arith.addf %26, %28 : vector<256x128xf32>
    %30 = arith.truncf %29 : vector<256x128xf32> to vector<256x128xbf16>
    %c0_23 = arith.constant 0 : index
    %c0_24 = arith.constant 0 : index
    %31 = vector.load %arg19[%c0_23, %c0_24] : memref<256x128xbf16, #tpu.memory_space<vmem>>, vector<256x128xbf16>
    tpu.vector_store %arg19[%c0_23, %c0_24], %30 {strides = array<i32>} : memref<256x128xbf16, #tpu.memory_space<vmem>>, vector<256x128xbf16>,
    %c0_25 = arith.constant 0 : index
    %c0_26 = arith.constant 0 : index
    %32 = vector.load %arg10[%c0_25, %c0_26] : memref<128x128xbf16, #tpu.memory_space<vmem>>, vector<128x128xbf16>
    %cst_27 = arith.constant dense<0.000000e+00> : vector<256x128xf32>
    %33 = tpu.matmul %30, %32, %cst_27 {dimension_numbers = #tpu.dot_dimension_numbers<[1], [0], [0], [1], [0, 0, 1, 1], [], []>} : vector<256x128xbf16>, vector<128x128xbf16>, vector<256x128xf32> -> vector<256x128xf32>
    %c0_28 = arith.constant 0 : index
    %c0_29 = arith.constant 0 : index
    %34 = vector.load %arg11[%c0_28, %c0_29] : memref<1x128xf32, #tpu.memory_space<vmem>>, vector<1x128xf32>
    %35 = vector.broadcast %34 : vector<1x128xf32> to vector<256x128xf32>
    %36 = arith.addf %33, %35 : vector<256x128xf32>
    %cst_30 = arith.constant 0.000000e+00 : f32
    %37 = vector.broadcast %cst_30 : f32 to vector<256x128xf32>
    %38 = arith.maximumf %36, %37 : vector<256x128xf32>
    %39 = arith.truncf %38 : vector<256x128xf32> to vector<256x128xbf16>
    %c0_31 = arith.constant 0 : index
    %c0_32 = arith.constant 0 : index
    %40 = vector.load %arg12[%c0_31, %c0_32] : memref<128x128xbf16, #tpu.memory_space<vmem>>, vector<128x128xbf16>
    %cst_33 = arith.constant dense<0.000000e+00> : vector<256x128xf32>
    %41 = tpu.matmul %39, %40, %cst_33 {dimension_numbers = #tpu.dot_dimension_numbers<[1], [0], [0], [1], [0, 0, 1, 1], [], []>} : vector<256x128xbf16>, vector<128x128xbf16>, vector<256x128xf32> -> vector<256x128xf32>
    %c0_34 = arith.constant 0 : index
    %c0_35 = arith.constant 0 : index
    %42 = vector.load %arg13[%c0_34, %c0_35] : memref<1x128xf32, #tpu.memory_space<vmem>>, vector<1x128xf32>
    %43 = vector.broadcast %42 : vector<1x128xf32> to vector<256x128xf32>
    %44 = arith.addf %41, %43 : vector<256x128xf32>
    %cst_36 = arith.constant 0.000000e+00 : f32
    %45 = vector.broadcast %cst_36 : f32 to vector<256x128xf32>
    %46 = arith.maximumf %44, %45 : vector<256x128xf32>
    %47 = arith.truncf %46 : vector<256x128xf32> to vector<256x128xbf16>
    %c0_37 = arith.constant 0 : index
    %c0_38 = arith.constant 0 : index
    %48 = vector.load %arg14[%c0_37, %c0_38] : memref<128x128xbf16, #tpu.memory_space<vmem>>, vector<128x128xbf16>
    %cst_39 = arith.constant dense<0.000000e+00> : vector<256x128xf32>
    %49 = tpu.matmul %47, %48, %cst_39 {dimension_numbers = #tpu.dot_dimension_numbers<[1], [0], [0], [1], [0, 0, 1, 1], [], []>} : vector<256x128xbf16>, vector<128x128xbf16>, vector<256x128xf32> -> vector<256x128xf32>
    %c0_40 = arith.constant 0 : index
    %c0_41 = arith.constant 0 : index
    %50 = vector.load %arg15[%c0_40, %c0_41] : memref<1x128xf32, #tpu.memory_space<vmem>>, vector<1x128xf32>
    %51 = vector.broadcast %50 : vector<1x128xf32> to vector<256x128xf32>
    %52 = arith.addf %49, %51 : vector<256x128xf32>
    %cst_42 = arith.constant 0.000000e+00 : f32
    %53 = vector.broadcast %cst_42 : f32 to vector<256x128xf32>
    %54 = arith.maximumf %52, %53 : vector<256x128xf32>
    %55 = arith.truncf %54 : vector<256x128xf32> to vector<256x128xbf16>
    %c0_43 = arith.constant 0 : index
    %c0_44 = arith.constant 0 : index
    %56 = vector.load %arg16[%c0_43, %c0_44] : memref<128x128xbf16, #tpu.memory_space<vmem>>, vector<128x128xbf16>
    %cst_45 = arith.constant dense<0.000000e+00> : vector<256x128xf32>
    %57 = tpu.matmul %55, %56, %cst_45 {dimension_numbers = #tpu.dot_dimension_numbers<[1], [0], [0], [1], [0, 0, 1, 1], [], []>} : vector<256x128xbf16>, vector<128x128xbf16>, vector<256x128xf32> -> vector<256x128xf32>
    %c0_46 = arith.constant 0 : index
    %c0_47 = arith.constant 0 : index
    %58 = vector.load %arg17[%c0_46, %c0_47] : memref<1x128xf32, #tpu.memory_space<vmem>>, vector<1x128xf32>
    %59 = vector.broadcast %58 : vector<1x128xf32> to vector<256x128xf32>
    %60 = arith.addf %57, %59 : vector<256x128xf32>
    %61 = arith.truncf %60 : vector<256x128xf32> to vector<256x128xbf16>
    %c0_48 = arith.constant 0 : index
    %c0_49 = arith.constant 0 : index
    %62 = vector.load %arg18[%c0_48, %c0_49] : memref<256x128xbf16, #tpu.memory_space<vmem>>, vector<256x128xbf16>
    tpu.vector_store %arg18[%c0_48, %c0_49], %61 {strides = array<i32>} : memref<256x128xbf16, #tpu.memory_space<vmem>>, vector<256x128xbf16>,
    return
  }
  func.func @transform_0(%arg0: i32) -> (i32, i32) {
    %c0_i32 = arith.constant 0 : i32
    %c0_i32_0 = arith.constant 0 : i32
    return %arg0, %c0_i32 : i32, i32
  }
  func.func @transform_1(%arg0: i32) -> (i32, i32) {
    %c0_i32 = arith.constant 0 : i32
    %c0_i32_0 = arith.constant 0 : i32
    %c0_i32_1 = arith.constant 0 : i32
    return %c0_i32, %c0_i32_0 : i32, i32
  }
  func.func @transform_2(%arg0: i32) -> (i32, i32) {
    %c0_i32 = arith.constant 0 : i32
    %c0_i32_0 = arith.constant 0 : i32
    %c0_i32_1 = arith.constant 0 : i32
    return %c0_i32, %c0_i32_0 : i32, i32
  }
  func.func @transform_3(%arg0: i32) -> (i32, i32) {
    %c0_i32 = arith.constant 0 : i32
    %c0_i32_0 = arith.constant 0 : i32
    %c0_i32_1 = arith.constant 0 : i32
    return %c0_i32, %c0_i32_0 : i32, i32
  }
  func.func @transform_4(%arg0: i32) -> (i32, i32) {
    %c0_i32 = arith.constant 0 : i32
    %c0_i32_0 = arith.constant 0 : i32
    %c0_i32_1 = arith.constant 0 : i32
    return %c0_i32, %c0_i32_0 : i32, i32
  }
  func.func @transform_5(%arg0: i32) -> (i32, i32) {
    %c0_i32 = arith.constant 0 : i32
    %c0_i32_0 = arith.constant 0 : i32
    %c0_i32_1 = arith.constant 0 : i32
    return %c0_i32, %c0_i32_0 : i32, i32
  }
  func.func @transform_6(%arg0: i32) -> (i32, i32) {
    %c0_i32 = arith.constant 0 : i32
    %c0_i32_0 = arith.constant 0 : i32
    %c0_i32_1 = arith.constant 0 : i32
    return %c0_i32, %c0_i32_0 : i32, i32
  }
  func.func @transform_7(%arg0: i32) -> (i32, i32) {
    %c0_i32 = arith.constant 0 : i32
    %c0_i32_0 = arith.constant 0 : i32
    %c0_i32_1 = arith.constant 0 : i32
    return %c0_i32, %c0_i32_0 : i32, i32
  }
  func.func @transform_8(%arg0: i32) -> (i32, i32) {
    %c0_i32 = arith.constant 0 : i32
    %c0_i32_0 = arith.constant 0 : i32
    %c0_i32_1 = arith.constant 0 : i32
    return %c0_i32, %c0_i32_0 : i32, i32
  }
  func.func @transform_9(%arg0: i32) -> (i32, i32) {
    %c0_i32 = arith.constant 0 : i32
    %c0_i32_0 = arith.constant 0 : i32
    %c0_i32_1 = arith.constant 0 : i32
    return %c0_i32, %c0_i32_0 : i32, i32
  }
  func.func @transform_10(%arg0: i32) -> (i32, i32) {
    %c0_i32 = arith.constant 0 : i32
    %c0_i32_0 = arith.constant 0 : i32
    %c0_i32_1 = arith.constant 0 : i32
    return %c0_i32, %c0_i32_0 : i32, i32
  }
  func.func @transform_11(%arg0: i32) -> (i32, i32) {
    %c0_i32 = arith.constant 0 : i32
    %c0_i32_0 = arith.constant 0 : i32
    %c0_i32_1 = arith.constant 0 : i32
    return %c0_i32, %c0_i32_0 : i32, i32
  }
  func.func @transform_12(%arg0: i32) -> (i32, i32) {
    %c0_i32 = arith.constant 0 : i32
    %c0_i32_0 = arith.constant 0 : i32
    %c0_i32_1 = arith.constant 0 : i32
    return %c0_i32, %c0_i32_0 : i32, i32
  }
  func.func @transform_13(%arg0: i32) -> (i32, i32) {
    %c0_i32 = arith.constant 0 : i32
    %c0_i32_0 = arith.constant 0 : i32
    %c0_i32_1 = arith.constant 0 : i32
    return %c0_i32, %c0_i32_0 : i32, i32
  }
  func.func @transform_14(%arg0: i32) -> (i32, i32) {
    %c0_i32 = arith.constant 0 : i32
    %c0_i32_0 = arith.constant 0 : i32
    %c0_i32_1 = arith.constant 0 : i32
    return %c0_i32, %c0_i32_0 : i32, i32
  }
  func.func @transform_15(%arg0: i32) -> (i32, i32) {
    %c0_i32 = arith.constant 0 : i32
    %c0_i32_0 = arith.constant 0 : i32
    %c0_i32_1 = arith.constant 0 : i32
    return %c0_i32, %c0_i32_0 : i32, i32
  }
  func.func @transform_16(%arg0: i32) -> (i32, i32) {
    %c0_i32 = arith.constant 0 : i32
    %c0_i32_0 = arith.constant 0 : i32
    %c0_i32_1 = arith.constant 0 : i32
    return %c0_i32, %c0_i32_0 : i32, i32
  }
  func.func @transform_17(%arg0: i32) -> (i32, i32) {
    %c0_i32 = arith.constant 0 : i32
    %c0_i32_0 = arith.constant 0 : i32
    return %arg0, %c0_i32 : i32, i32
  }
  func.func @transform_18(%arg0: i32) -> (i32, i32) {
    %c0_i32 = arith.constant 0 : i32
    %c0_i32_0 = arith.constant 0 : i32
    return %arg0, %c0_i32 : i32, i32
  }
}

module attributes {stable_mosaic.version = 11 : i64} {
  func.func @ae_kernel(%arg0: i32, %arg1: memref<256x128xbf16, #tpu.memory_space<vmem>>, %arg2: memref<128x128xbf16, #tpu.memory_space<vmem>>, %arg3: memref<1x128xf32, #tpu.memory_space<vmem>>, %arg4: memref<128x128xbf16, #tpu.memory_space<vmem>>, %arg5: memref<1x128xf32, #tpu.memory_space<vmem>>, %arg6: memref<128x128xbf16, #tpu.memory_space<vmem>>, %arg7: memref<1x128xf32, #tpu.memory_space<vmem>>, %arg8: memref<128x128xbf16, #tpu.memory_space<vmem>>, %arg9: memref<1x128xf32, #tpu.memory_space<vmem>>, %arg10: memref<128x128xbf16, #tpu.memory_space<vmem>>, %arg11: memref<1x128xf32, #tpu.memory_space<vmem>>, %arg12: memref<128x128xbf16, #tpu.memory_space<vmem>>, %arg13: memref<1x128xf32, #tpu.memory_space<vmem>>, %arg14: memref<128x128xbf16, #tpu.memory_space<vmem>>, %arg15: memref<1x128xf32, #tpu.memory_space<vmem>>, %arg16: memref<128x128xbf16, #tpu.memory_space<vmem>>, %arg17: memref<1x128xf32, #tpu.memory_space<vmem>>, %arg18: memref<256x128xbf16, #tpu.memory_space<vmem>>, %arg19: memref<256x128xbf16, #tpu.memory_space<vmem>>) attributes {dimension_semantics = [#tpu.dimension_semantics<parallel>], iteration_bounds = array<i64: 2>, scalar_prefetch = 0 : i64, scratch_operands = 0 : i64, tpu.core_type = #tpu.core_type<tc>, window_params = [{transform_indices = @transform_0, window_bounds = array<i64: 256, 128>}, {pipeline_mode = #tpu.pipeline_mode<synchronous>, transform_indices = @transform_1, window_bounds = array<i64: 128, 128>}, {pipeline_mode = #tpu.pipeline_mode<synchronous>, transform_indices = @transform_2, window_bounds = array<i64: 1, 128>}, {pipeline_mode = #tpu.pipeline_mode<synchronous>, transform_indices = @transform_3, window_bounds = array<i64: 128, 128>}, {pipeline_mode = #tpu.pipeline_mode<synchronous>, transform_indices = @transform_4, window_bounds = array<i64: 1, 128>}, {pipeline_mode = #tpu.pipeline_mode<synchronous>, transform_indices = @transform_5, window_bounds = array<i64: 128, 128>}, {pipeline_mode = #tpu.pipeline_mode<synchronous>, transform_indices = @transform_6, window_bounds = array<i64: 1, 128>}, {pipeline_mode = #tpu.pipeline_mode<synchronous>, transform_indices = @transform_7, window_bounds = array<i64: 128, 128>}, {pipeline_mode = #tpu.pipeline_mode<synchronous>, transform_indices = @transform_8, window_bounds = array<i64: 1, 128>}, {pipeline_mode = #tpu.pipeline_mode<synchronous>, transform_indices = @transform_9, window_bounds = array<i64: 128, 128>}, {pipeline_mode = #tpu.pipeline_mode<synchronous>, transform_indices = @transform_10, window_bounds = array<i64: 1, 128>}, {pipeline_mode = #tpu.pipeline_mode<synchronous>, transform_indices = @transform_11, window_bounds = array<i64: 128, 128>}, {pipeline_mode = #tpu.pipeline_mode<synchronous>, transform_indices = @transform_12, window_bounds = array<i64: 1, 128>}, {pipeline_mode = #tpu.pipeline_mode<synchronous>, transform_indices = @transform_13, window_bounds = array<i64: 128, 128>}, {pipeline_mode = #tpu.pipeline_mode<synchronous>, transform_indices = @transform_14, window_bounds = array<i64: 1, 128>}, {pipeline_mode = #tpu.pipeline_mode<synchronous>, transform_indices = @transform_15, window_bounds = array<i64: 128, 128>}, {pipeline_mode = #tpu.pipeline_mode<synchronous>, transform_indices = @transform_16, window_bounds = array<i64: 1, 128>}, {transform_indices = @transform_17, window_bounds = array<i64: 256, 128>}, {transform_indices = @transform_18, window_bounds = array<i64: 256, 128>}]} {
    %c0 = arith.constant 0 : index
    %c0_0 = arith.constant 0 : index
    %0 = vector.load %arg1[%c0, %c0_0] : memref<256x128xbf16, #tpu.memory_space<vmem>>, vector<256x128xbf16>
    %c0_1 = arith.constant 0 : index
    %c0_2 = arith.constant 0 : index
    %1 = vector.load %arg2[%c0_1, %c0_2] : memref<128x128xbf16, #tpu.memory_space<vmem>>, vector<128x128xbf16>
    %cst = arith.constant dense<0.000000e+00> : vector<256x128xf32>
    %2 = tpu.matmul %0, %1, %cst {dimension_numbers = #tpu.dot_dimension_numbers<[1], [0], [0], [1], [0, 0, 1, 1], [], []>} : vector<256x128xbf16>, vector<128x128xbf16>, vector<256x128xf32> -> vector<256x128xf32>
    %c0_3 = arith.constant 0 : index
    %c0_4 = arith.constant 0 : index
    %3 = vector.load %arg3[%c0_3, %c0_4] : memref<1x128xf32, #tpu.memory_space<vmem>>, vector<1x128xf32>
    %4 = vector.broadcast %3 : vector<1x128xf32> to vector<256x128xf32>
    %5 = arith.addf %2, %4 : vector<256x128xf32>
    %cst_5 = arith.constant 0.000000e+00 : f32
    %6 = vector.broadcast %cst_5 : f32 to vector<256x128xf32>
    %7 = arith.maximumf %5, %6 : vector<256x128xf32>
    %8 = arith.truncf %7 : vector<256x128xf32> to vector<256x128xbf16>
    %c0_6 = arith.constant 0 : index
    %c0_7 = arith.constant 0 : index
    %9 = vector.load %arg4[%c0_6, %c0_7] : memref<128x128xbf16, #tpu.memory_space<vmem>>, vector<128x128xbf16>
    %cst_8 = arith.constant dense<0.000000e+00> : vector<256x128xf32>
    %10 = tpu.matmul %8, %9, %cst_8 {dimension_numbers = #tpu.dot_dimension_numbers<[1], [0], [0], [1], [0, 0, 1, 1], [], []>} : vector<256x128xbf16>, vector<128x128xbf16>, vector<256x128xf32> -> vector<256x128xf32>
    %c0_9 = arith.constant 0 : index
    %c0_10 = arith.constant 0 : index
    %11 = vector.load %arg5[%c0_9, %c0_10] : memref<1x128xf32, #tpu.memory_space<vmem>>, vector<1x128xf32>
    %12 = vector.broadcast %11 : vector<1x128xf32> to vector<256x128xf32>
    %13 = arith.addf %10, %12 : vector<256x128xf32>
    %cst_11 = arith.constant 0.000000e+00 : f32
    %14 = vector.broadcast %cst_11 : f32 to vector<256x128xf32>
    %15 = arith.maximumf %13, %14 : vector<256x128xf32>
    %16 = arith.truncf %15 : vector<256x128xf32> to vector<256x128xbf16>
    %c0_12 = arith.constant 0 : index
    %c0_13 = arith.constant 0 : index
    %17 = vector.load %arg6[%c0_12, %c0_13] : memref<128x128xbf16, #tpu.memory_space<vmem>>, vector<128x128xbf16>
    %cst_14 = arith.constant dense<0.000000e+00> : vector<256x128xf32>
    %18 = tpu.matmul %16, %17, %cst_14 {dimension_numbers = #tpu.dot_dimension_numbers<[1], [0], [0], [1], [0, 0, 1, 1], [], []>} : vector<256x128xbf16>, vector<128x128xbf16>, vector<256x128xf32> -> vector<256x128xf32>
    %c0_15 = arith.constant 0 : index
    %c0_16 = arith.constant 0 : index
    %19 = vector.load %arg7[%c0_15, %c0_16] : memref<1x128xf32, #tpu.memory_space<vmem>>, vector<1x128xf32>
    %20 = vector.broadcast %19 : vector<1x128xf32> to vector<256x128xf32>
    %21 = arith.addf %18, %20 : vector<256x128xf32>
    %cst_17 = arith.constant 0.000000e+00 : f32
    %22 = vector.broadcast %cst_17 : f32 to vector<256x128xf32>
    %23 = arith.maximumf %21, %22 : vector<256x128xf32>
    %24 = arith.truncf %23 : vector<256x128xf32> to vector<256x128xbf16>
    %c0_18 = arith.constant 0 : index
    %c0_19 = arith.constant 0 : index
    %25 = vector.load %arg8[%c0_18, %c0_19] : memref<128x128xbf16, #tpu.memory_space<vmem>>, vector<128x128xbf16>
    %cst_20 = arith.constant dense<0.000000e+00> : vector<256x128xf32>
    %26 = tpu.matmul %24, %25, %cst_20 {dimension_numbers = #tpu.dot_dimension_numbers<[1], [0], [0], [1], [0, 0, 1, 1], [], []>} : vector<256x128xbf16>, vector<128x128xbf16>, vector<256x128xf32> -> vector<256x128xf32>
    %c0_21 = arith.constant 0 : index
    %c0_22 = arith.constant 0 : index
    %27 = vector.load %arg9[%c0_21, %c0_22] : memref<1x128xf32, #tpu.memory_space<vmem>>, vector<1x128xf32>
    %28 = vector.broadcast %27 : vector<1x128xf32> to vector<256x128xf32>
    %29 = arith.addf %26, %28 : vector<256x128xf32>
    %30 = arith.truncf %29 : vector<256x128xf32> to vector<256x128xbf16>
    %c0_23 = arith.constant 0 : index
    %c0_24 = arith.constant 0 : index
    %31 = vector.load %arg19[%c0_23, %c0_24] : memref<256x128xbf16, #tpu.memory_space<vmem>>, vector<256x128xbf16>
    tpu.vector_store %arg19[%c0_23, %c0_24], %30 {strides = array<i32>} : memref<256x128xbf16, #tpu.memory_space<vmem>>, vector<256x128xbf16>,
    %c0_25 = arith.constant 0 : index
    %c0_26 = arith.constant 0 : index
    %32 = vector.load %arg10[%c0_25, %c0_26] : memref<128x128xbf16, #tpu.memory_space<vmem>>, vector<128x128xbf16>
    %cst_27 = arith.constant dense<0.000000e+00> : vector<256x128xf32>
    %33 = tpu.matmul %30, %32, %cst_27 {dimension_numbers = #tpu.dot_dimension_numbers<[1], [0], [0], [1], [0, 0, 1, 1], [], []>} : vector<256x128xbf16>, vector<128x128xbf16>, vector<256x128xf32> -> vector<256x128xf32>
    %c0_28 = arith.constant 0 : index
    %c0_29 = arith.constant 0 : index
    %34 = vector.load %arg11[%c0_28, %c0_29] : memref<1x128xf32, #tpu.memory_space<vmem>>, vector<1x128xf32>
    %35 = vector.broadcast %34 : vector<1x128xf32> to vector<256x128xf32>
    %36 = arith.addf %33, %35 : vector<256x128xf32>
    %cst_30 = arith.constant 0.000000e+00 : f32
    %37 = vector.broadcast %cst_30 : f32 to vector<256x128xf32>
    %38 = arith.maximumf %36, %37 : vector<256x128xf32>
    %39 = arith.truncf %38 : vector<256x128xf32> to vector<256x128xbf16>
    %c0_31 = arith.constant 0 : index
    %c0_32 = arith.constant 0 : index
    %40 = vector.load %arg12[%c0_31, %c0_32] : memref<128x128xbf16, #tpu.memory_space<vmem>>, vector<128x128xbf16>
    %cst_33 = arith.constant dense<0.000000e+00> : vector<256x128xf32>
    %41 = tpu.matmul %39, %40, %cst_33 {dimension_numbers = #tpu.dot_dimension_numbers<[1], [0], [0], [1], [0, 0, 1, 1], [], []>} : vector<256x128xbf16>, vector<128x128xbf16>, vector<256x128xf32> -> vector<256x128xf32>
    %c0_34 = arith.constant 0 : index
    %c0_35 = arith.constant 0 : index
    %42 = vector.load %arg13[%c0_34, %c0_35] : memref<1x128xf32, #tpu.memory_space<vmem>>, vector<1x128xf32>
    %43 = vector.broadcast %42 : vector<1x128xf32> to vector<256x128xf32>
    %44 = arith.addf %41, %43 : vector<256x128xf32>
    %cst_36 = arith.constant 0.000000e+00 : f32
    %45 = vector.broadcast %cst_36 : f32 to vector<256x128xf32>
    %46 = arith.maximumf %44, %45 : vector<256x128xf32>
    %47 = arith.truncf %46 : vector<256x128xf32> to vector<256x128xbf16>
    %c0_37 = arith.constant 0 : index
    %c0_38 = arith.constant 0 : index
    %48 = vector.load %arg14[%c0_37, %c0_38] : memref<128x128xbf16, #tpu.memory_space<vmem>>, vector<128x128xbf16>
    %cst_39 = arith.constant dense<0.000000e+00> : vector<256x128xf32>
    %49 = tpu.matmul %47, %48, %cst_39 {dimension_numbers = #tpu.dot_dimension_numbers<[1], [0], [0], [1], [0, 0, 1, 1], [], []>} : vector<256x128xbf16>, vector<128x128xbf16>, vector<256x128xf32> -> vector<256x128xf32>
    %c0_40 = arith.constant 0 : index
    %c0_41 = arith.constant 0 : index
    %50 = vector.load %arg15[%c0_40, %c0_41] : memref<1x128xf32, #tpu.memory_space<vmem>>, vector<1x128xf32>
    %51 = vector.broadcast %50 : vector<1x128xf32> to vector<256x128xf32>
    %52 = arith.addf %49, %51 : vector<256x128xf32>
    %cst_42 = arith.constant 0.000000e+00 : f32
    %53 = vector.broadcast %cst_42 : f32 to vector<256x128xf32>
    %54 = arith.maximumf %52, %53 : vector<256x128xf32>
    %55 = arith.truncf %54 : vector<256x128xf32> to vector<256x128xbf16>
    %c0_43 = arith.constant 0 : index
    %c0_44 = arith.constant 0 : index
    %56 = vector.load %arg16[%c0_43, %c0_44] : memref<128x128xbf16, #tpu.memory_space<vmem>>, vector<128x128xbf16>
    %cst_45 = arith.constant dense<0.000000e+00> : vector<256x128xf32>
    %57 = tpu.matmul %55, %56, %cst_45 {dimension_numbers = #tpu.dot_dimension_numbers<[1], [0], [0], [1], [0, 0, 1, 1], [], []>} : vector<256x128xbf16>, vector<128x128xbf16>, vector<256x128xf32> -> vector<256x128xf32>
    %c0_46 = arith.constant 0 : index
    %c0_47 = arith.constant 0 : index
    %58 = vector.load %arg17[%c0_46, %c0_47] : memref<1x128xf32, #tpu.memory_space<vmem>>, vector<1x128xf32>
    %59 = vector.broadcast %58 : vector<1x128xf32> to vector<256x128xf32>
    %60 = arith.addf %57, %59 : vector<256x128xf32>
    %61 = arith.truncf %60 : vector<256x128xf32> to vector<256x128xbf16>
    %c0_48 = arith.constant 0 : index
    %c0_49 = arith.constant 0 : index
    %62 = vector.load %arg18[%c0_48, %c0_49] : memref<256x128xbf16, #tpu.memory_space<vmem>>, vector<256x128xbf16>
    tpu.vector_store %arg18[%c0_48, %c0_49], %61 {strides = array<i32>} : memref<256x128xbf16, #tpu.memory_space<vmem>>, vector<256x128xbf16>,
    return
  }
  func.func @transform_0(%arg0: i32) -> (i32, i32) {
    %c0_i32 = arith.constant 0 : i32
    %c0_i32_0 = arith.constant 0 : i32
    return %arg0, %c0_i32 : i32, i32
  }
  func.func @transform_1(%arg0: i32) -> (i32, i32) {
    %c0_i32 = arith.constant 0 : i32
    %c0_i32_0 = arith.constant 0 : i32
    %c0_i32_1 = arith.constant 0 : i32
    return %c0_i32, %c0_i32_0 : i32, i32
  }
  func.func @transform_2(%arg0: i32) -> (i32, i32) {
    %c0_i32 = arith.constant 0 : i32
    %c0_i32_0 = arith.constant 0 : i32
    %c0_i32_1 = arith.constant 0 : i32
    return %c0_i32, %c0_i32_0 : i32, i32
  }
  func.func @transform_3(%arg0: i32) -> (i32, i32) {
    %c0_i32 = arith.constant 0 : i32
    %c0_i32_0 = arith.constant 0 : i32
    %c0_i32_1 = arith.constant 0 : i32
    return %c0_i32, %c0_i32_0 : i32, i32
  }
  func.func @transform_4(%arg0: i32) -> (i32, i32) {
    %c0_i32 = arith.constant 0 : i32
    %c0_i32_0 = arith.constant 0 : i32
    %c0_i32_1 = arith.constant 0 : i32
    return %c0_i32, %c0_i32_0 : i32, i32
  }
  func.func @transform_5(%arg0: i32) -> (i32, i32) {
    %c0_i32 = arith.constant 0 : i32
    %c0_i32_0 = arith.constant 0 : i32
    %c0_i32_1 = arith.constant 0 : i32
    return %c0_i32, %c0_i32_0 : i32, i32
  }
  func.func @transform_6(%arg0: i32) -> (i32, i32) {
    %c0_i32 = arith.constant 0 : i32
    %c0_i32_0 = arith.constant 0 : i32
    %c0_i32_1 = arith.constant 0 : i32
    return %c0_i32, %c0_i32_0 : i32, i32
  }
  func.func @transform_7(%arg0: i32) -> (i32, i32) {
    %c0_i32 = arith.constant 0 : i32
    %c0_i32_0 = arith.constant 0 : i32
    %c0_i32_1 = arith.constant 0 : i32
    return %c0_i32, %c0_i32_0 : i32, i32
  }
  func.func @transform_8(%arg0: i32) -> (i32, i32) {
    %c0_i32 = arith.constant 0 : i32
    %c0_i32_0 = arith.constant 0 : i32
    %c0_i32_1 = arith.constant 0 : i32
    return %c0_i32, %c0_i32_0 : i32, i32
  }
  func.func @transform_9(%arg0: i32) -> (i32, i32) {
    %c0_i32 = arith.constant 0 : i32
    %c0_i32_0 = arith.constant 0 : i32
    %c0_i32_1 = arith.constant 0 : i32
    return %c0_i32, %c0_i32_0 : i32, i32
  }
  func.func @transform_10(%arg0: i32) -> (i32, i32) {
    %c0_i32 = arith.constant 0 : i32
    %c0_i32_0 = arith.constant 0 : i32
    %c0_i32_1 = arith.constant 0 : i32
    return %c0_i32, %c0_i32_0 : i32, i32
  }
  func.func @transform_11(%arg0: i32) -> (i32, i32) {
    %c0_i32 = arith.constant 0 : i32
    %c0_i32_0 = arith.constant 0 : i32
    %c0_i32_1 = arith.constant 0 : i32
    return %c0_i32, %c0_i32_0 : i32, i32
  }
  func.func @transform_12(%arg0: i32) -> (i32, i32) {
    %c0_i32 = arith.constant 0 : i32
    %c0_i32_0 = arith.constant 0 : i32
    %c0_i32_1 = arith.constant 0 : i32
    return %c0_i32, %c0_i32_0 : i32, i32
  }
  func.func @transform_13(%arg0: i32) -> (i32, i32) {
    %c0_i32 = arith.constant 0 : i32
    %c0_i32_0 = arith.constant 0 : i32
    %c0_i32_1 = arith.constant 0 : i32
    return %c0_i32, %c0_i32_0 : i32, i32
  }
  func.func @transform_14(%arg0: i32) -> (i32, i32) {
    %c0_i32 = arith.constant 0 : i32
    %c0_i32_0 = arith.constant 0 : i32
    %c0_i32_1 = arith.constant 0 : i32
    return %c0_i32, %c0_i32_0 : i32, i32
  }
  func.func @transform_15(%arg0: i32) -> (i32, i32) {
    %c0_i32 = arith.constant 0 : i32
    %c0_i32_0 = arith.constant 0 : i32
    %c0_i32_1 = arith.constant 0 : i32
    return %c0_i32, %c0_i32_0 : i32, i32
  }
  func.func @transform_16(%arg0: i32) -> (i32, i32) {
    %c0_i32 = arith.constant 0 : i32
    %c0_i32_0 = arith.constant 0 : i32
    %c0_i32_1 = arith.constant 0 : i32
    return %c0_i32, %c0_i32_0 : i32, i32
  }
  func.func @transform_17(%arg0: i32) -> (i32, i32) {
    %c0_i32 = arith.constant 0 : i32
    %c0_i32_0 = arith.constant 0 : i32
    return %arg0, %c0_i32 : i32, i32
  }
  func.func @transform_18(%arg0: i32) -> (i32, i32) {
    %c0_i32 = arith.constant 0 : i32
    %c0_i32_0 = arith.constant 0 : i32
    return %arg0, %c0_i32 : i32, i32
  }
}

</mosaic_0001>

<bundles_post_ra>
// kernel: _ae_forward_impl.1
= control target key start
LH: loop header
LB: loop body
LE: loop exit
PB: predicated region body
PF: predicated region fallthrough
CT: control target
= control target key end

     0   :  { %s4462_s27 = smov 0   ;;  %s5029_s0 = inlined_call_operand.vmem [shape: bf16[512,128], index: 0, kind: input, shape index: {}]   ;;  %s5030_s1 = inlined_call_operand.vmem [shape: bf16[128,128], index: 1, kind: input, shape index: {}]   ;;  %s5031_s2 = inlined_call_operand.vmem [shape: f32[1,128], index: 2, kind: input, shape index: {}]   ;;  %s5032_s3 = inlined_call_operand.vmem [shape: bf16[128,128], index: 3, kind: input, shape index: {}]   ;;  %s5033_s4 = inlined_call_operand.vmem [shape: f32[1,128], index: 4, kind: input, shape index: {}]   ;;  %s5034_s5 = inlined_call_operand.vmem [shape: bf16[128,128], index: 5, kind: input, shape index: {}]   ;;  %s5035_s6 = inlined_call_operand.vmem [shape: f32[1,128], index: 6, kind: input, shape index: {}]   ;;  %s5036_s7 = inlined_call_operand.vmem [shape: bf16[128,128], index: 7, kind: input, shape index: {}]   ;;  %s5037_s8 = inlined_call_operand.vmem [shape: f32[1,128], index: 8, kind: input, shape index: {}]   ;;  %s5038_s9 = inlined_call_operand.vmem [shape: bf16[128,128], index: 9, kind: input, shape index: {}]   ;;  %s5039_s10 = inlined_call_operand.vmem [shape: f32[1,128], index: 10, kind: input, shape index: {}]   ;;  %s5040_s11 = inlined_call_operand.vmem [shape: bf16[128,128], index: 11, kind: input, shape index: {}]   ;;  %s5041_s12 = inlined_call_operand.vmem [shape: f32[1,128], index: 12, kind: input, shape index: {}]   ;;  %s5042_s13 = inlined_call_operand.vmem [shape: bf16[128,128], index: 13, kind: input, shape index: {}]   ;;  %s5043_s14 = inlined_call_operand.vmem [shape: f32[1,128], index: 14, kind: input, shape index: {}]   ;;  %s5044_s15 = inlined_call_operand.vmem [shape: bf16[128,128], index: 15, kind: input, shape index: {}]   ;;  %s5045_s16 = inlined_call_operand.vmem [shape: f32[1,128], index: 16, kind: input, shape index: {}]   ;;  %s5046_s17 = inlined_call_operand.vmem [shape: bf16[512,128], index: 17, kind: output, shape index: {0}]   ;;  %s5047_s18 = inlined_call_operand.vmem [shape: bf16[512,128], index: 18, kind: output, shape index: {1}]  }
   0x1   :  { %5049 = sst [smem:[#allocation2_spill]] %s5029_s0 }
   0x2   :  { %5050 = sst [smem:[#allocation3_spill]] %s5030_s1 }
   0x3   :  { %5051 = sst [smem:[#allocation4_spill]] %s5031_s2 }
   0x4 LB: > { %s3276_s28 = sadd.s32 4294967295, %s4365_s27   ;;  %p3280_p0 = scmp.ge.s32.totalorder %s4365_s27, 1  ;;  %s4365_s27 = sphi %s4462_s27, %s29_s27  }
   0x5   : > { %p516_p1 = scmp.lt.s32.totalorder %s4365_s27, 3 }
   0x7   : > { %p517_p2 = pnand %p3280_p0, %p516_p1 }
   0x8   : > { %s5052_s0 = sld [smem:[#allocation3_spill]] (!%p517_p2)  ;;  %s3281_s19 = sshll.u32 (!%p517_p2), %s3276_s28, 5  ;;  %v4303_v9 = vld [vmem:[%s5032_s3] sm:$0xff] (!%p517_p2)   ;;  %v4304_v10 = vld [vmem:[%s5032_s3 + $0x8] sm:$0xff] (!%p517_p2)   ;;  %v4305_v12 = vld [vmem:[%s5032_s3 + $0x10] sm:$0xff] (!%p517_p2)  }
   0x9   : > { %520 = sbr.rel (%p517_p2) target bundleno = 1875 (0x753), region = 88  ;;  %p576_p3 = scmp.lt.s32.totalorder (!%p517_p2), %s3281_s19, 63  ;;  %3935 = vmatprep.subr.bf16.mxu1 (!%p517_p2), %v4303_v9  ;;  %v4306_v14 = vld [vmem:[%s5032_s3 + $0x18] sm:$0xff] (!%p517_p2)   ;;  %v4307_v15 = vld [vmem:[%s5032_s3 + $0x20] sm:$0xff] (!%p517_p2)   ;;  %v4308_v18 = vld [vmem:[%s5032_s3 + $0x28] sm:$0xff] (!%p517_p2)  }
   0xa   : > { %s5053_s25 = sld [smem:[#allocation2_spill]] (!%p517_p2)  ;;  %3936 = vmatpush3.bf16.msra.mxu1 (!%p517_p2), %v4303_v9  ;;  %v4309_v30 = vld [vmem:[%s5032_s3 + $0x30] sm:$0xff] (!%p517_p2)   ;;  %v4310_v31 = vld [vmem:[%s5032_s3 + $0x38] sm:$0xff] (!%p517_p2)   ;;  %v4311_v32 = vld [vmem:[%s5034_s5] sm:$0xff] (!%p517_p2)  }
   0xb   : > { %3937 = vmatprep.subr.bf16.mxu1 (!%p517_p2), %v4304_v10  ;;  %v4312_v33 = vld [vmem:[%s5034_s5 + $0x8] sm:$0xff] (!%p517_p2)   ;;  %v4313_v34 = vld [vmem:[%s5034_s5 + $0x10] sm:$0xff] (!%p517_p2)   ;;  %v4314_v35 = vld [vmem:[%s5034_s5 + $0x18] sm:$0xff] (!%p517_p2)  }
   0xc   : > { %v4315_v36 = vld [vmem:[%s5034_s5 + $0x20] sm:$0xff] (!%p517_p2)   ;;  %v4316_v37 = vld [vmem:[%s5034_s5 + $0x28] sm:$0xff] (!%p517_p2)   ;;  %v4317_v38 = vld [vmem:[%s5034_s5 + $0x30] sm:$0xff] (!%p517_p2)  }
   0xe   : > { %v4279_v0 = vld [vmem:[%s5052_s0] sm:$0xff] (!%p517_p2)   ;;  %v4280_v1 = vld [vmem:[%s5052_s0 + $0x8] sm:$0xff] (!%p517_p2)   ;;  %v4281_v2 = vld [vmem:[%s5052_s0 + $0x10] sm:$0xff] (!%p517_p2)   ;;  %3938 = vmatpush3.bf16.msra.mxu1 (!%p517_p2), %v4304_v10 }
   0xf   : > { %3887 = vmatprep.subr.bf16.mxu0 (!%p517_p2), %v4279_v0  ;;  %v4282_v3 = vld [vmem:[%s5052_s0 + $0x18] sm:$0xff] (!%p517_p2)   ;;  %v4283_v5 = vld [vmem:[%s5052_s0 + $0x20] sm:$0xff] (!%p517_p2)   ;;  %v4284_v6 = vld [vmem:[%s5052_s0 + $0x28] sm:$0xff] (!%p517_p2)   ;;  %3939 = vmatprep.subr.bf16.mxu1 (!%p517_p2), %v4305_v12 }
  0x10   : > { %3888 = vmatpush3.bf16.msra.mxu0 %v4279_v0  ;;  %s5056_s19 = smov (!%p576_p3, %s3281_s19), 63  ;;  %v4285_v7 = vld [vmem:[%s5052_s0 + $0x30] sm:$0xff]   ;;  %v4286_v8 = vld [vmem:[%s5052_s0 + $0x38] sm:$0xff]  }
  0x11   : > { %3889 = vmatprep.subr.bf16.mxu0 %v4280_v1  ;;  %s4479_s2 = sshll.u32 %s5056_s19, 2 }
  0x12   : > { %s4485_s26 = scalar_lea.vmem %s5053_s25, %s4479_s2  ;;  %3940 = vmatpush3.bf16.msra.mxu1 %v4305_v12  ;;  %s4758_s20 = scalar_lea.vmem %s5047_s18, %s4479_s2 }
  0x13   : > { %v4287_v4 = vld [vmem:[%s4485_s26] sm:$0xff]   ;;  %v4288_v11 = vld [vmem:[%s4485_s26 + $0x8] sm:$0xff]   ;;  %v4289_v13 = vld [vmem:[%s4485_s26 + $0x10] sm:$0xff]   ;;  %3941 = vmatprep.subr.bf16.mxu1 %v4306_v14  ;;  %s4979_s30 = scalar_lea.vmem %s5046_s17, %s4479_s2 }
  0x14   : > { %3890 = vmatpush3.bf16.msra.mxu0 %v4280_v1  ;;  %3903 = vmatprep.mubr.bf16.mxu0 %v4287_v4  ;;  %v4290_v16 = vld [vmem:[%s4485_s26 + $0x18] sm:$0xff]   ;;  %v4291_v17 = vld [vmem:[%s4485_s26 + $0x20] sm:$0xff]   ;;  %v4292_v19 = vld [vmem:[%s4485_s26 + $0x28] sm:$0xff]  }
  0x15   : > { %3891 = vmatprep.subr.bf16.mxu0 %v4281_v2  ;;  %v4293_v20 = vld [vmem:[%s4485_s26 + $0x30] sm:$0xff]   ;;  %v4294_v21 = vld [vmem:[%s4485_s26 + $0x38] sm:$0xff]   ;;  %v4295_v22 = vld [vmem:[%s4485_s26 + $0x40] sm:$0xff]  }
  0x16   : > { %3942 = vmatpush3.bf16.msra.mxu1 %v4306_v14  ;;  %v4296_v23 = vld [vmem:[%s4485_s26 + $0x48] sm:$0xff]   ;;  %v4297_v24 = vld [vmem:[%s4485_s26 + $0x50] sm:$0xff]   ;;  %v4298_v25 = vld [vmem:[%s4485_s26 + $0x58] sm:$0xff]  }
  0x17   : > { %3943 = vmatprep.subr.bf16.mxu1 %v4307_v15  ;;  %v4299_v26 = vld [vmem:[%s4485_s26 + $0x60] sm:$0xff]   ;;  %v4300_v27 = vld [vmem:[%s4485_s26 + $0x68] sm:$0xff]   ;;  %v4301_v28 = vld [vmem:[%s4485_s26 + $0x70] sm:$0xff]  }
  0x18   : > { %3892 = vmatpush3.bf16.msra.mxu0 %v4281_v2  ;;  %v4302_v29 = vld [vmem:[%s4485_s26 + $0x78] sm:$0xff]   ;;  %s5054_s26 = sld [smem:[#allocation4_spill]] }
  0x19   : > { %3893 = vmatprep.subr.bf16.mxu0 %v4282_v3 }
  0x1a   : > { %3944 = vmatpush3.bf16.msra.mxu1 %v4307_v15 }
  0x1b   : > { %3945 = vmatprep.subr.bf16.mxu1 %v4308_v18 }
  0x1c   : > { %3894 = vmatpush3.bf16.msra.mxu0 %v4282_v3 }
  0x1d   : > { %3895 = vmatprep.subr.bf16.mxu0 %v4283_v5 }
  0x1e   : > { %3946 = vmatpush3.bf16.msra.mxu1 %v4308_v18  ;;  %v4566_v39 = vld [vmem:[%s5054_s26] ss:$0 sm:$0xff] }
  0x1f   : > { %3947 = vmatprep.subr.bf16.mxu1 %v4309_v30 }
  0x20   : > { %3896 = vmatpush3.bf16.msra.mxu0 %v4283_v5 }
  0x21   : > { %3897 = vmatprep.subr.bf16.mxu0 %v4284_v6 }
  0x22   : > { %3948 = vmatpush3.bf16.msra.mxu1 %v4309_v30 }
  0x23   : > { %3949 = vmatprep.subr.bf16.mxu1 %v4310_v31 }
  0x24   : > { %3898 = vmatpush3.bf16.msra.mxu0 %v4284_v6 }
  0x25   : > { %3899 = vmatprep.subr.bf16.mxu0 %v4285_v7 }
  0x26   : > { %3950 = vmatpush3.bf16.msra.mxu1 %v4310_v31 }
  0x28   : > { %3900 = vmatpush3.bf16.msra.mxu0 %v4285_v7 }
  0x29   : > { %3901 = vmatprep.subr.bf16.mxu0 %v4286_v8 }
  0x2c   : > { %3902 = vmatpush3.bf16.msra.mxu0 %v4286_v8 }
  0x2d   : > { %3983 = vmatprep.subr.bf16.mxu0 %v4311_v32 }
  0x2f   : > { %3904 = vmatmul.mubr.bf16.vlgmr.msra.gmra.mrb[0].mxu0 %v4288_v11 }
  0x30   : > { %3907 = vmatprep.mubr.bf16.mxu0 %v4289_v13  ;;  %3984 = vmatpush3.bf16.msra.mxu0 %v4311_v32 }
  0x31   : > { %3985 = vmatprep.subr.bf16.mxu0 %v4312_v33 }
  0x34   : > { %3986 = vmatpush3.bf16.msra.mxu0 %v4312_v33 }
  0x35   : > { %3987 = vmatprep.subr.bf16.mxu0 %v4313_v34 }
  0x37   : > { %3908 = vmatmul.mubr.bf16.gmra.mrb[4].mxu0 %v4290_v16 }
  0x38   : > { %3911 = vmatprep.mubr.bf16.mxu0 %v4291_v17  ;;  %3988 = vmatpush3.bf16.msra.mxu0 %v4313_v34 }
  0x39   : > { %3989 = vmatprep.subr.bf16.mxu0 %v4314_v35 }
  0x3c   : > { %3990 = vmatpush3.bf16.msra.mxu0 %v4314_v35 }
  0x3d   : > { %3991 = vmatprep.subr.bf16.mxu0 %v4315_v36 }
  0x3f   : > { %3912 = vmatmul.mubr.bf16.gmra.mrb[8].mxu0 %v4292_v19 }
  0x40   : > { %3915 = vmatprep.mubr.bf16.mxu0 %v4293_v20  ;;  %3992 = vmatpush3.bf16.msra.mxu0 %v4315_v36 }
  0x41   : > { %3993 = vmatprep.subr.bf16.mxu0 %v4316_v37 }
  0x44   : > { %3994 = vmatpush3.bf16.msra.mxu0 %v4316_v37 }
  0x45   : > { %3995 = vmatprep.subr.bf16.mxu0 %v4317_v38 }
  0x47   : > { %3916 = vmatmul.mubr.bf16.gmra.mrb[12].mxu0 %v4294_v21 }
  0x48   : > { %3919 = vmatprep.mubr.bf16.mxu0 %v4295_v22  ;;  %3996 = vmatpush3.bf16.msra.mxu0 %v4317_v38 }
  0x4f   : > { %3920 = vmatmul.mubr.bf16.gmra.mrb[16].mxu0 %v4296_v23 }
  0x50   : > { %3923 = vmatprep.mubr.bf16.mxu0 %v4297_v24 }
  0x57   : > { %3924 = vmatmul.mubr.bf16.gmra.mrb[20].mxu0 %v4298_v25 }
  0x58   : > { %3927 = vmatprep.mubr.bf16.mxu0 %v4299_v26 }
  0x5f   : > { %3928 = vmatmul.mubr.bf16.gmra.mrb[24].mxu0 %v4300_v27 }
  0x60   : > { %3931 = vmatprep.mubr.bf16.mxu0 %v4301_v28 }
  0x67   : > { %3932 = vmatmul.mubr.bf16.gmra.mrb[28].mxu0 %v4302_v29 }
 0x102   : > { %v3905_v40 = vpop.f32.mrb[0].mxu0 }
 0x103   : > { %v836_v41 = vadd.f32 %v3905_v40, %v4566_v39  ;;  %v827_v42 = vpop.f32.mrb[1].mxu0 }
 0x104   : > { %v828_v43 = vadd.f32 %v4566_v39, %v827_v42  ;;  %v3906_v44 = vpop.f32.mrb[2].mxu0 }
 0x105   : > { %v839_v45 = vadd.f32 %v3906_v44, %v4566_v39  ;;  %v830_v46 = vpop.f32.mrb[3].mxu0  ;;  %v956_v48 = vmax.f32 %v836_v41, 0.0 }
 0x106   : > { %v831_v47 = vadd.f32 %v4566_v39, %v830_v46  ;;  %v954_v50 = vmax.f32 %v828_v43, 0.0 }
 0x107   : > { %v957_v49 = vmax.f32 %v839_v45, 0.0 }
 0x108   : > { %v955_v51 = vmax.f32 %v831_v47, 0.0 }
 0x109   : > { %v987_v52 = vpack.c.bf16 %v957_v49, %v956_v48 }
 0x10a   : > { %v3909_v53 = vpop.f32.mrb[4].mxu0  ;;  %v986_v54 = vpack.c.bf16 %v955_v51, %v954_v50 }
 0x10b   : > { %v852_v55 = vadd.f32 %v3909_v53, %v4566_v39  ;;  %v843_v56 = vpop.f32.mrb[5].mxu0 }
 0x10c   : > { %v844_v57 = vadd.f32 %v4566_v39, %v843_v56  ;;  %v3910_v58 = vpop.f32.mrb[6].mxu0  ;;  %3951 = vmatprep.mubr.bf16.mxu1 %v986_v54 }
 0x10d   : > { %v855_v59 = vadd.f32 %v3910_v58, %v4566_v39  ;;  %v846_v60 = vpop.f32.mrb[7].mxu0  ;;  %3952 = vmatmul.mubr.bf16.vlgmr.msra.gmra.mrb[0].mxu1 %v987_v52  ;;  %v960_v62 = vmax.f32 %v852_v55, 0.0 }
 0x10e   : > { %v847_v61 = vadd.f32 %v4566_v39, %v846_v60  ;;  %v958_v0 = vmax.f32 %v844_v57, 0.0 }
 0x10f   : > { %v961_v63 = vmax.f32 %v855_v59, 0.0 }
 0x110   : > { %v959_v1 = vmax.f32 %v847_v61, 0.0 }
 0x111   : > { %v989_v2 = vpack.c.bf16 %v961_v63, %v960_v62 }
 0x112   : > { %v988_v3 = vpack.c.bf16 %v959_v1, %v958_v0  ;;  %v3913_v4 = vpop.f32.mrb[8].mxu0 }
 0x113   : > { %v868_v5 = vadd.f32 %v3913_v4, %v4566_v39  ;;  %v859_v6 = vpop.f32.mrb[9].mxu0 }
 0x114   : > { %v860_v7 = vadd.f32 %v4566_v39, %v859_v6  ;;  %v3914_v8 = vpop.f32.mrb[10].mxu0  ;;  %3955 = vmatprep.mubr.bf16.mxu1 %v988_v3 }
 0x115   : > { %v871_v9 = vadd.f32 %v3914_v8, %v4566_v39  ;;  %v862_v10 = vpop.f32.mrb[11].mxu0  ;;  %3956 = vmatmul.mubr.bf16.gmra.mrb[4].mxu1 %v989_v2  ;;  %v964_v12 = vmax.f32 %v868_v5, 0.0 }
 0x116   : > { %v863_v11 = vadd.f32 %v4566_v39, %v862_v10  ;;  %v962_v14 = vmax.f32 %v860_v7, 0.0 }
 0x117   : > { %v965_v13 = vmax.f32 %v871_v9, 0.0 }
 0x118   : > { %v963_v15 = vmax.f32 %v863_v11, 0.0 }
 0x119   : > { %v991_v16 = vpack.c.bf16 %v965_v13, %v964_v12 }
 0x11a   : > { %v990_v17 = vpack.c.bf16 %v963_v15, %v962_v14  ;;  %v3917_v18 = vpop.f32.mrb[12].mxu0 }
 0x11b   : > { %v884_v19 = vadd.f32 %v3917_v18, %v4566_v39  ;;  %v875_v20 = vpop.f32.mrb[13].mxu0 }
 0x11c   : > { %v876_v21 = vadd.f32 %v4566_v39, %v875_v20  ;;  %v3918_v22 = vpop.f32.mrb[14].mxu0  ;;  %3959 = vmatprep.mubr.bf16.mxu1 %v990_v17 }
 0x11d   : > { %v887_v23 = vadd.f32 %v3918_v22, %v4566_v39  ;;  %v878_v24 = vpop.f32.mrb[15].mxu0  ;;  %3960 = vmatmul.mubr.bf16.gmra.mrb[8].mxu1 %v991_v16  ;;  %v968_v26 = vmax.f32 %v884_v19, 0.0 }
 0x11e   : > { %v879_v25 = vadd.f32 %v4566_v39, %v878_v24  ;;  %v966_v28 = vmax.f32 %v876_v21, 0.0 }
 0x11f   : > { %v969_v27 = vmax.f32 %v887_v23, 0.0 }
 0x120   : > { %v967_v29 = vmax.f32 %v879_v25, 0.0  ;;  %v4318_v25 = vld [vmem:[%s5034_s5 + $0x38] sm:$0xff]  }
 0x121   : > { %v993_v30 = vpack.c.bf16 %v969_v27, %v968_v26  ;;  %3997 = vmatprep.subr.bf16.mxu0 %v4318_v25  ;;  %v4319_v26 = vld [vmem:[%s5036_s7] sm:$0xff]   ;;  %v4321_v27 = vld [vmem:[%s5036_s7 + $0x10] sm:$0xff]  }
 0x122   : > { %v992_v31 = vpack.c.bf16 %v967_v29, %v966_v28  ;;  %v3921_v32 = vpop.f32.mrb[16].mxu0  ;;  %3998 = vmatpush3.bf16.msra.mxu0 %v4318_v25  ;;  %4031 = vmatprep.subr.bf16.mxu1 %v4319_v26  ;;  %v4322_v28 = vld [vmem:[%s5036_s7 + $0x18] sm:$0xff]   ;;  %v4323_v29 = vld [vmem:[%s5036_s7 + $0x20] sm:$0xff]  }
 0x123   : > { %v900_v33 = vadd.f32 %v3921_v32, %v4566_v39  ;;  %v891_v34 = vpop.f32.mrb[17].mxu0  ;;  %4032 = vmatpush3.bf16.msra.mxu1 %v4319_v26  ;;  %v4627_v32 = vld [vmem:[%s5033_s4] ss:$0 sm:$0xff] }
 0x124   : > { %v892_v35 = vadd.f32 %v4566_v39, %v891_v34  ;;  %v3922_v36 = vpop.f32.mrb[18].mxu0  ;;  %3963 = vmatprep.mubr.bf16.mxu1 %v992_v31  ;;  %v4325_v31 = vld [vmem:[%s5036_s7 + $0x30] sm:$0xff]  }
 0x125   : > { %v903_v37 = vadd.f32 %v3922_v36, %v4566_v39  ;;  %v894_v38 = vpop.f32.mrb[19].mxu0  ;;  %3964 = vmatmul.mubr.bf16.gmra.mrb[12].mxu1 %v993_v30  ;;  %v972_v41 = vmax.f32 %v900_v33, 0.0  ;;  %v4324_v30 = vld [vmem:[%s5036_s7 + $0x28] sm:$0xff]  }
 0x126   : > { %v895_v40 = vadd.f32 %v4566_v39, %v894_v38  ;;  %v970_v43 = vmax.f32 %v892_v35, 0.0 }
 0x127   : > { %v973_v42 = vmax.f32 %v903_v37, 0.0 }
 0x128   : > { %v971_v44 = vmax.f32 %v895_v40, 0.0 }
 0x129   : > { %v995_v45 = vpack.c.bf16 %v973_v42, %v972_v41 }
 0x12a   : > { %v994_v46 = vpack.c.bf16 %v971_v44, %v970_v43  ;;  %v3925_v47 = vpop.f32.mrb[20].mxu0 }
 0x12b   : > { %v916_v48 = vadd.f32 %v3925_v47, %v4566_v39  ;;  %v907_v49 = vpop.f32.mrb[21].mxu0 }
 0x12c   : > { %v908_v50 = vadd.f32 %v4566_v39, %v907_v49  ;;  %v3926_v51 = vpop.f32.mrb[22].mxu0  ;;  %3967 = vmatprep.mubr.bf16.mxu1 %v994_v46 }
 0x12d   : > { %v919_v52 = vadd.f32 %v3926_v51, %v4566_v39  ;;  %v910_v53 = vpop.f32.mrb[23].mxu0  ;;  %3968 = vmatmul.mubr.bf16.gmra.mrb[16].mxu1 %v995_v45  ;;  %v976_v55 = vmax.f32 %v916_v48, 0.0 }
 0x12e   : > { %v911_v54 = vadd.f32 %v4566_v39, %v910_v53  ;;  %v974_v57 = vmax.f32 %v908_v50, 0.0 }
 0x12f   : > { %v977_v56 = vmax.f32 %v919_v52, 0.0 }
 0x130   : > { %v975_v58 = vmax.f32 %v911_v54, 0.0 }
 0x131   : > { %v997_v59 = vpack.c.bf16 %v977_v56, %v976_v55 }
 0x132   : > { %v996_v60 = vpack.c.bf16 %v975_v58, %v974_v57  ;;  %v3929_v61 = vpop.f32.mrb[24].mxu0 }
 0x133   : > { %v932_v62 = vadd.f32 %v3929_v61, %v4566_v39  ;;  %v923_v63 = vpop.f32.mrb[25].mxu0 }
 0x134   : > { %v924_v0 = vadd.f32 %v4566_v39, %v923_v63  ;;  %v3930_v1 = vpop.f32.mrb[26].mxu0  ;;  %3971 = vmatprep.mubr.bf16.mxu1 %v996_v60 }
 0x135   : > { %v935_v2 = vadd.f32 %v3930_v1, %v4566_v39  ;;  %v926_v3 = vpop.f32.mrb[27].mxu0  ;;  %3972 = vmatmul.mubr.bf16.gmra.mrb[20].mxu1 %v997_v59  ;;  %v980_v5 = vmax.f32 %v932_v62, 0.0 }
 0x136   : > { %v927_v4 = vadd.f32 %v4566_v39, %v926_v3  ;;  %v978_v7 = vmax.f32 %v924_v0, 0.0 }
 0x137   : > { %v981_v6 = vmax.f32 %v935_v2, 0.0 }
 0x138   : > { %v979_v8 = vmax.f32 %v927_v4, 0.0 }
 0x139   : > { %v999_v9 = vpack.c.bf16 %v981_v6, %v980_v5 }
 0x13a   : > { %v998_v10 = vpack.c.bf16 %v979_v8, %v978_v7  ;;  %v3933_v11 = vpop.f32.mrb[28].mxu0 }
 0x13b   : > { %v948_v12 = vadd.f32 %v3933_v11, %v4566_v39  ;;  %v939_v13 = vpop.f32.mrb[29].mxu0 }
 0x13c   : > { %v940_v14 = vadd.f32 %v4566_v39, %v939_v13  ;;  %v3934_v15 = vpop.f32.mrb[30].mxu0  ;;  %3975 = vmatprep.mubr.bf16.mxu1 %v998_v10 }
 0x13d   : > { %v951_v16 = vadd.f32 %v3934_v15, %v4566_v39  ;;  %v942_v17 = vpop.f32.mrb[31].mxu0  ;;  %3976 = vmatmul.mubr.bf16.gmra.mrb[24].mxu1 %v999_v9  ;;  %v984_v19 = vmax.f32 %v948_v12, 0.0 }
 0x13e   : > { %v943_v18 = vadd.f32 %v4566_v39, %v942_v17  ;;  %v982_v21 = vmax.f32 %v940_v14, 0.0  ;;  %v4320_v39 = vld [vmem:[%s5036_s7 + $0x8] sm:$0xff]  }
 0x13f   : > { %v985_v20 = vmax.f32 %v951_v16, 0.0  ;;  %4033 = vmatprep.subr.bf16.mxu1 %v4320_v39 }
 0x140   : > { %v983_v22 = vmax.f32 %v943_v18, 0.0  ;;  %4034 = vmatpush3.bf16.msra.mxu1 %v4320_v39 }
 0x141   : > { %v1001_v23 = vpack.c.bf16 %v985_v20, %v984_v19  ;;  %4035 = vmatprep.subr.bf16.mxu1 %v4321_v27 }
 0x142   : > { %v1000_v24 = vpack.c.bf16 %v983_v22, %v982_v21 }
 0x144   : > { %3979 = vmatprep.mubr.bf16.mxu1 %v1000_v24  ;;  %4036 = vmatpush3.bf16.msra.mxu1 %v4321_v27 }
 0x145   : > { %3980 = vmatmul.mubr.bf16.gmra.mrb[28].mxu1 %v1001_v23  ;;  %4037 = vmatprep.subr.bf16.mxu1 %v4322_v28 }
 0x148   : > { %4038 = vmatpush3.bf16.msra.mxu1 %v4322_v28 }
 0x149   : > { %4039 = vmatprep.subr.bf16.mxu1 %v4323_v29 }
 0x14c   : > { %4040 = vmatpush3.bf16.msra.mxu1 %v4323_v29 }
 0x14d   : > { %4041 = vmatprep.subr.bf16.mxu1 %v4324_v30 }
 0x150   : > { %4042 = vmatpush3.bf16.msra.mxu1 %v4324_v30 }
 0x151   : > { %4043 = vmatprep.subr.bf16.mxu1 %v4325_v31 }
 0x154   : > { %4044 = vmatpush3.bf16.msra.mxu1 %v4325_v31 }
 0x1e0   : > { %v3953_v33 = vpop.f32.mrb[0].mxu1 }
 0x1e1   : > { %v1116_v34 = vadd.f32 %v3953_v33, %v4627_v32  ;;  %v1107_v35 = vpop.f32.mrb[1].mxu1 }
 0x1e2   : > { %v1108_v36 = vadd.f32 %v4627_v32, %v1107_v35  ;;  %v3954_v37 = vpop.f32.mrb[2].mxu1 }
 0x1e3   : > { %v1119_v38 = vadd.f32 %v3954_v37, %v4627_v32  ;;  %v1110_v40 = vpop.f32.mrb[3].mxu1  ;;  %v1236_v42 = vmax.f32 %v1116_v34, 0.0 }
 0x1e4   : > { %v1111_v41 = vadd.f32 %v4627_v32, %v1110_v40  ;;  %v1234_v44 = vmax.f32 %v1108_v36, 0.0 }
 0x1e5   : > { %v1237_v43 = vmax.f32 %v1119_v38, 0.0 }
 0x1e6   : > { %v1235_v45 = vmax.f32 %v1111_v41, 0.0 }
 0x1e7   : > { %v1267_v46 = vpack.c.bf16 %v1237_v43, %v1236_v42 }
 0x1e8   : > { %v1266_v47 = vpack.c.bf16 %v1235_v45, %v1234_v44  ;;  %v3957_v48 = vpop.f32.mrb[4].mxu1 }
 0x1e9   : > { %v1132_v49 = vadd.f32 %v3957_v48, %v4627_v32  ;;  %v1123_v50 = vpop.f32.mrb[5].mxu1 }
 0x1ea   : > { %v1124_v51 = vadd.f32 %v4627_v32, %v1123_v50  ;;  %v3958_v52 = vpop.f32.mrb[6].mxu1  ;;  %3999 = vmatprep.mubr.bf16.mxu0 %v1266_v47 }
 0x1eb   : > { %v1135_v53 = vadd.f32 %v3958_v52, %v4627_v32  ;;  %v1126_v54 = vpop.f32.mrb[7].mxu1  ;;  %4000 = vmatmul.mubr.bf16.vlgmr.msra.gmra.mrb[32].mxu0 %v1267_v46  ;;  %v1240_v56 = vmax.f32 %v1132_v49, 0.0 }
 0x1ec   : > { %v1127_v55 = vadd.f32 %v4627_v32, %v1126_v54  ;;  %v1238_v58 = vmax.f32 %v1124_v51, 0.0 }
 0x1ed   : > { %v1241_v57 = vmax.f32 %v1135_v53, 0.0 }
 0x1ee   : > { %v1239_v59 = vmax.f32 %v1127_v55, 0.0 }
 0x1ef   : > { %v1269_v60 = vpack.c.bf16 %v1241_v57, %v1240_v56 }
 0x1f0   : > { %v1268_v61 = vpack.c.bf16 %v1239_v59, %v1238_v58  ;;  %v3961_v62 = vpop.f32.mrb[8].mxu1 }
 0x1f1   : > { %v1148_v63 = vadd.f32 %v3961_v62, %v4627_v32  ;;  %v1139_v0 = vpop.f32.mrb[9].mxu1 }
 0x1f2   : > { %v1140_v1 = vadd.f32 %v4627_v32, %v1139_v0  ;;  %v3962_v2 = vpop.f32.mrb[10].mxu1  ;;  %4003 = vmatprep.mubr.bf16.mxu0 %v1268_v61 }
 0x1f3   : > { %v1151_v3 = vadd.f32 %v3962_v2, %v4627_v32  ;;  %v1142_v4 = vpop.f32.mrb[11].mxu1  ;;  %4004 = vmatmul.mubr.bf16.gmra.mrb[36].mxu0 %v1269_v60  ;;  %v1244_v6 = vmax.f32 %v1148_v63, 0.0 }
 0x1f4   : > { %v1143_v5 = vadd.f32 %v4627_v32, %v1142_v4  ;;  %v1242_v8 = vmax.f32 %v1140_v1, 0.0 }
 0x1f5   : > { %v1245_v7 = vmax.f32 %v1151_v3, 0.0 }
 0x1f6   : > { %v1243_v9 = vmax.f32 %v1143_v5, 0.0 }
 0x1f7   : > { %v1271_v10 = vpack.c.bf16 %v1245_v7, %v1244_v6 }
 0x1f8   : > { %v1270_v11 = vpack.c.bf16 %v1243_v9, %v1242_v8  ;;  %v3965_v12 = vpop.f32.mrb[12].mxu1 }
 0x1f9   : > { %v1164_v13 = vadd.f32 %v3965_v12, %v4627_v32  ;;  %v1155_v14 = vpop.f32.mrb[13].mxu1 }
 0x1fa   : > { %v1156_v15 = vadd.f32 %v4627_v32, %v1155_v14  ;;  %v3966_v16 = vpop.f32.mrb[14].mxu1  ;;  %4007 = vmatprep.mubr.bf16.mxu0 %v1270_v11 }
 0x1fb   : > { %v1167_v17 = vadd.f32 %v3966_v16, %v4627_v32  ;;  %v1158_v18 = vpop.f32.mrb[15].mxu1  ;;  %4008 = vmatmul.mubr.bf16.gmra.mrb[40].mxu0 %v1271_v10  ;;  %v1248_v20 = vmax.f32 %v1164_v13, 0.0 }
 0x1fc   : > { %v1159_v19 = vadd.f32 %v4627_v32, %v1158_v18  ;;  %v1246_v22 = vmax.f32 %v1156_v15, 0.0 }
 0x1fd   : > { %v1249_v21 = vmax.f32 %v1167_v17, 0.0 }
 0x1fe   : > { %v1247_v23 = vmax.f32 %v1159_v19, 0.0  ;;  %v4326_v19 = vld [vmem:[%s5036_s7 + $0x38] sm:$0xff]  }
 0x1ff   : > { %v1273_v24 = vpack.c.bf16 %v1249_v21, %v1248_v20  ;;  %4045 = vmatprep.subr.bf16.mxu1 %v4326_v19  ;;  %v4327_v20 = vld [vmem:[%s5038_s9] sm:$0xff]   ;;  %v4329_v21 = vld [vmem:[%s5038_s9 + $0x10] sm:$0xff]  }
 0x200   : > { %v1272_v25 = vpack.c.bf16 %v1247_v23, %v1246_v22  ;;  %v3969_v26 = vpop.f32.mrb[16].mxu1  ;;  %4046 = vmatpush3.bf16.msra.mxu1 %v4326_v19  ;;  %4079 = vmatprep.subr.bf16.mxu0 %v4327_v20  ;;  %v4330_v22 = vld [vmem:[%s5038_s9 + $0x18] sm:$0xff]   ;;  %v4331_v23 = vld [vmem:[%s5038_s9 + $0x20] sm:$0xff]  }
 0x201   : > { %v1180_v39 = vadd.f32 %v3969_v26, %v4627_v32  ;;  %v1171_v27 = vpop.f32.mrb[17].mxu1  ;;  %4080 = vmatpush3.bf16.msra.mxu0 %v4327_v20  ;;  %v4688_v26 = vld [vmem:[%s5035_s6] ss:$0 sm:$0xff] }
 0x202   : > { %v1172_v28 = vadd.f32 %v4627_v32, %v1171_v27  ;;  %v3970_v29 = vpop.f32.mrb[18].mxu1  ;;  %4011 = vmatprep.mubr.bf16.mxu0 %v1272_v25  ;;  %v4333_v25 = vld [vmem:[%s5038_s9 + $0x30] sm:$0xff]  }
 0x203   : > { %v1183_v30 = vadd.f32 %v3970_v29, %v4627_v32  ;;  %v1174_v31 = vpop.f32.mrb[19].mxu1  ;;  %4012 = vmatmul.mubr.bf16.gmra.mrb[44].mxu0 %v1273_v24  ;;  %v1252_v34 = vmax.f32 %v1180_v39, 0.0  ;;  %v4332_v24 = vld [vmem:[%s5038_s9 + $0x28] sm:$0xff]  }
 0x204   : > { %v1175_v33 = vadd.f32 %v4627_v32, %v1174_v31  ;;  %v1250_v36 = vmax.f32 %v1172_v28, 0.0 }
 0x205   : > { %v1253_v35 = vmax.f32 %v1183_v30, 0.0 }
 0x206   : > { %v1251_v37 = vmax.f32 %v1175_v33, 0.0 }
 0x207   : > { %v1275_v38 = vpack.c.bf16 %v1253_v35, %v1252_v34 }
 0x208   : > { %v1274_v40 = vpack.c.bf16 %v1251_v37, %v1250_v36  ;;  %v3973_v41 = vpop.f32.mrb[20].mxu1 }
 0x209   : > { %v1196_v42 = vadd.f32 %v3973_v41, %v4627_v32  ;;  %v1187_v43 = vpop.f32.mrb[21].mxu1 }
 0x20a   : > { %v1188_v44 = vadd.f32 %v4627_v32, %v1187_v43  ;;  %v3974_v45 = vpop.f32.mrb[22].mxu1  ;;  %4015 = vmatprep.mubr.bf16.mxu0 %v1274_v40 }
 0x20b   : > { %v1199_v46 = vadd.f32 %v3974_v45, %v4627_v32  ;;  %v1190_v47 = vpop.f32.mrb[23].mxu1  ;;  %4016 = vmatmul.mubr.bf16.gmra.mrb[48].mxu0 %v1275_v38  ;;  %v1256_v49 = vmax.f32 %v1196_v42, 0.0 }
 0x20c   : > { %v1191_v48 = vadd.f32 %v4627_v32, %v1190_v47  ;;  %v1254_v51 = vmax.f32 %v1188_v44, 0.0 }
 0x20d   : > { %v1257_v50 = vmax.f32 %v1199_v46, 0.0 }
 0x20e   : > { %v1255_v52 = vmax.f32 %v1191_v48, 0.0 }
 0x20f   : > { %v1277_v53 = vpack.c.bf16 %v1257_v50, %v1256_v49 }
 0x210   : > { %v1276_v54 = vpack.c.bf16 %v1255_v52, %v1254_v51  ;;  %v3977_v55 = vpop.f32.mrb[24].mxu1 }
 0x211   : > { %v1212_v56 = vadd.f32 %v3977_v55, %v4627_v32  ;;  %v1203_v57 = vpop.f32.mrb[25].mxu1 }
 0x212   : > { %v1204_v58 = vadd.f32 %v4627_v32, %v1203_v57  ;;  %v3978_v59 = vpop.f32.mrb[26].mxu1  ;;  %4019 = vmatprep.mubr.bf16.mxu0 %v1276_v54 }
 0x213   : > { %v1215_v60 = vadd.f32 %v3978_v59, %v4627_v32  ;;  %v1206_v61 = vpop.f32.mrb[27].mxu1  ;;  %4020 = vmatmul.mubr.bf16.gmra.mrb[52].mxu0 %v1277_v53  ;;  %v1260_v63 = vmax.f32 %v1212_v56, 0.0 }
 0x214   : > { %v1207_v62 = vadd.f32 %v4627_v32, %v1206_v61  ;;  %v1258_v1 = vmax.f32 %v1204_v58, 0.0 }
 0x215   : > { %v1261_v0 = vmax.f32 %v1215_v60, 0.0 }
 0x216   : > { %v1259_v2 = vmax.f32 %v1207_v62, 0.0 }
 0x217   : > { %v1279_v3 = vpack.c.bf16 %v1261_v0, %v1260_v63 }
 0x218   : > { %v1278_v4 = vpack.c.bf16 %v1259_v2, %v1258_v1  ;;  %v3981_v5 = vpop.f32.mrb[28].mxu1 }
 0x219   : > { %v1228_v6 = vadd.f32 %v3981_v5, %v4627_v32  ;;  %v1219_v7 = vpop.f32.mrb[29].mxu1 }
 0x21a   : > { %v1220_v8 = vadd.f32 %v4627_v32, %v1219_v7  ;;  %v3982_v9 = vpop.f32.mrb[30].mxu1  ;;  %4023 = vmatprep.mubr.bf16.mxu0 %v1278_v4 }
 0x21b   : > { %v1231_v10 = vadd.f32 %v3982_v9, %v4627_v32  ;;  %v1222_v11 = vpop.f32.mrb[31].mxu1  ;;  %4024 = vmatmul.mubr.bf16.gmra.mrb[56].mxu0 %v1279_v3  ;;  %v1264_v13 = vmax.f32 %v1228_v6, 0.0 }
 0x21c   : > { %v1223_v12 = vadd.f32 %v4627_v32, %v1222_v11  ;;  %v1262_v15 = vmax.f32 %v1220_v8, 0.0  ;;  %v4328_v32 = vld [vmem:[%s5038_s9 + $0x8] sm:$0xff]  }
 0x21d   : > { %v1265_v14 = vmax.f32 %v1231_v10, 0.0  ;;  %4081 = vmatprep.subr.bf16.mxu0 %v4328_v32 }
 0x21e   : > { %v1263_v16 = vmax.f32 %v1223_v12, 0.0  ;;  %4082 = vmatpush3.bf16.msra.mxu0 %v4328_v32 }
 0x21f   : > { %v1281_v17 = vpack.c.bf16 %v1265_v14, %v1264_v13  ;;  %4083 = vmatprep.subr.bf16.mxu0 %v4329_v21 }
 0x220   : > { %v1280_v18 = vpack.c.bf16 %v1263_v16, %v1262_v15 }
 0x222   : > { %4027 = vmatprep.mubr.bf16.mxu0 %v1280_v18  ;;  %4084 = vmatpush3.bf16.msra.mxu0 %v4329_v21 }
 0x223   : > { %4028 = vmatmul.mubr.bf16.gmra.mrb[60].mxu0 %v1281_v17  ;;  %4085 = vmatprep.subr.bf16.mxu0 %v4330_v22 }
 0x226   : > { %4086 = vmatpush3.bf16.msra.mxu0 %v4330_v22 }
 0x227   : > { %4087 = vmatprep.subr.bf16.mxu0 %v4331_v23 }
 0x22a   : > { %4088 = vmatpush3.bf16.msra.mxu0 %v4331_v23 }
 0x22b   : > { %4089 = vmatprep.subr.bf16.mxu0 %v4332_v24 }
 0x22e   : > { %4090 = vmatpush3.bf16.msra.mxu0 %v4332_v24 }
 0x22f   : > { %4091 = vmatprep.subr.bf16.mxu0 %v4333_v25 }
 0x232   : > { %4092 = vmatpush3.bf16.msra.mxu0 %v4333_v25 }
 0x2be   : > { %v4001_v39 = vpop.f32.mrb[32].mxu0 }
 0x2bf   : > { %v1396_v27 = vadd.f32 %v4001_v39, %v4688_v26  ;;  %v1387_v28 = vpop.f32.mrb[33].mxu0 }
 0x2c0   : > { %v1388_v29 = vadd.f32 %v4688_v26, %v1387_v28  ;;  %v4002_v30 = vpop.f32.mrb[34].mxu0 }
 0x2c1   : > { %v1399_v31 = vadd.f32 %v4002_v30, %v4688_v26  ;;  %v1390_v33 = vpop.f32.mrb[35].mxu0  ;;  %v1516_v35 = vmax.f32 %v1396_v27, 0.0 }
 0x2c2   : > { %v1391_v34 = vadd.f32 %v4688_v26, %v1390_v33  ;;  %v1514_v37 = vmax.f32 %v1388_v29, 0.0 }
 0x2c3   : > { %v1517_v36 = vmax.f32 %v1399_v31, 0.0 }
 0x2c4   : > { %v1515_v38 = vmax.f32 %v1391_v34, 0.0 }
 0x2c5   : > { %v1547_v40 = vpack.c.bf16 %v1517_v36, %v1516_v35 }
 0x2c6   : > { %v1546_v41 = vpack.c.bf16 %v1515_v38, %v1514_v37  ;;  %v4005_v42 = vpop.f32.mrb[36].mxu0 }
 0x2c7   : > { %v1412_v43 = vadd.f32 %v4005_v42, %v4688_v26  ;;  %v1403_v44 = vpop.f32.mrb[37].mxu0 }
 0x2c8   : > { %v1404_v45 = vadd.f32 %v4688_v26, %v1403_v44  ;;  %v4006_v46 = vpop.f32.mrb[38].mxu0  ;;  %4047 = vmatprep.mubr.bf16.mxu1 %v1546_v41 }
 0x2c9   : > { %v1415_v47 = vadd.f32 %v4006_v46, %v4688_v26  ;;  %v1406_v48 = vpop.f32.mrb[39].mxu0  ;;  %4048 = vmatmul.mubr.bf16.vlgmr.msra.gmra.mrb[32].mxu1 %v1547_v40  ;;  %v1520_v50 = vmax.f32 %v1412_v43, 0.0 }
 0x2ca   : > { %v1407_v49 = vadd.f32 %v4688_v26, %v1406_v48  ;;  %v1518_v52 = vmax.f32 %v1404_v45, 0.0 }
 0x2cb   : > { %v1521_v51 = vmax.f32 %v1415_v47, 0.0 }
 0x2cc   : > { %v1519_v53 = vmax.f32 %v1407_v49, 0.0 }
 0x2cd   : > { %v1549_v54 = vpack.c.bf16 %v1521_v51, %v1520_v50 }
 0x2ce   : > { %v1548_v55 = vpack.c.bf16 %v1519_v53, %v1518_v52  ;;  %v4009_v56 = vpop.f32.mrb[40].mxu0 }
 0x2cf   : > { %v1428_v57 = vadd.f32 %v4009_v56, %v4688_v26  ;;  %v1419_v58 = vpop.f32.mrb[41].mxu0 }
 0x2d0   : > { %v1420_v59 = vadd.f32 %v4688_v26, %v1419_v58  ;;  %v4010_v60 = vpop.f32.mrb[42].mxu0  ;;  %4051 = vmatprep.mubr.bf16.mxu1 %v1548_v55 }
 0x2d1   : > { %v1431_v61 = vadd.f32 %v4010_v60, %v4688_v26  ;;  %v1422_v62 = vpop.f32.mrb[43].mxu0  ;;  %4052 = vmatmul.mubr.bf16.gmra.mrb[36].mxu1 %v1549_v54  ;;  %v1524_v0 = vmax.f32 %v1428_v57, 0.0 }
 0x2d2   : > { %v1423_v63 = vadd.f32 %v4688_v26, %v1422_v62  ;;  %v1522_v2 = vmax.f32 %v1420_v59, 0.0 }
 0x2d3   : > { %v1525_v1 = vmax.f32 %v1431_v61, 0.0 }
 0x2d4   : > { %v1523_v3 = vmax.f32 %v1423_v63, 0.0 }
 0x2d5   : > { %v1551_v4 = vpack.c.bf16 %v1525_v1, %v1524_v0 }
 0x2d6   : > { %v1550_v5 = vpack.c.bf16 %v1523_v3, %v1522_v2  ;;  %v4013_v6 = vpop.f32.mrb[44].mxu0 }
 0x2d7   : > { %v1444_v7 = vadd.f32 %v4013_v6, %v4688_v26  ;;  %v1435_v8 = vpop.f32.mrb[45].mxu0 }
 0x2d8   : > { %v1436_v9 = vadd.f32 %v4688_v26, %v1435_v8  ;;  %v4014_v10 = vpop.f32.mrb[46].mxu0  ;;  %4055 = vmatprep.mubr.bf16.mxu1 %v1550_v5 }
 0x2d9   : > { %v1447_v11 = vadd.f32 %v4014_v10, %v4688_v26  ;;  %v1438_v12 = vpop.f32.mrb[47].mxu0  ;;  %4056 = vmatmul.mubr.bf16.gmra.mrb[40].mxu1 %v1551_v4  ;;  %v1528_v14 = vmax.f32 %v1444_v7, 0.0 }
 0x2da   : > { %v1439_v13 = vadd.f32 %v4688_v26, %v1438_v12  ;;  %v1526_v16 = vmax.f32 %v1436_v9, 0.0 }
 0x2db   : > { %v1529_v15 = vmax.f32 %v1447_v11, 0.0 }
 0x2dc   : > { %v1527_v17 = vmax.f32 %v1439_v13, 0.0  ;;  %v4334_v13 = vld [vmem:[%s5038_s9 + $0x38] sm:$0xff]  }
 0x2dd   : > { %v1553_v18 = vpack.c.bf16 %v1529_v15, %v1528_v14  ;;  %4093 = vmatprep.subr.bf16.mxu0 %v4334_v13  ;;  %v4335_v14 = vld [vmem:[%s5040_s11] sm:$0xff]   ;;  %v4337_v15 = vld [vmem:[%s5040_s11 + $0x10] sm:$0xff]  }
 0x2de   : > { %v1552_v19 = vpack.c.bf16 %v1527_v17, %v1526_v16  ;;  %v4017_v20 = vpop.f32.mrb[48].mxu0  ;;  %4094 = vmatpush3.bf16.msra.mxu0 %v4334_v13  ;;  %4127 = vmatprep.subr.bf16.mxu1 %v4335_v14  ;;  %v4338_v16 = vld [vmem:[%s5040_s11 + $0x18] sm:$0xff]   ;;  %v4339_v17 = vld [vmem:[%s5040_s11 + $0x20] sm:$0xff]  }
 0x2df   : > { %v1460_v32 = vadd.f32 %v4017_v20, %v4688_v26  ;;  %v1451_v21 = vpop.f32.mrb[49].mxu0  ;;  %4128 = vmatpush3.bf16.msra.mxu1 %v4335_v14 }
 0x2e0   : > { %v1452_v22 = vadd.f32 %v4688_v26, %v1451_v21  ;;  %v4018_v23 = vpop.f32.mrb[50].mxu0  ;;  %4059 = vmatprep.mubr.bf16.mxu1 %v1552_v19  ;;  %v4341_v19 = vld [vmem:[%s5040_s11 + $0x30] sm:$0xff]  }
 0x2e1   : > { %v1463_v24 = vadd.f32 %v4018_v23, %v4688_v26  ;;  %v1454_v25 = vpop.f32.mrb[51].mxu0  ;;  %4060 = vmatmul.mubr.bf16.gmra.mrb[44].mxu1 %v1553_v18  ;;  %v1532_v27 = vmax.f32 %v1460_v32, 0.0  ;;  %v4340_v18 = vld [vmem:[%s5040_s11 + $0x28] sm:$0xff]   ;;  %v4749_v32 = vld [vmem:[%s5037_s8] ss:$0 sm:$0xff] }
 0x2e2   : > { %v1455_v39 = vadd.f32 %v4688_v26, %v1454_v25  ;;  %v1530_v29 = vmax.f32 %v1452_v22, 0.0 }
 0x2e3   : > { %v1533_v28 = vmax.f32 %v1463_v24, 0.0 }
 0x2e4   : > { %v1531_v30 = vmax.f32 %v1455_v39, 0.0 }
 0x2e5   : > { %v1555_v31 = vpack.c.bf16 %v1533_v28, %v1532_v27 }
 0x2e6   : > { %v1554_v33 = vpack.c.bf16 %v1531_v30, %v1530_v29  ;;  %v4021_v34 = vpop.f32.mrb[52].mxu0 }
 0x2e7   : > { %v1476_v35 = vadd.f32 %v4021_v34, %v4688_v26  ;;  %v1467_v36 = vpop.f32.mrb[53].mxu0 }
 0x2e8   : > { %v1468_v37 = vadd.f32 %v4688_v26, %v1467_v36  ;;  %v4022_v38 = vpop.f32.mrb[54].mxu0  ;;  %4063 = vmatprep.mubr.bf16.mxu1 %v1554_v33 }
 0x2e9   : > { %v1479_v40 = vadd.f32 %v4022_v38, %v4688_v26  ;;  %v1470_v41 = vpop.f32.mrb[55].mxu0  ;;  %4064 = vmatmul.mubr.bf16.gmra.mrb[48].mxu1 %v1555_v31  ;;  %v1536_v43 = vmax.f32 %v1476_v35, 0.0 }
 0x2ea   : > { %v1471_v42 = vadd.f32 %v4688_v26, %v1470_v41  ;;  %v1534_v45 = vmax.f32 %v1468_v37, 0.0 }
 0x2eb   : > { %v1537_v44 = vmax.f32 %v1479_v40, 0.0 }
 0x2ec   : > { %v1535_v46 = vmax.f32 %v1471_v42, 0.0 }
 0x2ed   : > { %v1557_v47 = vpack.c.bf16 %v1537_v44, %v1536_v43 }
 0x2ee   : > { %v1556_v48 = vpack.c.bf16 %v1535_v46, %v1534_v45  ;;  %v4025_v49 = vpop.f32.mrb[56].mxu0 }
 0x2ef   : > { %v1492_v50 = vadd.f32 %v4025_v49, %v4688_v26  ;;  %v1483_v51 = vpop.f32.mrb[57].mxu0 }
 0x2f0   : > { %v1484_v52 = vadd.f32 %v4688_v26, %v1483_v51  ;;  %v4026_v53 = vpop.f32.mrb[58].mxu0  ;;  %4067 = vmatprep.mubr.bf16.mxu1 %v1556_v48 }
 0x2f1   : > { %v1495_v54 = vadd.f32 %v4026_v53, %v4688_v26  ;;  %v1486_v55 = vpop.f32.mrb[59].mxu0  ;;  %4068 = vmatmul.mubr.bf16.gmra.mrb[52].mxu1 %v1557_v47  ;;  %v1540_v57 = vmax.f32 %v1492_v50, 0.0 }
 0x2f2   : > { %v1487_v56 = vadd.f32 %v4688_v26, %v1486_v55  ;;  %v1538_v59 = vmax.f32 %v1484_v52, 0.0 }
 0x2f3   : > { %v1541_v58 = vmax.f32 %v1495_v54, 0.0 }
 0x2f4   : > { %v1539_v60 = vmax.f32 %v1487_v56, 0.0 }
 0x2f5   : > { %v1559_v61 = vpack.c.bf16 %v1541_v58, %v1540_v57 }
 0x2f6   : > { %v1558_v62 = vpack.c.bf16 %v1539_v60, %v1538_v59  ;;  %v4029_v63 = vpop.f32.mrb[60].mxu0 }
 0x2f7   : > { %v1508_v0 = vadd.f32 %v4029_v63, %v4688_v26  ;;  %v1499_v1 = vpop.f32.mrb[61].mxu0 }
 0x2f8   : > { %v1500_v2 = vadd.f32 %v4688_v26, %v1499_v1  ;;  %v4030_v3 = vpop.f32.mrb[62].mxu0  ;;  %4071 = vmatprep.mubr.bf16.mxu1 %v1558_v62 }
 0x2f9   : > { %v1511_v4 = vadd.f32 %v4030_v3, %v4688_v26  ;;  %v1502_v5 = vpop.f32.mrb[63].mxu0  ;;  %4072 = vmatmul.mubr.bf16.gmra.mrb[56].mxu1 %v1559_v61  ;;  %v1544_v7 = vmax.f32 %v1508_v0, 0.0 }
 0x2fa   : > { %v1503_v6 = vadd.f32 %v4688_v26, %v1502_v5  ;;  %v1542_v9 = vmax.f32 %v1500_v2, 0.0  ;;  %v4336_v26 = vld [vmem:[%s5040_s11 + $0x8] sm:$0xff]  }
 0x2fb   : > { %v1545_v8 = vmax.f32 %v1511_v4, 0.0  ;;  %4129 = vmatprep.subr.bf16.mxu1 %v4336_v26 }
 0x2fc   : > { %v1543_v10 = vmax.f32 %v1503_v6, 0.0  ;;  %4130 = vmatpush3.bf16.msra.mxu1 %v4336_v26 }
 0x2fd   : > { %v1561_v11 = vpack.c.bf16 %v1545_v8, %v1544_v7  ;;  %4131 = vmatprep.subr.bf16.mxu1 %v4337_v15 }
 0x2fe   : > { %v1560_v12 = vpack.c.bf16 %v1543_v10, %v1542_v9 }
 0x300   : > { %4075 = vmatprep.mubr.bf16.mxu1 %v1560_v12  ;;  %4132 = vmatpush3.bf16.msra.mxu1 %v4337_v15 }
 0x301   : > { %4076 = vmatmul.mubr.bf16.gmra.mrb[60].mxu1 %v1561_v11  ;;  %4133 = vmatprep.subr.bf16.mxu1 %v4338_v16 }
 0x304   : > { %4134 = vmatpush3.bf16.msra.mxu1 %v4338_v16 }
 0x305   : > { %4135 = vmatprep.subr.bf16.mxu1 %v4339_v17 }
 0x308   : > { %4136 = vmatpush3.bf16.msra.mxu1 %v4339_v17 }
 0x309   : > { %4137 = vmatprep.subr.bf16.mxu1 %v4340_v18 }
 0x30c   : > { %4138 = vmatpush3.bf16.msra.mxu1 %v4340_v18 }
 0x30d   : > { %4139 = vmatprep.subr.bf16.mxu1 %v4341_v19 }
 0x310   : > { %4140 = vmatpush3.bf16.msra.mxu1 %v4341_v19 }
 0x39c   : > { %v4049_v20 = vpop.f32.mrb[32].mxu1 }
 0x39d   : > { %v1667_v21 = vpop.f32.mrb[33].mxu1  ;;  %v1676_v23 = vadd.f32 %v4049_v20, %v4749_v32 }
 0x39e   : > { %v4050_v22 = vpop.f32.mrb[34].mxu1  ;;  %v1668_v39 = vadd.f32 %v4749_v32, %v1667_v21 }
 0x39f   : > { %v1679_v24 = vadd.f32 %v4050_v22, %v4749_v32  ;;  %v1670_v25 = vpop.f32.mrb[35].mxu1 }
 0x3a0   : > { %v1671_v27 = vadd.f32 %v4749_v32, %v1670_v25 }
 0x3a1   : > { %v1795_v28 = vpack.c.bf16 %v1679_v24, %v1676_v23 }
 0x3a2   : > { %v1794_v29 = vpack.c.bf16 %v1671_v27, %v1668_v39 }
 0x3a3   : > { %3665 = vst [vmem:[%s4758_s20 + $0x8] sm:$0xff] %v1795_v28  }
 0x3a4   : > { %3509 = vst [vmem:[%s4758_s20] sm:$0xff] %v1794_v29   ;;  %v4053_v30 = vpop.f32.mrb[36].mxu1  ;;  %4095 = vmatprep.mubr.bf16.mxu0 %v1794_v29 }
 0x3a5   : > { %v1683_v31 = vpop.f32.mrb[37].mxu1  ;;  %4096 = vmatmul.mubr.bf16.vlgmr.msra.gmra.mrb[64].mxu0 %v1795_v28  ;;  %v1692_v34 = vadd.f32 %v4053_v30, %v4749_v32 }
 0x3a6   : > { %v4054_v33 = vpop.f32.mrb[38].mxu1  ;;  %v1684_v37 = vadd.f32 %v4749_v32, %v1683_v31 }
 0x3a7   : > { %v1695_v35 = vadd.f32 %v4054_v33, %v4749_v32  ;;  %v1686_v36 = vpop.f32.mrb[39].mxu1 }
 0x3a8   : > { %v1687_v38 = vadd.f32 %v4749_v32, %v1686_v36 }
 0x3a9   : > { %v1797_v40 = vpack.c.bf16 %v1695_v35, %v1692_v34 }
 0x3aa   : > { %v1796_v41 = vpack.c.bf16 %v1687_v38, %v1684_v37  ;;  %v4342_v38 = vld [vmem:[%s5040_s11 + $0x38] sm:$0xff]  }
 0x3ab   : > { %3667 = vst [vmem:[%s4758_s20 + $0x18] sm:$0xff] %v1797_v40   ;;  %4141 = vmatprep.subr.bf16.mxu1 %v4342_v38 }
 0x3ac   : > { %3666 = vst [vmem:[%s4758_s20 + $0x10] sm:$0xff] %v1796_v41   ;;  %v4057_v42 = vpop.f32.mrb[40].mxu1  ;;  %4099 = vmatprep.mubr.bf16.mxu0 %v1796_v41  ;;  %4142 = vmatpush3.bf16.msra.mxu1 %v4342_v38  ;;  %v4345_v41 = vld [vmem:[%s5042_s13 + $0x10] sm:$0xff]  }
 0x3ad   : > { %v1699_v43 = vpop.f32.mrb[41].mxu1  ;;  %4100 = vmatmul.mubr.bf16.gmra.mrb[68].mxu0 %v1797_v40  ;;  %v1708_v45 = vadd.f32 %v4057_v42, %v4749_v32  ;;  %v4343_v40 = vld [vmem:[%s5042_s13] sm:$0xff]   ;;  %v4346_v42 = vld [vmem:[%s5042_s13 + $0x18] sm:$0xff]  }
 0x3ae   : > { %v4058_v44 = vpop.f32.mrb[42].mxu1  ;;  %v1700_v48 = vadd.f32 %v4749_v32, %v1699_v43  ;;  %4175 = vmatprep.subr.bf16.mxu0 %v4343_v40  ;;  %v4347_v43 = vld [vmem:[%s5042_s13 + $0x20] sm:$0xff]  }
 0x3af   : > { %v1711_v46 = vadd.f32 %v4058_v44, %v4749_v32  ;;  %v1702_v47 = vpop.f32.mrb[43].mxu1  ;;  %4176 = vmatpush3.bf16.msra.mxu0 %v4343_v40  ;;  %v4348_v44 = vld [vmem:[%s5042_s13 + $0x28] sm:$0xff]  }
 0x3b0   : > { %v1703_v49 = vadd.f32 %v4749_v32, %v1702_v47 }
 0x3b1   : > { %v1799_v50 = vpack.c.bf16 %v1711_v46, %v1708_v45  ;;  %v4349_v45 = vld [vmem:[%s5042_s13 + $0x30] sm:$0xff]   ;;  %v4832_v46 = vld [vmem:[%s5039_s10] ss:$0 sm:$0xff] }
 0x3b2   : > { %v1798_v51 = vpack.c.bf16 %v1703_v49, %v1700_v48 }
 0x3b3   : > { %3669 = vst [vmem:[%s4758_s20 + $0x28] sm:$0xff] %v1799_v50  }
 0x3b4   : > { %3668 = vst [vmem:[%s4758_s20 + $0x20] sm:$0xff] %v1798_v51   ;;  %v4061_v52 = vpop.f32.mrb[44].mxu1  ;;  %4103 = vmatprep.mubr.bf16.mxu0 %v1798_v51 }
 0x3b5   : > { %v1715_v53 = vpop.f32.mrb[45].mxu1  ;;  %4104 = vmatmul.mubr.bf16.gmra.mrb[72].mxu0 %v1799_v50  ;;  %v1724_v55 = vadd.f32 %v4061_v52, %v4749_v32 }
 0x3b6   : > { %v4062_v54 = vpop.f32.mrb[46].mxu1  ;;  %v1716_v58 = vadd.f32 %v4749_v32, %v1715_v53 }
 0x3b7   : > { %v1727_v56 = vadd.f32 %v4062_v54, %v4749_v32  ;;  %v1718_v57 = vpop.f32.mrb[47].mxu1 }
 0x3b8   : > { %v1719_v59 = vadd.f32 %v4749_v32, %v1718_v57 }
 0x3b9   : > { %v1801_v60 = vpack.c.bf16 %v1727_v56, %v1724_v55 }
 0x3ba   : > { %v1800_v61 = vpack.c.bf16 %v1719_v59, %v1716_v58 }
 0x3bb   : > { %3671 = vst [vmem:[%s4758_s20 + $0x38] sm:$0xff] %v1801_v60  }
 0x3bc   : > { %3670 = vst [vmem:[%s4758_s20 + $0x30] sm:$0xff] %v1800_v61   ;;  %v4065_v62 = vpop.f32.mrb[48].mxu1  ;;  %4107 = vmatprep.mubr.bf16.mxu0 %v1800_v61 }
 0x3bd   : > { %v1731_v63 = vpop.f32.mrb[49].mxu1  ;;  %4108 = vmatmul.mubr.bf16.gmra.mrb[76].mxu0 %v1801_v60  ;;  %v1740_v1 = vadd.f32 %v4065_v62, %v4749_v32 }
 0x3be   : > { %v4066_v0 = vpop.f32.mrb[50].mxu1  ;;  %v1732_v4 = vadd.f32 %v4749_v32, %v1731_v63 }
 0x3bf   : > { %v1743_v2 = vadd.f32 %v4066_v0, %v4749_v32  ;;  %v1734_v3 = vpop.f32.mrb[51].mxu1 }
 0x3c0   : > { %v1735_v5 = vadd.f32 %v4749_v32, %v1734_v3 }
 0x3c1   : > { %v1803_v6 = vpack.c.bf16 %v1743_v2, %v1740_v1 }
 0x3c2   : > { %v1802_v7 = vpack.c.bf16 %v1735_v5, %v1732_v4 }
 0x3c3   : > { %3673 = vst [vmem:[%s4758_s20 + $0x48] sm:$0xff] %v1803_v6  }
 0x3c4   : > { %3672 = vst [vmem:[%s4758_s20 + $0x40] sm:$0xff] %v1802_v7   ;;  %v4069_v8 = vpop.f32.mrb[52].mxu1  ;;  %4111 = vmatprep.mubr.bf16.mxu0 %v1802_v7 }
 0x3c5   : > { %v1747_v9 = vpop.f32.mrb[53].mxu1  ;;  %4112 = vmatmul.mubr.bf16.gmra.mrb[80].mxu0 %v1803_v6  ;;  %v1756_v11 = vadd.f32 %v4069_v8, %v4749_v32 }
 0x3c6   : > { %v4070_v10 = vpop.f32.mrb[54].mxu1  ;;  %v1748_v14 = vadd.f32 %v4749_v32, %v1747_v9 }
 0x3c7   : > { %v1759_v12 = vadd.f32 %v4070_v10, %v4749_v32  ;;  %v1750_v13 = vpop.f32.mrb[55].mxu1 }
 0x3c8   : > { %v1751_v26 = vadd.f32 %v4749_v32, %v1750_v13 }
 0x3c9   : > { %v1805_v15 = vpack.c.bf16 %v1759_v12, %v1756_v11 }
 0x3ca   : > { %v1804_v16 = vpack.c.bf16 %v1751_v26, %v1748_v14 }
 0x3cb   : > { %3675 = vst [vmem:[%s4758_s20 + $0x58] sm:$0xff] %v1805_v15  }
 0x3cc   : > { %3674 = vst [vmem:[%s4758_s20 + $0x50] sm:$0xff] %v1804_v16   ;;  %v4073_v17 = vpop.f32.mrb[56].mxu1  ;;  %4115 = vmatprep.mubr.bf16.mxu0 %v1804_v16 }
 0x3cd   : > { %v1763_v18 = vpop.f32.mrb[57].mxu1  ;;  %4116 = vmatmul.mubr.bf16.gmra.mrb[84].mxu0 %v1805_v15  ;;  %v1772_v20 = vadd.f32 %v4073_v17, %v4749_v32 }
 0x3ce   : > { %v4074_v19 = vpop.f32.mrb[58].mxu1  ;;  %v1764_v23 = vadd.f32 %v4749_v32, %v1763_v18 }
 0x3cf   : > { %v1775_v21 = vadd.f32 %v4074_v19, %v4749_v32  ;;  %v1766_v22 = vpop.f32.mrb[59].mxu1 }
 0x3d0   : > { %v1767_v24 = vadd.f32 %v4749_v32, %v1766_v22 }
 0x3d1   : > { %v1807_v25 = vpack.c.bf16 %v1775_v21, %v1772_v20 }
 0x3d2   : > { %v1806_v39 = vpack.c.bf16 %v1767_v24, %v1764_v23 }
 0x3d3   : > { %3677 = vst [vmem:[%s4758_s20 + $0x68] sm:$0xff] %v1807_v25  }
 0x3d4   : > { %3676 = vst [vmem:[%s4758_s20 + $0x60] sm:$0xff] %v1806_v39   ;;  %v4077_v27 = vpop.f32.mrb[60].mxu1  ;;  %4119 = vmatprep.mubr.bf16.mxu0 %v1806_v39 }
 0x3d5   : > { %v1779_v28 = vpop.f32.mrb[61].mxu1  ;;  %4120 = vmatmul.mubr.bf16.gmra.mrb[88].mxu0 %v1807_v25  ;;  %v1788_v30 = vadd.f32 %v4077_v27, %v4749_v32 }
 0x3d6   : > { %v4078_v29 = vpop.f32.mrb[62].mxu1  ;;  %v1780_v34 = vadd.f32 %v4749_v32, %v1779_v28 }
 0x3d7   : > { %v1791_v31 = vadd.f32 %v4078_v29, %v4749_v32  ;;  %v1782_v33 = vpop.f32.mrb[63].mxu1 }
 0x3d8   : > { %v1783_v35 = vadd.f32 %v4749_v32, %v1782_v33  ;;  %v4344_v32 = vld [vmem:[%s5042_s13 + $0x8] sm:$0xff]  }
 0x3d9   : > { %v1809_v36 = vpack.c.bf16 %v1791_v31, %v1788_v30  ;;  %4177 = vmatprep.subr.bf16.mxu0 %v4344_v32 }
 0x3da   : > { %v1808_v37 = vpack.c.bf16 %v1783_v35, %v1780_v34  ;;  %4178 = vmatpush3.bf16.msra.mxu0 %v4344_v32 }
 0x3db   : > { %3679 = vst [vmem:[%s4758_s20 + $0x78] sm:$0xff] %v1809_v36   ;;  %4179 = vmatprep.subr.bf16.mxu0 %v4345_v41 }
 0x3dc   : > { %3678 = vst [vmem:[%s4758_s20 + $0x70] sm:$0xff] %v1808_v37   ;;  %4123 = vmatprep.mubr.bf16.mxu0 %v1808_v37 }
 0x3dd   : > { %4124 = vmatmul.mubr.bf16.gmra.mrb[92].mxu0 %v1809_v36 }
 0x3de   : > { %4180 = vmatpush3.bf16.msra.mxu0 %v4345_v41 }
 0x3df   : > { %4181 = vmatprep.subr.bf16.mxu0 %v4346_v42 }
 0x3e2   : > { %4182 = vmatpush3.bf16.msra.mxu0 %v4346_v42 }
 0x3e3   : > { %4183 = vmatprep.subr.bf16.mxu0 %v4347_v43 }
 0x3e6   : > { %4184 = vmatpush3.bf16.msra.mxu0 %v4347_v43 }
 0x3e7   : > { %4185 = vmatprep.subr.bf16.mxu0 %v4348_v44 }
 0x3ea   : > { %4186 = vmatpush3.bf16.msra.mxu0 %v4348_v44 }
 0x3eb   : > { %4187 = vmatprep.subr.bf16.mxu0 %v4349_v45 }
 0x3ee   : > { %4188 = vmatpush3.bf16.msra.mxu0 %v4349_v45 }
 0x478   : > { %v4097_v47 = vpop.f32.mrb[64].mxu0 }
 0x479   : > { %v2068_v48 = vadd.f32 %v4097_v47, %v4832_v46  ;;  %v2059_v49 = vpop.f32.mrb[65].mxu0 }
 0x47a   : > { %v2060_v50 = vadd.f32 %v4832_v46, %v2059_v49  ;;  %v4098_v51 = vpop.f32.mrb[66].mxu0 }
 0x47b   : > { %v2071_v52 = vadd.f32 %v4098_v51, %v4832_v46  ;;  %v2062_v53 = vpop.f32.mrb[67].mxu0  ;;  %v2188_v55 = vmax.f32 %v2068_v48, 0.0 }
 0x47c   : > { %v2063_v54 = vadd.f32 %v4832_v46, %v2062_v53  ;;  %v2186_v57 = vmax.f32 %v2060_v50, 0.0 }
 0x47d   : > { %v2189_v56 = vmax.f32 %v2071_v52, 0.0 }
 0x47e   : > { %v2187_v58 = vmax.f32 %v2063_v54, 0.0 }
 0x47f   : > { %v2219_v59 = vpack.c.bf16 %v2189_v56, %v2188_v55 }
 0x480   : > { %v2218_v60 = vpack.c.bf16 %v2187_v58, %v2186_v57  ;;  %v4101_v61 = vpop.f32.mrb[68].mxu0 }
 0x481   : > { %v2084_v62 = vadd.f32 %v4101_v61, %v4832_v46  ;;  %v2075_v63 = vpop.f32.mrb[69].mxu0 }
 0x482   : > { %v2076_v0 = vadd.f32 %v4832_v46, %v2075_v63  ;;  %v4102_v1 = vpop.f32.mrb[70].mxu0  ;;  %4143 = vmatprep.mubr.bf16.mxu1 %v2218_v60 }
 0x483   : > { %v2087_v2 = vadd.f32 %v4102_v1, %v4832_v46  ;;  %v2078_v3 = vpop.f32.mrb[71].mxu0  ;;  %4144 = vmatmul.mubr.bf16.vlgmr.msra.gmra.mrb[64].mxu1 %v2219_v59  ;;  %v2192_v5 = vmax.f32 %v2084_v62, 0.0 }
 0x484   : > { %v2079_v4 = vadd.f32 %v4832_v46, %v2078_v3  ;;  %v2190_v7 = vmax.f32 %v2076_v0, 0.0 }
 0x485   : > { %v2193_v6 = vmax.f32 %v2087_v2, 0.0 }
 0x486   : > { %v2191_v8 = vmax.f32 %v2079_v4, 0.0 }
 0x487   : > { %v2221_v9 = vpack.c.bf16 %v2193_v6, %v2192_v5 }
 0x488   : > { %v2220_v10 = vpack.c.bf16 %v2191_v8, %v2190_v7  ;;  %v4105_v11 = vpop.f32.mrb[72].mxu0 }
 0x489   : > { %v2100_v12 = vadd.f32 %v4105_v11, %v4832_v46  ;;  %v2091_v13 = vpop.f32.mrb[73].mxu0 }
 0x48a   : > { %v2092_v14 = vadd.f32 %v4832_v46, %v2091_v13  ;;  %v4106_v26 = vpop.f32.mrb[74].mxu0  ;;  %4147 = vmatprep.mubr.bf16.mxu1 %v2220_v10 }
 0x48b   : > { %v2103_v15 = vadd.f32 %v4106_v26, %v4832_v46  ;;  %v2094_v16 = vpop.f32.mrb[75].mxu0  ;;  %4148 = vmatmul.mubr.bf16.gmra.mrb[68].mxu1 %v2221_v9  ;;  %v2196_v18 = vmax.f32 %v2100_v12, 0.0 }
 0x48c   : > { %v2095_v17 = vadd.f32 %v4832_v46, %v2094_v16  ;;  %v2194_v20 = vmax.f32 %v2092_v14, 0.0 }
 0x48d   : > { %v2197_v19 = vmax.f32 %v2103_v15, 0.0 }
 0x48e   : > { %v2195_v21 = vmax.f32 %v2095_v17, 0.0 }
 0x48f   : > { %v2223_v22 = vpack.c.bf16 %v2197_v19, %v2196_v18 }
 0x490   : > { %v2222_v23 = vpack.c.bf16 %v2195_v21, %v2194_v20  ;;  %v4109_v24 = vpop.f32.mrb[76].mxu0 }
 0x491   : > { %v2116_v25 = vadd.f32 %v4109_v24, %v4832_v46  ;;  %v2107_v39 = vpop.f32.mrb[77].mxu0 }
 0x492   : > { %v2108_v27 = vadd.f32 %v4832_v46, %v2107_v39  ;;  %v4110_v28 = vpop.f32.mrb[78].mxu0  ;;  %4151 = vmatprep.mubr.bf16.mxu1 %v2222_v23 }
 0x493   : > { %v2119_v29 = vadd.f32 %v4110_v28, %v4832_v46  ;;  %v2110_v30 = vpop.f32.mrb[79].mxu0  ;;  %4152 = vmatmul.mubr.bf16.gmra.mrb[72].mxu1 %v2223_v22  ;;  %v2200_v33 = vmax.f32 %v2116_v25, 0.0 }
 0x494   : > { %v2111_v31 = vadd.f32 %v4832_v46, %v2110_v30  ;;  %v2198_v35 = vmax.f32 %v2108_v27, 0.0 }
 0x495   : > { %v2201_v34 = vmax.f32 %v2119_v29, 0.0 }
 0x496   : > { %v2199_v36 = vmax.f32 %v2111_v31, 0.0  ;;  %v4350_v31 = vld [vmem:[%s5042_s13 + $0x38] sm:$0xff]  }
 0x497   : > { %v2225_v37 = vpack.c.bf16 %v2201_v34, %v2200_v33  ;;  %4189 = vmatprep.subr.bf16.mxu0 %v4350_v31  ;;  %v4351_v33 = vld [vmem:[%s5044_s15] sm:$0xff]   ;;  %v4353_v34 = vld [vmem:[%s5044_s15 + $0x10] sm:$0xff]  }
 0x498   : > { %v2224_v38 = vpack.c.bf16 %v2199_v36, %v2198_v35  ;;  %v4113_v40 = vpop.f32.mrb[80].mxu0  ;;  %4190 = vmatpush3.bf16.msra.mxu0 %v4350_v31  ;;  %4223 = vmatprep.subr.bf16.mxu1 %v4351_v33  ;;  %v4354_v35 = vld [vmem:[%s5044_s15 + $0x18] sm:$0xff]   ;;  %v4355_v36 = vld [vmem:[%s5044_s15 + $0x20] sm:$0xff]  }
 0x499   : > { %v2132_v32 = vadd.f32 %v4113_v40, %v4832_v46  ;;  %v2123_v41 = vpop.f32.mrb[81].mxu0  ;;  %4224 = vmatpush3.bf16.msra.mxu1 %v4351_v33  ;;  %v4893_v40 = vld [vmem:[%s5041_s12] ss:$0 sm:$0xff] }
 0x49a   : > { %v2124_v42 = vadd.f32 %v4832_v46, %v2123_v41  ;;  %v4114_v43 = vpop.f32.mrb[82].mxu0  ;;  %4155 = vmatprep.mubr.bf16.mxu1 %v2224_v38  ;;  %v4357_v38 = vld [vmem:[%s5044_s15 + $0x30] sm:$0xff]  }
 0x49b   : > { %v2135_v44 = vadd.f32 %v4114_v43, %v4832_v46  ;;  %v2126_v45 = vpop.f32.mrb[83].mxu0  ;;  %4156 = vmatmul.mubr.bf16.gmra.mrb[76].mxu1 %v2225_v37  ;;  %v2204_v48 = vmax.f32 %v2132_v32, 0.0  ;;  %v4356_v37 = vld [vmem:[%s5044_s15 + $0x28] sm:$0xff]  }
 0x49c   : > { %v2127_v47 = vadd.f32 %v4832_v46, %v2126_v45  ;;  %v2202_v50 = vmax.f32 %v2124_v42, 0.0 }
 0x49d   : > { %v2205_v49 = vmax.f32 %v2135_v44, 0.0 }
 0x49e   : > { %v2203_v51 = vmax.f32 %v2127_v47, 0.0 }
 0x49f   : > { %v2227_v52 = vpack.c.bf16 %v2205_v49, %v2204_v48 }
 0x4a0   : > { %v2226_v53 = vpack.c.bf16 %v2203_v51, %v2202_v50  ;;  %v4117_v54 = vpop.f32.mrb[84].mxu0 }
 0x4a1   : > { %v2148_v55 = vadd.f32 %v4117_v54, %v4832_v46  ;;  %v2139_v56 = vpop.f32.mrb[85].mxu0 }
 0x4a2   : > { %v2140_v57 = vadd.f32 %v4832_v46, %v2139_v56  ;;  %v4118_v58 = vpop.f32.mrb[86].mxu0  ;;  %4159 = vmatprep.mubr.bf16.mxu1 %v2226_v53 }
 0x4a3   : > { %v2151_v59 = vadd.f32 %v4118_v58, %v4832_v46  ;;  %v2142_v60 = vpop.f32.mrb[87].mxu0  ;;  %4160 = vmatmul.mubr.bf16.gmra.mrb[80].mxu1 %v2227_v52  ;;  %v2208_v62 = vmax.f32 %v2148_v55, 0.0 }
 0x4a4   : > { %v2143_v61 = vadd.f32 %v4832_v46, %v2142_v60  ;;  %v2206_v0 = vmax.f32 %v2140_v57, 0.0 }
 0x4a5   : > { %v2209_v63 = vmax.f32 %v2151_v59, 0.0 }
 0x4a6   : > { %v2207_v1 = vmax.f32 %v2143_v61, 0.0 }
 0x4a7   : > { %v2229_v2 = vpack.c.bf16 %v2209_v63, %v2208_v62 }
 0x4a8   : > { %v2228_v3 = vpack.c.bf16 %v2207_v1, %v2206_v0  ;;  %v4121_v4 = vpop.f32.mrb[88].mxu0 }
 0x4a9   : > { %v2164_v5 = vadd.f32 %v4121_v4, %v4832_v46  ;;  %v2155_v6 = vpop.f32.mrb[89].mxu0 }
 0x4aa   : > { %v2156_v7 = vadd.f32 %v4832_v46, %v2155_v6  ;;  %v4122_v8 = vpop.f32.mrb[90].mxu0  ;;  %4163 = vmatprep.mubr.bf16.mxu1 %v2228_v3 }
 0x4ab   : > { %v2167_v9 = vadd.f32 %v4122_v8, %v4832_v46  ;;  %v2158_v10 = vpop.f32.mrb[91].mxu0  ;;  %4164 = vmatmul.mubr.bf16.gmra.mrb[84].mxu1 %v2229_v2  ;;  %v2212_v12 = vmax.f32 %v2164_v5, 0.0 }
 0x4ac   : > { %v2159_v11 = vadd.f32 %v4832_v46, %v2158_v10  ;;  %v2210_v14 = vmax.f32 %v2156_v7, 0.0 }
 0x4ad   : > { %v2213_v13 = vmax.f32 %v2167_v9, 0.0 }
 0x4ae   : > { %v2211_v26 = vmax.f32 %v2159_v11, 0.0 }
 0x4af   : > { %v2231_v15 = vpack.c.bf16 %v2213_v13, %v2212_v12 }
 0x4b0   : > { %v2230_v16 = vpack.c.bf16 %v2211_v26, %v2210_v14  ;;  %v4125_v17 = vpop.f32.mrb[92].mxu0 }
 0x4b1   : > { %v2180_v18 = vadd.f32 %v4125_v17, %v4832_v46  ;;  %v2171_v19 = vpop.f32.mrb[93].mxu0 }
 0x4b2   : > { %v2172_v20 = vadd.f32 %v4832_v46, %v2171_v19  ;;  %v4126_v21 = vpop.f32.mrb[94].mxu0  ;;  %4167 = vmatprep.mubr.bf16.mxu1 %v2230_v16 }
 0x4b3   : > { %v2183_v22 = vadd.f32 %v4126_v21, %v4832_v46  ;;  %v2174_v23 = vpop.f32.mrb[95].mxu0  ;;  %4168 = vmatmul.mubr.bf16.gmra.mrb[88].mxu1 %v2231_v15  ;;  %v2216_v25 = vmax.f32 %v2180_v18, 0.0 }
 0x4b4   : > { %v2175_v24 = vadd.f32 %v4832_v46, %v2174_v23  ;;  %v2214_v27 = vmax.f32 %v2172_v20, 0.0  ;;  %v4352_v46 = vld [vmem:[%s5044_s15 + $0x8] sm:$0xff]  }
 0x4b5   : > { %v2217_v39 = vmax.f32 %v2183_v22, 0.0  ;;  %4225 = vmatprep.subr.bf16.mxu1 %v4352_v46 }
 0x4b6   : > { %v2215_v28 = vmax.f32 %v2175_v24, 0.0  ;;  %4226 = vmatpush3.bf16.msra.mxu1 %v4352_v46 }
 0x4b7   : > { %v2233_v29 = vpack.c.bf16 %v2217_v39, %v2216_v25  ;;  %4227 = vmatprep.subr.bf16.mxu1 %v4353_v34 }
 0x4b8   : > { %v2232_v30 = vpack.c.bf16 %v2215_v28, %v2214_v27 }
 0x4ba   : > { %4171 = vmatprep.mubr.bf16.mxu1 %v2232_v30  ;;  %4228 = vmatpush3.bf16.msra.mxu1 %v4353_v34 }
 0x4bb   : > { %4172 = vmatmul.mubr.bf16.gmra.mrb[92].mxu1 %v2233_v29  ;;  %4229 = vmatprep.subr.bf16.mxu1 %v4354_v35 }
 0x4be   : > { %4230 = vmatpush3.bf16.msra.mxu1 %v4354_v35 }
 0x4bf   : > { %4231 = vmatprep.subr.bf16.mxu1 %v4355_v36 }
 0x4c2   : > { %4232 = vmatpush3.bf16.msra.mxu1 %v4355_v36 }
 0x4c3   : > { %4233 = vmatprep.subr.bf16.mxu1 %v4356_v37 }
 0x4c6   : > { %4234 = vmatpush3.bf16.msra.mxu1 %v4356_v37 }
 0x4c7   : > { %4235 = vmatprep.subr.bf16.mxu1 %v4357_v38 }
 0x4ca   : > { %4236 = vmatpush3.bf16.msra.mxu1 %v4357_v38 }
 0x556   : > { %v4145_v32 = vpop.f32.mrb[64].mxu1 }
 0x557   : > { %v2348_v41 = vadd.f32 %v4145_v32, %v4893_v40  ;;  %v2339_v42 = vpop.f32.mrb[65].mxu1 }
 0x558   : > { %v2340_v43 = vadd.f32 %v4893_v40, %v2339_v42  ;;  %v4146_v44 = vpop.f32.mrb[66].mxu1 }
 0x559   : > { %v2351_v45 = vadd.f32 %v4146_v44, %v4893_v40  ;;  %v2342_v47 = vpop.f32.mrb[67].mxu1  ;;  %v2468_v49 = vmax.f32 %v2348_v41, 0.0 }
 0x55a   : > { %v2343_v48 = vadd.f32 %v4893_v40, %v2342_v47  ;;  %v2466_v51 = vmax.f32 %v2340_v43, 0.0 }
 0x55b   : > { %v2469_v50 = vmax.f32 %v2351_v45, 0.0 }
 0x55c   : > { %v2467_v52 = vmax.f32 %v2343_v48, 0.0 }
 0x55d   : > { %v2499_v53 = vpack.c.bf16 %v2469_v50, %v2468_v49 }
 0x55e   : > { %v2498_v54 = vpack.c.bf16 %v2467_v52, %v2466_v51  ;;  %v4149_v55 = vpop.f32.mrb[68].mxu1 }
 0x55f   : > { %v2364_v56 = vadd.f32 %v4149_v55, %v4893_v40  ;;  %v2355_v57 = vpop.f32.mrb[69].mxu1 }
 0x560   : > { %v2356_v58 = vadd.f32 %v4893_v40, %v2355_v57  ;;  %v4150_v59 = vpop.f32.mrb[70].mxu1  ;;  %4191 = vmatprep.mubr.bf16.mxu0 %v2498_v54 }
 0x561   : > { %v2367_v60 = vadd.f32 %v4150_v59, %v4893_v40  ;;  %v2358_v61 = vpop.f32.mrb[71].mxu1  ;;  %4192 = vmatmul.mubr.bf16.vlgmr.msra.gmra.mrb[96].mxu0 %v2499_v53  ;;  %v2472_v63 = vmax.f32 %v2364_v56, 0.0 }
 0x562   : > { %v2359_v62 = vadd.f32 %v4893_v40, %v2358_v61  ;;  %v2470_v1 = vmax.f32 %v2356_v58, 0.0 }
 0x563   : > { %v2473_v0 = vmax.f32 %v2367_v60, 0.0 }
 0x564   : > { %v2471_v2 = vmax.f32 %v2359_v62, 0.0 }
 0x565   : > { %v2501_v3 = vpack.c.bf16 %v2473_v0, %v2472_v63 }
 0x566   : > { %v2500_v4 = vpack.c.bf16 %v2471_v2, %v2470_v1  ;;  %v4153_v5 = vpop.f32.mrb[72].mxu1 }
 0x567   : > { %v2380_v6 = vadd.f32 %v4153_v5, %v4893_v40  ;;  %v2371_v7 = vpop.f32.mrb[73].mxu1 }
 0x568   : > { %v2372_v8 = vadd.f32 %v4893_v40, %v2371_v7  ;;  %v4154_v9 = vpop.f32.mrb[74].mxu1  ;;  %4195 = vmatprep.mubr.bf16.mxu0 %v2500_v4 }
 0x569   : > { %v2383_v10 = vadd.f32 %v4154_v9, %v4893_v40  ;;  %v2374_v11 = vpop.f32.mrb[75].mxu1  ;;  %4196 = vmatmul.mubr.bf16.gmra.mrb[100].mxu0 %v2501_v3  ;;  %v2476_v13 = vmax.f32 %v2380_v6, 0.0 }
 0x56a   : > { %v2375_v12 = vadd.f32 %v4893_v40, %v2374_v11  ;;  %v2474_v26 = vmax.f32 %v2372_v8, 0.0 }
 0x56b   : > { %v2477_v14 = vmax.f32 %v2383_v10, 0.0 }
 0x56c   : > { %v2475_v15 = vmax.f32 %v2375_v12, 0.0 }
 0x56d   : > { %v2503_v16 = vpack.c.bf16 %v2477_v14, %v2476_v13 }
 0x56e   : > { %v2502_v17 = vpack.c.bf16 %v2475_v15, %v2474_v26  ;;  %v4157_v18 = vpop.f32.mrb[76].mxu1 }
 0x56f   : > { %v2396_v19 = vadd.f32 %v4157_v18, %v4893_v40  ;;  %v2387_v20 = vpop.f32.mrb[77].mxu1 }
 0x570   : > { %v2388_v21 = vadd.f32 %v4893_v40, %v2387_v20  ;;  %v4158_v22 = vpop.f32.mrb[78].mxu1  ;;  %4199 = vmatprep.mubr.bf16.mxu0 %v2502_v17 }
 0x571   : > { %v2399_v23 = vadd.f32 %v4158_v22, %v4893_v40  ;;  %v2390_v24 = vpop.f32.mrb[79].mxu1  ;;  %4200 = vmatmul.mubr.bf16.gmra.mrb[104].mxu0 %v2503_v16  ;;  %v2480_v39 = vmax.f32 %v2396_v19, 0.0 }
 0x572   : > { %v2391_v25 = vadd.f32 %v4893_v40, %v2390_v24  ;;  %v2478_v28 = vmax.f32 %v2388_v21, 0.0 }
 0x573   : > { %v2481_v27 = vmax.f32 %v2399_v23, 0.0 }
 0x574   : > { %v2479_v29 = vmax.f32 %v2391_v25, 0.0  ;;  %v4358_v25 = vld [vmem:[%s5044_s15 + $0x38] sm:$0xff]  }
 0x575   : > { %v2505_v30 = vpack.c.bf16 %v2481_v27, %v2480_v39  ;;  %4237 = vmatprep.subr.bf16.mxu1 %v4358_v25  ;;  %v4933_v39 = vld [vmem:[%s5043_s14] ss:$0 sm:$0xff] }
 0x576   : > { %v2504_v31 = vpack.c.bf16 %v2479_v29, %v2478_v28  ;;  %v4161_v33 = vpop.f32.mrb[80].mxu1  ;;  %4238 = vmatpush3.bf16.msra.mxu1 %v4358_v25 }
 0x577   : > { %v2412_v46 = vadd.f32 %v4161_v33, %v4893_v40  ;;  %v2403_v34 = vpop.f32.mrb[81].mxu1 }
 0x578   : > { %v2404_v35 = vadd.f32 %v4893_v40, %v2403_v34  ;;  %v4162_v36 = vpop.f32.mrb[82].mxu1  ;;  %4203 = vmatprep.mubr.bf16.mxu0 %v2504_v31 }
 0x579   : > { %v2415_v37 = vadd.f32 %v4162_v36, %v4893_v40  ;;  %v2406_v38 = vpop.f32.mrb[83].mxu1  ;;  %4204 = vmatmul.mubr.bf16.gmra.mrb[108].mxu0 %v2505_v30  ;;  %v2484_v41 = vmax.f32 %v2412_v46, 0.0 }
 0x57a   : > { %v2407_v32 = vadd.f32 %v4893_v40, %v2406_v38  ;;  %v2482_v43 = vmax.f32 %v2404_v35, 0.0 }
 0x57b   : > { %v2485_v42 = vmax.f32 %v2415_v37, 0.0 }
 0x57c   : > { %v2483_v44 = vmax.f32 %v2407_v32, 0.0 }
 0x57d   : > { %v2507_v45 = vpack.c.bf16 %v2485_v42, %v2484_v41 }
 0x57e   : > { %v2506_v47 = vpack.c.bf16 %v2483_v44, %v2482_v43  ;;  %v4165_v48 = vpop.f32.mrb[84].mxu1 }
 0x57f   : > { %v2428_v49 = vadd.f32 %v4165_v48, %v4893_v40  ;;  %v2419_v50 = vpop.f32.mrb[85].mxu1 }
 0x580   : > { %v2420_v51 = vadd.f32 %v4893_v40, %v2419_v50  ;;  %v4166_v52 = vpop.f32.mrb[86].mxu1  ;;  %4207 = vmatprep.mubr.bf16.mxu0 %v2506_v47 }
 0x581   : > { %v2431_v53 = vadd.f32 %v4166_v52, %v4893_v40  ;;  %v2422_v54 = vpop.f32.mrb[87].mxu1  ;;  %4208 = vmatmul.mubr.bf16.gmra.mrb[112].mxu0 %v2507_v45  ;;  %v2488_v56 = vmax.f32 %v2428_v49, 0.0 }
 0x582   : > { %v2423_v55 = vadd.f32 %v4893_v40, %v2422_v54  ;;  %v2486_v58 = vmax.f32 %v2420_v51, 0.0 }
 0x583   : > { %v2489_v57 = vmax.f32 %v2431_v53, 0.0 }
 0x584   : > { %v2487_v59 = vmax.f32 %v2423_v55, 0.0 }
 0x585   : > { %v2509_v60 = vpack.c.bf16 %v2489_v57, %v2488_v56 }
 0x586   : > { %v2508_v61 = vpack.c.bf16 %v2487_v59, %v2486_v58  ;;  %v4169_v62 = vpop.f32.mrb[88].mxu1 }
 0x587   : > { %v2444_v63 = vadd.f32 %v4169_v62, %v4893_v40  ;;  %v2435_v0 = vpop.f32.mrb[89].mxu1 }
 0x588   : > { %v2436_v1 = vadd.f32 %v4893_v40, %v2435_v0  ;;  %v4170_v2 = vpop.f32.mrb[90].mxu1  ;;  %4211 = vmatprep.mubr.bf16.mxu0 %v2508_v61 }
 0x589   : > { %v2447_v3 = vadd.f32 %v4170_v2, %v4893_v40  ;;  %v2438_v4 = vpop.f32.mrb[91].mxu1  ;;  %4212 = vmatmul.mubr.bf16.gmra.mrb[116].mxu0 %v2509_v60  ;;  %v2492_v6 = vmax.f32 %v2444_v63, 0.0 }
 0x58a   : > { %v2439_v5 = vadd.f32 %v4893_v40, %v2438_v4  ;;  %v2490_v8 = vmax.f32 %v2436_v1, 0.0 }
 0x58b   : > { %v2493_v7 = vmax.f32 %v2447_v3, 0.0 }
 0x58c   : > { %v2491_v9 = vmax.f32 %v2439_v5, 0.0 }
 0x58d   : > { %v2511_v10 = vpack.c.bf16 %v2493_v7, %v2492_v6 }
 0x58e   : > { %v2510_v11 = vpack.c.bf16 %v2491_v9, %v2490_v8  ;;  %v4173_v12 = vpop.f32.mrb[92].mxu1 }
 0x58f   : > { %v2460_v13 = vadd.f32 %v4173_v12, %v4893_v40  ;;  %v2451_v14 = vpop.f32.mrb[93].mxu1 }
 0x590   : > { %v2452_v26 = vadd.f32 %v4893_v40, %v2451_v14  ;;  %v4174_v15 = vpop.f32.mrb[94].mxu1  ;;  %4215 = vmatprep.mubr.bf16.mxu0 %v2510_v11 }
 0x591   : > { %v2463_v16 = vadd.f32 %v4174_v15, %v4893_v40  ;;  %v2454_v17 = vpop.f32.mrb[95].mxu1  ;;  %4216 = vmatmul.mubr.bf16.gmra.mrb[120].mxu0 %v2511_v10  ;;  %v2496_v19 = vmax.f32 %v2460_v13, 0.0 }
 0x592   : > { %v2455_v18 = vadd.f32 %v4893_v40, %v2454_v17  ;;  %v2494_v21 = vmax.f32 %v2452_v26, 0.0 }
 0x593   : > { %v2497_v20 = vmax.f32 %v2463_v16, 0.0 }
 0x594   : > { %v2495_v22 = vmax.f32 %v2455_v18, 0.0 }
 0x595   : > { %v2513_v23 = vpack.c.bf16 %v2497_v20, %v2496_v19 }
 0x596   : > { %v2512_v24 = vpack.c.bf16 %v2495_v22, %v2494_v21 }
 0x598   : > { %4219 = vmatprep.mubr.bf16.mxu0 %v2512_v24 }
 0x599   : > { %4220 = vmatmul.mubr.bf16.gmra.mrb[124].mxu0 %v2513_v23 }
 0x634   : > { %v4193_v40 = vpop.f32.mrb[96].mxu0 }
 0x635   : > { %v2628_v27 = vadd.f32 %v4193_v40, %v4933_v39  ;;  %v2619_v28 = vpop.f32.mrb[97].mxu0 }
 0x636   : > { %v2620_v29 = vadd.f32 %v4933_v39, %v2619_v28  ;;  %v4194_v30 = vpop.f32.mrb[98].mxu0 }
 0x637   : > { %v2631_v31 = vadd.f32 %v4194_v30, %v4933_v39  ;;  %v2622_v33 = vpop.f32.mrb[99].mxu0  ;;  %v2748_v34 = vmax.f32 %v2628_v27, 0.0 }
 0x638   : > { %v2623_v46 = vadd.f32 %v4933_v39, %v2622_v33  ;;  %v2746_v36 = vmax.f32 %v2620_v29, 0.0 }
 0x639   : > { %v2749_v35 = vmax.f32 %v2631_v31, 0.0 }
 0x63a   : > { %v2747_v37 = vmax.f32 %v2623_v46, 0.0 }
 0x63b   : > { %v2779_v38 = vpack.c.bf16 %v2749_v35, %v2748_v34 }
 0x63c   : > { %v2778_v32 = vpack.c.bf16 %v2747_v37, %v2746_v36  ;;  %v4197_v41 = vpop.f32.mrb[100].mxu0 }
 0x63d   : > { %v2644_v42 = vadd.f32 %v4197_v41, %v4933_v39  ;;  %v2635_v43 = vpop.f32.mrb[101].mxu0 }
 0x63e   : > { %v2636_v44 = vadd.f32 %v4933_v39, %v2635_v43  ;;  %v4198_v45 = vpop.f32.mrb[102].mxu0  ;;  %4239 = vmatprep.mubr.bf16.mxu1 %v2778_v32 }
 0x63f   : > { %v2647_v47 = vadd.f32 %v4198_v45, %v4933_v39  ;;  %v2638_v48 = vpop.f32.mrb[103].mxu0  ;;  %4240 = vmatmul.mubr.bf16.vlgmr.msra.gmra.mrb[96].mxu1 %v2779_v38  ;;  %v2752_v50 = vmax.f32 %v2644_v42, 0.0 }
 0x640   : > { %v2639_v49 = vadd.f32 %v4933_v39, %v2638_v48  ;;  %v2750_v52 = vmax.f32 %v2636_v44, 0.0 }
 0x641   : > { %v2753_v51 = vmax.f32 %v2647_v47, 0.0 }
 0x642   : > { %v2751_v53 = vmax.f32 %v2639_v49, 0.0 }
 0x643   : > { %v2781_v54 = vpack.c.bf16 %v2753_v51, %v2752_v50 }
 0x644   : > { %v2780_v55 = vpack.c.bf16 %v2751_v53, %v2750_v52  ;;  %v4201_v56 = vpop.f32.mrb[104].mxu0 }
 0x645   : > { %v2660_v57 = vadd.f32 %v4201_v56, %v4933_v39  ;;  %v2651_v58 = vpop.f32.mrb[105].mxu0 }
 0x646   : > { %v2652_v59 = vadd.f32 %v4933_v39, %v2651_v58  ;;  %v4202_v60 = vpop.f32.mrb[106].mxu0  ;;  %4243 = vmatprep.mubr.bf16.mxu1 %v2780_v55 }
 0x647   : > { %v2663_v61 = vadd.f32 %v4202_v60, %v4933_v39  ;;  %v2654_v62 = vpop.f32.mrb[107].mxu0  ;;  %4244 = vmatmul.mubr.bf16.gmra.mrb[100].mxu1 %v2781_v54  ;;  %v2756_v0 = vmax.f32 %v2660_v57, 0.0 }
 0x648   : > { %v2655_v63 = vadd.f32 %v4933_v39, %v2654_v62  ;;  %v2754_v2 = vmax.f32 %v2652_v59, 0.0 }
 0x649   : > { %v2757_v1 = vmax.f32 %v2663_v61, 0.0 }
 0x64a   : > { %v2755_v3 = vmax.f32 %v2655_v63, 0.0 }
 0x64b   : > { %v2783_v4 = vpack.c.bf16 %v2757_v1, %v2756_v0 }
 0x64c   : > { %v2782_v5 = vpack.c.bf16 %v2755_v3, %v2754_v2  ;;  %v4205_v6 = vpop.f32.mrb[108].mxu0 }
 0x64d   : > { %v2676_v7 = vadd.f32 %v4205_v6, %v4933_v39  ;;  %v2667_v8 = vpop.f32.mrb[109].mxu0 }
 0x64e   : > { %v2668_v9 = vadd.f32 %v4933_v39, %v2667_v8  ;;  %v4206_v10 = vpop.f32.mrb[110].mxu0  ;;  %4247 = vmatprep.mubr.bf16.mxu1 %v2782_v5 }
 0x64f   : > { %v2679_v11 = vadd.f32 %v4206_v10, %v4933_v39  ;;  %v2670_v12 = vpop.f32.mrb[111].mxu0  ;;  %4248 = vmatmul.mubr.bf16.gmra.mrb[104].mxu1 %v2783_v4  ;;  %v2760_v14 = vmax.f32 %v2676_v7, 0.0 }
 0x650   : > { %v2671_v13 = vadd.f32 %v4933_v39, %v2670_v12  ;;  %v2758_v15 = vmax.f32 %v2668_v9, 0.0 }
 0x651   : > { %v2761_v26 = vmax.f32 %v2679_v11, 0.0 }
 0x652   : > { %v2759_v16 = vmax.f32 %v2671_v13, 0.0 }
 0x653   : > { %v2785_v17 = vpack.c.bf16 %v2761_v26, %v2760_v14  ;;  %v4970_v14 = vld [vmem:[%s5045_s16] ss:$0 sm:$0xff] }
 0x654   : > { %v2784_v18 = vpack.c.bf16 %v2759_v16, %v2758_v15  ;;  %v4209_v19 = vpop.f32.mrb[112].mxu0 }
 0x655   : > { %v2692_v20 = vadd.f32 %v4209_v19, %v4933_v39  ;;  %v2683_v21 = vpop.f32.mrb[113].mxu0 }
 0x656   : > { %v2684_v22 = vadd.f32 %v4933_v39, %v2683_v21  ;;  %v4210_v23 = vpop.f32.mrb[114].mxu0  ;;  %4251 = vmatprep.mubr.bf16.mxu1 %v2784_v18 }
 0x657   : > { %v2695_v24 = vadd.f32 %v4210_v23, %v4933_v39  ;;  %v2686_v25 = vpop.f32.mrb[115].mxu0  ;;  %4252 = vmatmul.mubr.bf16.gmra.mrb[108].mxu1 %v2785_v17  ;;  %v2764_v27 = vmax.f32 %v2692_v20, 0.0 }
 0x658   : > { %v2687_v40 = vadd.f32 %v4933_v39, %v2686_v25  ;;  %v2762_v29 = vmax.f32 %v2684_v22, 0.0 }
 0x659   : > { %v2765_v28 = vmax.f32 %v2695_v24, 0.0 }
 0x65a   : > { %v2763_v30 = vmax.f32 %v2687_v40, 0.0 }
 0x65b   : > { %v2787_v31 = vpack.c.bf16 %v2765_v28, %v2764_v27 }
 0x65c   : > { %v2786_v33 = vpack.c.bf16 %v2763_v30, %v2762_v29  ;;  %v4213_v46 = vpop.f32.mrb[116].mxu0 }
 0x65d   : > { %v2708_v34 = vadd.f32 %v4213_v46, %v4933_v39  ;;  %v2699_v35 = vpop.f32.mrb[117].mxu0 }
 0x65e   : > { %v2700_v36 = vadd.f32 %v4933_v39, %v2699_v35  ;;  %v4214_v37 = vpop.f32.mrb[118].mxu0  ;;  %4255 = vmatprep.mubr.bf16.mxu1 %v2786_v33 }
 0x65f   : > { %v2711_v38 = vadd.f32 %v4214_v37, %v4933_v39  ;;  %v2702_v32 = vpop.f32.mrb[119].mxu0  ;;  %4256 = vmatmul.mubr.bf16.gmra.mrb[112].mxu1 %v2787_v31  ;;  %v2768_v42 = vmax.f32 %v2708_v34, 0.0 }
 0x660   : > { %v2703_v41 = vadd.f32 %v4933_v39, %v2702_v32  ;;  %v2766_v44 = vmax.f32 %v2700_v36, 0.0 }
 0x661   : > { %v2769_v43 = vmax.f32 %v2711_v38, 0.0 }
 0x662   : > { %v2767_v45 = vmax.f32 %v2703_v41, 0.0 }
 0x663   : > { %v2789_v47 = vpack.c.bf16 %v2769_v43, %v2768_v42 }
 0x664   : > { %v2788_v48 = vpack.c.bf16 %v2767_v45, %v2766_v44  ;;  %v4217_v49 = vpop.f32.mrb[120].mxu0 }
 0x665   : > { %v2724_v50 = vadd.f32 %v4217_v49, %v4933_v39  ;;  %v2715_v51 = vpop.f32.mrb[121].mxu0 }
 0x666   : > { %v2716_v52 = vadd.f32 %v4933_v39, %v2715_v51  ;;  %v4218_v53 = vpop.f32.mrb[122].mxu0  ;;  %4259 = vmatprep.mubr.bf16.mxu1 %v2788_v48 }
 0x667   : > { %v2727_v54 = vadd.f32 %v4218_v53, %v4933_v39  ;;  %v2718_v55 = vpop.f32.mrb[123].mxu0  ;;  %4260 = vmatmul.mubr.bf16.gmra.mrb[116].mxu1 %v2789_v47  ;;  %v2772_v57 = vmax.f32 %v2724_v50, 0.0 }
 0x668   : > { %v2719_v56 = vadd.f32 %v4933_v39, %v2718_v55  ;;  %v2770_v59 = vmax.f32 %v2716_v52, 0.0 }
 0x669   : > { %v2773_v58 = vmax.f32 %v2727_v54, 0.0 }
 0x66a   : > { %v2771_v60 = vmax.f32 %v2719_v56, 0.0 }
 0x66b   : > { %v2791_v61 = vpack.c.bf16 %v2773_v58, %v2772_v57 }
 0x66c   : > { %v2790_v62 = vpack.c.bf16 %v2771_v60, %v2770_v59  ;;  %v4221_v63 = vpop.f32.mrb[124].mxu0 }
 0x66d   : > { %v2740_v0 = vadd.f32 %v4221_v63, %v4933_v39  ;;  %v2731_v1 = vpop.f32.mrb[125].mxu0 }
 0x66e   : > { %v2732_v2 = vadd.f32 %v4933_v39, %v2731_v1  ;;  %v4222_v3 = vpop.f32.mrb[126].mxu0  ;;  %4263 = vmatprep.mubr.bf16.mxu1 %v2790_v62 }
 0x66f   : > { %v2743_v4 = vadd.f32 %v4222_v3, %v4933_v39  ;;  %v2734_v5 = vpop.f32.mrb[127].mxu0  ;;  %4264 = vmatmul.mubr.bf16.gmra.mrb[120].mxu1 %v2791_v61  ;;  %v2776_v7 = vmax.f32 %v2740_v0, 0.0 }
 0x670   : > { %v2735_v6 = vadd.f32 %v4933_v39, %v2734_v5  ;;  %v2774_v9 = vmax.f32 %v2732_v2, 0.0 }
 0x671   : > { %v2777_v8 = vmax.f32 %v2743_v4, 0.0 }
 0x672   : > { %v2775_v10 = vmax.f32 %v2735_v6, 0.0 }
 0x673   : > { %v2793_v11 = vpack.c.bf16 %v2777_v8, %v2776_v7 }
 0x674   : > { %v2792_v12 = vpack.c.bf16 %v2775_v10, %v2774_v9 }
 0x676   : > { %4267 = vmatprep.mubr.bf16.mxu1 %v2792_v12 }
 0x677   : > { %4268 = vmatmul.mubr.bf16.gmra.mrb[124].mxu1 %v2793_v11 }
 0x712   : > { %v4241_v13 = vpop.f32.mrb[96].mxu1 }
 0x713   : > { %v2899_v26 = vpop.f32.mrb[97].mxu1  ;;  %v2908_v16 = vadd.f32 %v4241_v13, %v4970_v14 }
 0x714   : > { %v4242_v15 = vpop.f32.mrb[98].mxu1  ;;  %v2900_v18 = vadd.f32 %v4970_v14, %v2899_v26 }
 0x715   : > { %v2911_v39 = vadd.f32 %v4242_v15, %v4970_v14  ;;  %v2902_v17 = vpop.f32.mrb[99].mxu1 }
 0x716   : > { %v2903_v19 = vadd.f32 %v4970_v14, %v2902_v17 }
 0x717   : > { %v3593_v20 = vpack.c.bf16 %v2911_v39, %v2908_v16 }
 0x718   : > { %v3588_v21 = vpack.c.bf16 %v2903_v19, %v2900_v18 }
 0x719   : > { %3680 = vst [vmem:[%s4979_s30 + $0x8] sm:$0xff] %v3593_v20  }
 0x71a   : > { %3589 = vst [vmem:[%s4979_s30] sm:$0xff] %v3588_v21   ;;  %v4245_v22 = vpop.f32.mrb[100].mxu1 }
 0x71b   : > { %v2915_v23 = vpop.f32.mrb[101].mxu1  ;;  %v2924_v25 = vadd.f32 %v4245_v22, %v4970_v14 }
 0x71c   : > { %v4246_v24 = vpop.f32.mrb[102].mxu1  ;;  %v2916_v28 = vadd.f32 %v4970_v14, %v2915_v23 }
 0x71d   : > { %v2927_v40 = vadd.f32 %v4246_v24, %v4970_v14  ;;  %v2918_v27 = vpop.f32.mrb[103].mxu1 }
 0x71e   : > { %v2919_v29 = vadd.f32 %v4970_v14, %v2918_v27 }
 0x71f   : > { %v3603_v30 = vpack.c.bf16 %v2927_v40, %v2924_v25 }
 0x720   : > { %v3598_v31 = vpack.c.bf16 %v2919_v29, %v2916_v28 }
 0x721   : > { %3682 = vst [vmem:[%s4979_s30 + $0x18] sm:$0xff] %v3603_v30  }
 0x722   : > { %3681 = vst [vmem:[%s4979_s30 + $0x10] sm:$0xff] %v3598_v31   ;;  %v4249_v33 = vpop.f32.mrb[104].mxu1 }
 0x723   : > { %v2931_v46 = vpop.f32.mrb[105].mxu1  ;;  %v2940_v35 = vadd.f32 %v4249_v33, %v4970_v14 }
 0x724   : > { %v4250_v34 = vpop.f32.mrb[106].mxu1  ;;  %v2932_v38 = vadd.f32 %v4970_v14, %v2931_v46 }
 0x725   : > { %v2943_v36 = vadd.f32 %v4250_v34, %v4970_v14  ;;  %v2934_v37 = vpop.f32.mrb[107].mxu1 }
 0x726   : > { %v2935_v32 = vadd.f32 %v4970_v14, %v2934_v37 }
 0x727   : > { %v3613_v41 = vpack.c.bf16 %v2943_v36, %v2940_v35 }
 0x728   : > { %v3608_v42 = vpack.c.bf16 %v2935_v32, %v2932_v38 }
 0x729   : > { %3684 = vst [vmem:[%s4979_s30 + $0x28] sm:$0xff] %v3613_v41  }
 0x72a   : > { %3683 = vst [vmem:[%s4979_s30 + $0x20] sm:$0xff] %v3608_v42   ;;  %v4253_v43 = vpop.f32.mrb[108].mxu1 }
 0x72b   : > { %v2947_v44 = vpop.f32.mrb[109].mxu1  ;;  %v2956_v47 = vadd.f32 %v4253_v43, %v4970_v14 }
 0x72c   : > { %v4254_v45 = vpop.f32.mrb[110].mxu1  ;;  %v2948_v50 = vadd.f32 %v4970_v14, %v2947_v44 }
 0x72d   : > { %v2959_v48 = vadd.f32 %v4254_v45, %v4970_v14  ;;  %v2950_v49 = vpop.f32.mrb[111].mxu1 }
 0x72e   : > { %v2951_v51 = vadd.f32 %v4970_v14, %v2950_v49 }
 0x72f   : > { %v3623_v52 = vpack.c.bf16 %v2959_v48, %v2956_v47 }
 0x730   : > { %v3618_v53 = vpack.c.bf16 %v2951_v51, %v2948_v50 }
 0x731   : > { %3686 = vst [vmem:[%s4979_s30 + $0x38] sm:$0xff] %v3623_v52  }
 0x732   : > { %3685 = vst [vmem:[%s4979_s30 + $0x30] sm:$0xff] %v3618_v53   ;;  %v4257_v54 = vpop.f32.mrb[112].mxu1 }
 0x733   : > { %v2963_v55 = vpop.f32.mrb[113].mxu1  ;;  %v2972_v57 = vadd.f32 %v4257_v54, %v4970_v14 }
 0x734   : > { %v4258_v56 = vpop.f32.mrb[114].mxu1  ;;  %v2964_v60 = vadd.f32 %v4970_v14, %v2963_v55 }
 0x735   : > { %v2975_v58 = vadd.f32 %v4258_v56, %v4970_v14  ;;  %v2966_v59 = vpop.f32.mrb[115].mxu1 }
 0x736   : > { %v2967_v61 = vadd.f32 %v4970_v14, %v2966_v59 }
 0x737   : > { %v3633_v62 = vpack.c.bf16 %v2975_v58, %v2972_v57 }
 0x738   : > { %v3628_v63 = vpack.c.bf16 %v2967_v61, %v2964_v60 }
 0x739   : > { %3688 = vst [vmem:[%s4979_s30 + $0x48] sm:$0xff] %v3633_v62  }
 0x73a   : > { %3687 = vst [vmem:[%s4979_s30 + $0x40] sm:$0xff] %v3628_v63   ;;  %v4261_v0 = vpop.f32.mrb[116].mxu1 }
 0x73b   : > { %v2979_v1 = vpop.f32.mrb[117].mxu1  ;;  %v2988_v3 = vadd.f32 %v4261_v0, %v4970_v14 }
 0x73c   : > { %v4262_v2 = vpop.f32.mrb[118].mxu1  ;;  %v2980_v6 = vadd.f32 %v4970_v14, %v2979_v1 }
 0x73d   : > { %v2991_v4 = vadd.f32 %v4262_v2, %v4970_v14  ;;  %v2982_v5 = vpop.f32.mrb[119].mxu1 }
 0x73e   : > { %v2983_v7 = vadd.f32 %v4970_v14, %v2982_v5 }
 0x73f   : > { %v3643_v8 = vpack.c.bf16 %v2991_v4, %v2988_v3 }
 0x740   : > { %v3638_v9 = vpack.c.bf16 %v2983_v7, %v2980_v6 }
 0x741   : > { %3690 = vst [vmem:[%s4979_s30 + $0x58] sm:$0xff] %v3643_v8  }
 0x742   : > { %3689 = vst [vmem:[%s4979_s30 + $0x50] sm:$0xff] %v3638_v9   ;;  %v4265_v10 = vpop.f32.mrb[120].mxu1 }
 0x743   : > { %v2995_v11 = vpop.f32.mrb[121].mxu1  ;;  %v3004_v13 = vadd.f32 %v4265_v10, %v4970_v14 }
 0x744   : > { %v4266_v12 = vpop.f32.mrb[122].mxu1  ;;  %v2996_v16 = vadd.f32 %v4970_v14, %v2995_v11 }
 0x745   : > { %v3007_v26 = vadd.f32 %v4266_v12, %v4970_v14  ;;  %v2998_v15 = vpop.f32.mrb[123].mxu1 }
 0x746   : > { %v2999_v39 = vadd.f32 %v4970_v14, %v2998_v15 }
 0x747   : > { %v3653_v17 = vpack.c.bf16 %v3007_v26, %v3004_v13 }
 0x748   : > { %v3648_v18 = vpack.c.bf16 %v2999_v39, %v2996_v16 }
 0x749   : > { %3692 = vst [vmem:[%s4979_s30 + $0x68] sm:$0xff] %v3653_v17  }
 0x74a   : > { %3691 = vst [vmem:[%s4979_s30 + $0x60] sm:$0xff] %v3648_v18   ;;  %v4269_v19 = vpop.f32.mrb[124].mxu1 }
 0x74b   : > { %v3011_v20 = vpop.f32.mrb[125].mxu1  ;;  %v3020_v22 = vadd.f32 %v4269_v19, %v4970_v14 }
 0x74c   : > { %v4270_v21 = vpop.f32.mrb[126].mxu1  ;;  %v3012_v25 = vadd.f32 %v4970_v14, %v3011_v20 }
 0x74d   : > { %v3023_v23 = vadd.f32 %v4270_v21, %v4970_v14  ;;  %v3014_v24 = vpop.f32.mrb[127].mxu1 }
 0x74e   : > { %v3015_v40 = vadd.f32 %v4970_v14, %v3014_v24 }
 0x74f   : > { %v3663_v27 = vpack.c.bf16 %v3023_v23, %v3020_v22 }
 0x750   : > { %v3658_v28 = vpack.c.bf16 %v3015_v40, %v3012_v25 }
 0x751   : > { %3694 = vst [vmem:[%s4979_s30 + $0x78] sm:$0xff] %v3663_v27  }
 0x752   : > { %3693 = vst [vmem:[%s4979_s30 + $0x70] sm:$0xff] %v3658_v28  }
 0x753 PF: > { %s29_s27 = sadd.s32 1, %s4365_s27  }
 0x754   : > { %p26_p4 = scmp.ge.s32.totalorder %s29_s27, 4  }
 0x756   :  { %28 = sbr.rel (!%p26_p4) target bundleno = 4 (0x4), region = 130 }

// kernel: _ae_forward_impl.1
= control target key start
LH: loop header
LB: loop body
LE: loop exit
PB: predicated region body
PF: predicated region fallthrough
CT: control target
= control target key end

     0   :  { %s4462_s27 = smov 0   ;;  %s5029_s0 = inlined_call_operand.vmem [shape: bf16[512,128], index: 0, kind: input, shape index: {}]   ;;  %s5030_s1 = inlined_call_operand.vmem [shape: bf16[128,128], index: 1, kind: input, shape index: {}]   ;;  %s5031_s2 = inlined_call_operand.vmem [shape: f32[1,128], index: 2, kind: input, shape index: {}]   ;;  %s5032_s3 = inlined_call_operand.vmem [shape: bf16[128,128], index: 3, kind: input, shape index: {}]   ;;  %s5033_s4 = inlined_call_operand.vmem [shape: f32[1,128], index: 4, kind: input, shape index: {}]   ;;  %s5034_s5 = inlined_call_operand.vmem [shape: bf16[128,128], index: 5, kind: input, shape index: {}]   ;;  %s5035_s6 = inlined_call_operand.vmem [shape: f32[1,128], index: 6, kind: input, shape index: {}]   ;;  %s5036_s7 = inlined_call_operand.vmem [shape: bf16[128,128], index: 7, kind: input, shape index: {}]   ;;  %s5037_s8 = inlined_call_operand.vmem [shape: f32[1,128], index: 8, kind: input, shape index: {}]   ;;  %s5038_s9 = inlined_call_operand.vmem [shape: bf16[128,128], index: 9, kind: input, shape index: {}]   ;;  %s5039_s10 = inlined_call_operand.vmem [shape: f32[1,128], index: 10, kind: input, shape index: {}]   ;;  %s5040_s11 = inlined_call_operand.vmem [shape: bf16[128,128], index: 11, kind: input, shape index: {}]   ;;  %s5041_s12 = inlined_call_operand.vmem [shape: f32[1,128], index: 12, kind: input, shape index: {}]   ;;  %s5042_s13 = inlined_call_operand.vmem [shape: bf16[128,128], index: 13, kind: input, shape index: {}]   ;;  %s5043_s14 = inlined_call_operand.vmem [shape: f32[1,128], index: 14, kind: input, shape index: {}]   ;;  %s5044_s15 = inlined_call_operand.vmem [shape: bf16[128,128], index: 15, kind: input, shape index: {}]   ;;  %s5045_s16 = inlined_call_operand.vmem [shape: f32[1,128], index: 16, kind: input, shape index: {}]   ;;  %s5046_s17 = inlined_call_operand.vmem [shape: bf16[512,128], index: 17, kind: output, shape index: {0}]   ;;  %s5047_s18 = inlined_call_operand.vmem [shape: bf16[512,128], index: 18, kind: output, shape index: {1}]  }
   0x1   :  { %5049 = sst [smem:[#allocation2_spill]] %s5029_s0 }
   0x2   :  { %5050 = sst [smem:[#allocation3_spill]] %s5030_s1 }
   0x3   :  { %5051 = sst [smem:[#allocation4_spill]] %s5031_s2 }
   0x4 LB: > { %s3276_s28 = sadd.s32 4294967295, %s4365_s27   ;;  %p3280_p0 = scmp.ge.s32.totalorder %s4365_s27, 1  ;;  %s4365_s27 = sphi %s4462_s27, %s29_s27  }
   0x5   : > { %p516_p1 = scmp.lt.s32.totalorder %s4365_s27, 3 }
   0x7   : > { %p517_p2 = pnand %p3280_p0, %p516_p1 }
   0x8   : > { %s5052_s0 = sld [smem:[#allocation3_spill]] (!%p517_p2)  ;;  %s3281_s19 = sshll.u32 (!%p517_p2), %s3276_s28, 5  ;;  %v4303_v9 = vld [vmem:[%s5032_s3] sm:$0xff] (!%p517_p2)   ;;  %v4304_v10 = vld [vmem:[%s5032_s3 + $0x8] sm:$0xff] (!%p517_p2)   ;;  %v4305_v12 = vld [vmem:[%s5032_s3 + $0x10] sm:$0xff] (!%p517_p2)  }
   0x9   : > { %520 = sbr.rel (%p517_p2) target bundleno = 1875 (0x753), region = 88  ;;  %p576_p3 = scmp.lt.s32.totalorder (!%p517_p2), %s3281_s19, 63  ;;  %3935 = vmatprep.subr.bf16.mxu1 (!%p517_p2), %v4303_v9  ;;  %v4306_v14 = vld [vmem:[%s5032_s3 + $0x18] sm:$0xff] (!%p517_p2)   ;;  %v4307_v15 = vld [vmem:[%s5032_s3 + $0x20] sm:$0xff] (!%p517_p2)   ;;  %v4308_v18 = vld [vmem:[%s5032_s3 + $0x28] sm:$0xff] (!%p517_p2)  }
   0xa   : > { %s5053_s25 = sld [smem:[#allocation2_spill]] (!%p517_p2)  ;;  %3936 = vmatpush3.bf16.msra.mxu1 (!%p517_p2), %v4303_v9  ;;  %v4309_v30 = vld [vmem:[%s5032_s3 + $0x30] sm:$0xff] (!%p517_p2)   ;;  %v4310_v31 = vld [vmem:[%s5032_s3 + $0x38] sm:$0xff] (!%p517_p2)   ;;  %v4311_v32 = vld [vmem:[%s5034_s5] sm:$0xff] (!%p517_p2)  }
   0xb   : > { %3937 = vmatprep.subr.bf16.mxu1 (!%p517_p2), %v4304_v10  ;;  %v4312_v33 = vld [vmem:[%s5034_s5 + $0x8] sm:$0xff] (!%p517_p2)   ;;  %v4313_v34 = vld [vmem:[%s5034_s5 + $0x10] sm:$0xff] (!%p517_p2)   ;;  %v4314_v35 = vld [vmem:[%s5034_s5 + $0x18] sm:$0xff] (!%p517_p2)  }
   0xc   : > { %v4315_v36 = vld [vmem:[%s5034_s5 + $0x20] sm:$0xff] (!%p517_p2)   ;;  %v4316_v37 = vld [vmem:[%s5034_s5 + $0x28] sm:$0xff] (!%p517_p2)   ;;  %v4317_v38 = vld [vmem:[%s5034_s5 + $0x30] sm:$0xff] (!%p517_p2)  }
   0xe   : > { %v4279_v0 = vld [vmem:[%s5052_s0] sm:$0xff] (!%p517_p2)   ;;  %v4280_v1 = vld [vmem:[%s5052_s0 + $0x8] sm:$0xff] (!%p517_p2)   ;;  %v4281_v2 = vld [vmem:[%s5052_s0 + $0x10] sm:$0xff] (!%p517_p2)   ;;  %3938 = vmatpush3.bf16.msra.mxu1 (!%p517_p2), %v4304_v10 }
   0xf   : > { %3887 = vmatprep.subr.bf16.mxu0 (!%p517_p2), %v4279_v0  ;;  %v4282_v3 = vld [vmem:[%s5052_s0 + $0x18] sm:$0xff] (!%p517_p2)   ;;  %v4283_v5 = vld [vmem:[%s5052_s0 + $0x20] sm:$0xff] (!%p517_p2)   ;;  %v4284_v6 = vld [vmem:[%s5052_s0 + $0x28] sm:$0xff] (!%p517_p2)   ;;  %3939 = vmatprep.subr.bf16.mxu1 (!%p517_p2), %v4305_v12 }
  0x10   : > { %3888 = vmatpush3.bf16.msra.mxu0 %v4279_v0  ;;  %s5056_s19 = smov (!%p576_p3, %s3281_s19), 63  ;;  %v4285_v7 = vld [vmem:[%s5052_s0 + $0x30] sm:$0xff]   ;;  %v4286_v8 = vld [vmem:[%s5052_s0 + $0x38] sm:$0xff]  }
  0x11   : > { %3889 = vmatprep.subr.bf16.mxu0 %v4280_v1  ;;  %s4479_s2 = sshll.u32 %s5056_s19, 2 }
  0x12   : > { %s4485_s26 = scalar_lea.vmem %s5053_s25, %s4479_s2  ;;  %3940 = vmatpush3.bf16.msra.mxu1 %v4305_v12  ;;  %s4758_s20 = scalar_lea.vmem %s5047_s18, %s4479_s2 }
  0x13   : > { %v4287_v4 = vld [vmem:[%s4485_s26] sm:$0xff]   ;;  %v4288_v11 = vld [vmem:[%s4485_s26 + $0x8] sm:$0xff]   ;;  %v4289_v13 = vld [vmem:[%s4485_s26 + $0x10] sm:$0xff]   ;;  %3941 = vmatprep.subr.bf16.mxu1 %v4306_v14  ;;  %s4979_s30 = scalar_lea.vmem %s5046_s17, %s4479_s2 }
  0x14   : > { %3890 = vmatpush3.bf16.msra.mxu0 %v4280_v1  ;;  %3903 = vmatprep.mubr.bf16.mxu0 %v4287_v4  ;;  %v4290_v16 = vld [vmem:[%s4485_s26 + $0x18] sm:$0xff]   ;;  %v4291_v17 = vld [vmem:[%s4485_s26 + $0x20] sm:$0xff]   ;;  %v4292_v19 = vld [vmem:[%s4485_s26 + $0x28] sm:$0xff]  }
  0x15   : > { %3891 = vmatprep.subr.bf16.mxu0 %v4281_v2  ;;  %v4293_v20 = vld [vmem:[%s4485_s26 + $0x30] sm:$0xff]   ;;  %v4294_v21 = vld [vmem:[%s4485_s26 + $0x38] sm:$0xff]   ;;  %v4295_v22 = vld [vmem:[%s4485_s26 + $0x40] sm:$0xff]  }
  0x16   : > { %3942 = vmatpush3.bf16.msra.mxu1 %v4306_v14  ;;  %v4296_v23 = vld [vmem:[%s4485_s26 + $0x48] sm:$0xff]   ;;  %v4297_v24 = vld [vmem:[%s4485_s26 + $0x50] sm:$0xff]   ;;  %v4298_v25 = vld [vmem:[%s4485_s26 + $0x58] sm:$0xff]  }
  0x17   : > { %3943 = vmatprep.subr.bf16.mxu1 %v4307_v15  ;;  %v4299_v26 = vld [vmem:[%s4485_s26 + $0x60] sm:$0xff]   ;;  %v4300_v27 = vld [vmem:[%s4485_s26 + $0x68] sm:$0xff]   ;;  %v4301_v28 = vld [vmem:[%s4485_s26 + $0x70] sm:$0xff]  }
  0x18   : > { %3892 = vmatpush3.bf16.msra.mxu0 %v4281_v2  ;;  %v4302_v29 = vld [vmem:[%s4485_s26 + $0x78] sm:$0xff]   ;;  %s5054_s26 = sld [smem:[#allocation4_spill]] }
  0x19   : > { %3893 = vmatprep.subr.bf16.mxu0 %v4282_v3 }
  0x1a   : > { %3944 = vmatpush3.bf16.msra.mxu1 %v4307_v15 }
  0x1b   : > { %3945 = vmatprep.subr.bf16.mxu1 %v4308_v18 }
  0x1c   : > { %3894 = vmatpush3.bf16.msra.mxu0 %v4282_v3 }
  0x1d   : > { %3895 = vmatprep.subr.bf16.mxu0 %v4283_v5 }
  0x1e   : > { %3946 = vmatpush3.bf16.msra.mxu1 %v4308_v18  ;;  %v4566_v39 = vld [vmem:[%s5054_s26] ss:$0 sm:$0xff] }
  0x1f   : > { %3947 = vmatprep.subr.bf16.mxu1 %v4309_v30 }
  0x20   : > { %3896 = vmatpush3.bf16.msra.mxu0 %v4283_v5 }
  0x21   : > { %3897 = vmatprep.subr.bf16.mxu0 %v4284_v6 }
  0x22   : > { %3948 = vmatpush3.bf16.msra.mxu1 %v4309_v30 }
  0x23   : > { %3949 = vmatprep.subr.bf16.mxu1 %v4310_v31 }
  0x24   : > { %3898 = vmatpush3.bf16.msra.mxu0 %v4284_v6 }
  0x25   : > { %3899 = vmatprep.subr.bf16.mxu0 %v4285_v7 }
  0x26   : > { %3950 = vmatpush3.bf16.msra.mxu1 %v4310_v31 }
  0x28   : > { %3900 = vmatpush3.bf16.msra.mxu0 %v4285_v7 }
  0x29   : > { %3901 = vmatprep.subr.bf16.mxu0 %v4286_v8 }
  0x2c   : > { %3902 = vmatpush3.bf16.msra.mxu0 %v4286_v8 }
  0x2d   : > { %3983 = vmatprep.subr.bf16.mxu0 %v4311_v32 }
  0x2f   : > { %3904 = vmatmul.mubr.bf16.vlgmr.msra.gmra.mrb[0].mxu0 %v4288_v11 }
  0x30   : > { %3907 = vmatprep.mubr.bf16.mxu0 %v4289_v13  ;;  %3984 = vmatpush3.bf16.msra.mxu0 %v4311_v32 }
  0x31   : > { %3985 = vmatprep.subr.bf16.mxu0 %v4312_v33 }
  0x34   : > { %3986 = vmatpush3.bf16.msra.mxu0 %v4312_v33 }
  0x35   : > { %3987 = vmatprep.subr.bf16.mxu0 %v4313_v34 }
  0x37   : > { %3908 = vmatmul.mubr.bf16.gmra.mrb[4].mxu0 %v4290_v16 }
  0x38   : > { %3911 = vmatprep.mubr.bf16.mxu0 %v4291_v17  ;;  %3988 = vmatpush3.bf16.msra.mxu0 %v4313_v34 }
  0x39   : > { %3989 = vmatprep.subr.bf16.mxu0 %v4314_v35 }
  0x3c   : > { %3990 = vmatpush3.bf16.msra.mxu0 %v4314_v35 }
  0x3d   : > { %3991 = vmatprep.subr.bf16.mxu0 %v4315_v36 }
  0x3f   : > { %3912 = vmatmul.mubr.bf16.gmra.mrb[8].mxu0 %v4292_v19 }
  0x40   : > { %3915 = vmatprep.mubr.bf16.mxu0 %v4293_v20  ;;  %3992 = vmatpush3.bf16.msra.mxu0 %v4315_v36 }
  0x41   : > { %3993 = vmatprep.subr.bf16.mxu0 %v4316_v37 }
  0x44   : > { %3994 = vmatpush3.bf16.msra.mxu0 %v4316_v37 }
  0x45   : > { %3995 = vmatprep.subr.bf16.mxu0 %v4317_v38 }
  0x47   : > { %3916 = vmatmul.mubr.bf16.gmra.mrb[12].mxu0 %v4294_v21 }
  0x48   : > { %3919 = vmatprep.mubr.bf16.mxu0 %v4295_v22  ;;  %3996 = vmatpush3.bf16.msra.mxu0 %v4317_v38 }
  0x4f   : > { %3920 = vmatmul.mubr.bf16.gmra.mrb[16].mxu0 %v4296_v23 }
  0x50   : > { %3923 = vmatprep.mubr.bf16.mxu0 %v4297_v24 }
  0x57   : > { %3924 = vmatmul.mubr.bf16.gmra.mrb[20].mxu0 %v4298_v25 }
  0x58   : > { %3927 = vmatprep.mubr.bf16.mxu0 %v4299_v26 }
  0x5f   : > { %3928 = vmatmul.mubr.bf16.gmra.mrb[24].mxu0 %v4300_v27 }
  0x60   : > { %3931 = vmatprep.mubr.bf16.mxu0 %v4301_v28 }
  0x67   : > { %3932 = vmatmul.mubr.bf16.gmra.mrb[28].mxu0 %v4302_v29 }
 0x102   : > { %v3905_v40 = vpop.f32.mrb[0].mxu0 }
 0x103   : > { %v836_v41 = vadd.f32 %v3905_v40, %v4566_v39  ;;  %v827_v42 = vpop.f32.mrb[1].mxu0 }
 0x104   : > { %v828_v43 = vadd.f32 %v4566_v39, %v827_v42  ;;  %v3906_v44 = vpop.f32.mrb[2].mxu0 }
 0x105   : > { %v839_v45 = vadd.f32 %v3906_v44, %v4566_v39  ;;  %v830_v46 = vpop.f32.mrb[3].mxu0  ;;  %v956_v48 = vmax.f32 %v836_v41, 0.0 }
 0x106   : > { %v831_v47 = vadd.f32 %v4566_v39, %v830_v46  ;;  %v954_v50 = vmax.f32 %v828_v43, 0.0 }
 0x107   : > { %v957_v49 = vmax.f32 %v839_v45, 0.0 }
 0x108   : > { %v955_v51 = vmax.f32 %v831_v47, 0.0 }
 0x109   : > { %v987_v52 = vpack.c.bf16 %v957_v49, %v956_v48 }
 0x10a   : > { %v3909_v53 = vpop.f32.mrb[4].mxu0  ;;  %v986_v54 = vpack.c.bf16 %v955_v51, %v954_v50 }
 0x10b   : > { %v852_v55 = vadd.f32 %v3909_v53, %v4566_v39  ;;  %v843_v56 = vpop.f32.mrb[5].mxu0 }
 0x10c   : > { %v844_v57 = vadd.f32 %v4566_v39, %v843_v56  ;;  %v3910_v58 = vpop.f32.mrb[6].mxu0  ;;  %3951 = vmatprep.mubr.bf16.mxu1 %v986_v54 }
 0x10d   : > { %v855_v59 = vadd.f32 %v3910_v58, %v4566_v39  ;;  %v846_v60 = vpop.f32.mrb[7].mxu0  ;;  %3952 = vmatmul.mubr.bf16.vlgmr.msra.gmra.mrb[0].mxu1 %v987_v52  ;;  %v960_v62 = vmax.f32 %v852_v55, 0.0 }
 0x10e   : > { %v847_v61 = vadd.f32 %v4566_v39, %v846_v60  ;;  %v958_v0 = vmax.f32 %v844_v57, 0.0 }
 0x10f   : > { %v961_v63 = vmax.f32 %v855_v59, 0.0 }
 0x110   : > { %v959_v1 = vmax.f32 %v847_v61, 0.0 }
 0x111   : > { %v989_v2 = vpack.c.bf16 %v961_v63, %v960_v62 }
 0x112   : > { %v988_v3 = vpack.c.bf16 %v959_v1, %v958_v0  ;;  %v3913_v4 = vpop.f32.mrb[8].mxu0 }
 0x113   : > { %v868_v5 = vadd.f32 %v3913_v4, %v4566_v39  ;;  %v859_v6 = vpop.f32.mrb[9].mxu0 }
 0x114   : > { %v860_v7 = vadd.f32 %v4566_v39, %v859_v6  ;;  %v3914_v8 = vpop.f32.mrb[10].mxu0  ;;  %3955 = vmatprep.mubr.bf16.mxu1 %v988_v3 }
 0x115   : > { %v871_v9 = vadd.f32 %v3914_v8, %v4566_v39  ;;  %v862_v10 = vpop.f32.mrb[11].mxu0  ;;  %3956 = vmatmul.mubr.bf16.gmra.mrb[4].mxu1 %v989_v2  ;;  %v964_v12 = vmax.f32 %v868_v5, 0.0 }
 0x116   : > { %v863_v11 = vadd.f32 %v4566_v39, %v862_v10  ;;  %v962_v14 = vmax.f32 %v860_v7, 0.0 }
 0x117   : > { %v965_v13 = vmax.f32 %v871_v9, 0.0 }
 0x118   : > { %v963_v15 = vmax.f32 %v863_v11, 0.0 }
 0x119   : > { %v991_v16 = vpack.c.bf16 %v965_v13, %v964_v12 }
 0x11a   : > { %v990_v17 = vpack.c.bf16 %v963_v15, %v962_v14  ;;  %v3917_v18 = vpop.f32.mrb[12].mxu0 }
 0x11b   : > { %v884_v19 = vadd.f32 %v3917_v18, %v4566_v39  ;;  %v875_v20 = vpop.f32.mrb[13].mxu0 }
 0x11c   : > { %v876_v21 = vadd.f32 %v4566_v39, %v875_v20  ;;  %v3918_v22 = vpop.f32.mrb[14].mxu0  ;;  %3959 = vmatprep.mubr.bf16.mxu1 %v990_v17 }
 0x11d   : > { %v887_v23 = vadd.f32 %v3918_v22, %v4566_v39  ;;  %v878_v24 = vpop.f32.mrb[15].mxu0  ;;  %3960 = vmatmul.mubr.bf16.gmra.mrb[8].mxu1 %v991_v16  ;;  %v968_v26 = vmax.f32 %v884_v19, 0.0 }
 0x11e   : > { %v879_v25 = vadd.f32 %v4566_v39, %v878_v24  ;;  %v966_v28 = vmax.f32 %v876_v21, 0.0 }
 0x11f   : > { %v969_v27 = vmax.f32 %v887_v23, 0.0 }
 0x120   : > { %v967_v29 = vmax.f32 %v879_v25, 0.0  ;;  %v4318_v25 = vld [vmem:[%s5034_s5 + $0x38] sm:$0xff]  }
 0x121   : > { %v993_v30 = vpack.c.bf16 %v969_v27, %v968_v26  ;;  %3997 = vmatprep.subr.bf16.mxu0 %v4318_v25  ;;  %v4319_v26 = vld [vmem:[%s5036_s7] sm:$0xff]   ;;  %v4321_v27 = vld [vmem:[%s5036_s7 + $0x10] sm:$0xff]  }
 0x122   : > { %v992_v31 = vpack.c.bf16 %v967_v29, %v966_v28  ;;  %v3921_v32 = vpop.f32.mrb[16].mxu0  ;;  %3998 = vmatpush3.bf16.msra.mxu0 %v4318_v25  ;;  %4031 = vmatprep.subr.bf16.mxu1 %v4319_v26  ;;  %v4322_v28 = vld [vmem:[%s5036_s7 + $0x18] sm:$0xff]   ;;  %v4323_v29 = vld [vmem:[%s5036_s7 + $0x20] sm:$0xff]  }
 0x123   : > { %v900_v33 = vadd.f32 %v3921_v32, %v4566_v39  ;;  %v891_v34 = vpop.f32.mrb[17].mxu0  ;;  %4032 = vmatpush3.bf16.msra.mxu1 %v4319_v26  ;;  %v4627_v32 = vld [vmem:[%s5033_s4] ss:$0 sm:$0xff] }
 0x124   : > { %v892_v35 = vadd.f32 %v4566_v39, %v891_v34  ;;  %v3922_v36 = vpop.f32.mrb[18].mxu0  ;;  %3963 = vmatprep.mubr.bf16.mxu1 %v992_v31  ;;  %v4325_v31 = vld [vmem:[%s5036_s7 + $0x30] sm:$0xff]  }
 0x125   : > { %v903_v37 = vadd.f32 %v3922_v36, %v4566_v39  ;;  %v894_v38 = vpop.f32.mrb[19].mxu0  ;;  %3964 = vmatmul.mubr.bf16.gmra.mrb[12].mxu1 %v993_v30  ;;  %v972_v41 = vmax.f32 %v900_v33, 0.0  ;;  %v4324_v30 = vld [vmem:[%s5036_s7 + $0x28] sm:$0xff]  }
 0x126   : > { %v895_v40 = vadd.f32 %v4566_v39, %v894_v38  ;;  %v970_v43 = vmax.f32 %v892_v35, 0.0 }
 0x127   : > { %v973_v42 = vmax.f32 %v903_v37, 0.0 }
 0x128   : > { %v971_v44 = vmax.f32 %v895_v40, 0.0 }
 0x129   : > { %v995_v45 = vpack.c.bf16 %v973_v42, %v972_v41 }
 0x12a   : > { %v994_v46 = vpack.c.bf16 %v971_v44, %v970_v43  ;;  %v3925_v47 = vpop.f32.mrb[20].mxu0 }
 0x12b   : > { %v916_v48 = vadd.f32 %v3925_v47, %v4566_v39  ;;  %v907_v49 = vpop.f32.mrb[21].mxu0 }
 0x12c   : > { %v908_v50 = vadd.f32 %v4566_v39, %v907_v49  ;;  %v3926_v51 = vpop.f32.mrb[22].mxu0  ;;  %3967 = vmatprep.mubr.bf16.mxu1 %v994_v46 }
 0x12d   : > { %v919_v52 = vadd.f32 %v3926_v51, %v4566_v39  ;;  %v910_v53 = vpop.f32.mrb[23].mxu0  ;;  %3968 = vmatmul.mubr.bf16.gmra.mrb[16].mxu1 %v995_v45  ;;  %v976_v55 = vmax.f32 %v916_v48, 0.0 }
 0x12e   : > { %v911_v54 = vadd.f32 %v4566_v39, %v910_v53  ;;  %v974_v57 = vmax.f32 %v908_v50, 0.0 }
 0x12f   : > { %v977_v56 = vmax.f32 %v919_v52, 0.0 }
 0x130   : > { %v975_v58 = vmax.f32 %v911_v54, 0.0 }
 0x131   : > { %v997_v59 = vpack.c.bf16 %v977_v56, %v976_v55 }
 0x132   : > { %v996_v60 = vpack.c.bf16 %v975_v58, %v974_v57  ;;  %v3929_v61 = vpop.f32.mrb[24].mxu0 }
 0x133   : > { %v932_v62 = vadd.f32 %v3929_v61, %v4566_v39  ;;  %v923_v63 = vpop.f32.mrb[25].mxu0 }
 0x134   : > { %v924_v0 = vadd.f32 %v4566_v39, %v923_v63  ;;  %v3930_v1 = vpop.f32.mrb[26].mxu0  ;;  %3971 = vmatprep.mubr.bf16.mxu1 %v996_v60 }
 0x135   : > { %v935_v2 = vadd.f32 %v3930_v1, %v4566_v39  ;;  %v926_v3 = vpop.f32.mrb[27].mxu0  ;;  %3972 = vmatmul.mubr.bf16.gmra.mrb[20].mxu1 %v997_v59  ;;  %v980_v5 = vmax.f32 %v932_v62, 0.0 }
 0x136   : > { %v927_v4 = vadd.f32 %v4566_v39, %v926_v3  ;;  %v978_v7 = vmax.f32 %v924_v0, 0.0 }
 0x137   : > { %v981_v6 = vmax.f32 %v935_v2, 0.0 }
 0x138   : > { %v979_v8 = vmax.f32 %v927_v4, 0.0 }
 0x139   : > { %v999_v9 = vpack.c.bf16 %v981_v6, %v980_v5 }
 0x13a   : > { %v998_v10 = vpack.c.bf16 %v979_v8, %v978_v7  ;;  %v3933_v11 = vpop.f32.mrb[28].mxu0 }
 0x13b   : > { %v948_v12 = vadd.f32 %v3933_v11, %v4566_v39  ;;  %v939_v13 = vpop.f32.mrb[29].mxu0 }
 0x13c   : > { %v940_v14 = vadd.f32 %v4566_v39, %v939_v13  ;;  %v3934_v15 = vpop.f32.mrb[30].mxu0  ;;  %3975 = vmatprep.mubr.bf16.mxu1 %v998_v10 }
 0x13d   : > { %v951_v16 = vadd.f32 %v3934_v15, %v4566_v39  ;;  %v942_v17 = vpop.f32.mrb[31].mxu0  ;;  %3976 = vmatmul.mubr.bf16.gmra.mrb[24].mxu1 %v999_v9  ;;  %v984_v19 = vmax.f32 %v948_v12, 0.0 }
 0x13e   : > { %v943_v18 = vadd.f32 %v4566_v39, %v942_v17  ;;  %v982_v21 = vmax.f32 %v940_v14, 0.0  ;;  %v4320_v39 = vld [vmem:[%s5036_s7 + $0x8] sm:$0xff]  }
 0x13f   : > { %v985_v20 = vmax.f32 %v951_v16, 0.0  ;;  %4033 = vmatprep.subr.bf16.mxu1 %v4320_v39 }
 0x140   : > { %v983_v22 = vmax.f32 %v943_v18, 0.0  ;;  %4034 = vmatpush3.bf16.msra.mxu1 %v4320_v39 }
 0x141   : > { %v1001_v23 = vpack.c.bf16 %v985_v20, %v984_v19  ;;  %4035 = vmatprep.subr.bf16.mxu1 %v4321_v27 }
 0x142   : > { %v1000_v24 = vpack.c.bf16 %v983_v22, %v982_v21 }
 0x144   : > { %3979 = vmatprep.mubr.bf16.mxu1 %v1000_v24  ;;  %4036 = vmatpush3.bf16.msra.mxu1 %v4321_v27 }
 0x145   : > { %3980 = vmatmul.mubr.bf16.gmra.mrb[28].mxu1 %v1001_v23  ;;  %4037 = vmatprep.subr.bf16.mxu1 %v4322_v28 }
 0x148   : > { %4038 = vmatpush3.bf16.msra.mxu1 %v4322_v28 }
 0x149   : > { %4039 = vmatprep.subr.bf16.mxu1 %v4323_v29 }
 0x14c   : > { %4040 = vmatpush3.bf16.msra.mxu1 %v4323_v29 }
 0x14d   : > { %4041 = vmatprep.subr.bf16.mxu1 %v4324_v30 }
 0x150   : > { %4042 = vmatpush3.bf16.msra.mxu1 %v4324_v30 }
 0x151   : > { %4043 = vmatprep.subr.bf16.mxu1 %v4325_v31 }
 0x154   : > { %4044 = vmatpush3.bf16.msra.mxu1 %v4325_v31 }
 0x1e0   : > { %v3953_v33 = vpop.f32.mrb[0].mxu1 }
 0x1e1   : > { %v1116_v34 = vadd.f32 %v3953_v33, %v4627_v32  ;;  %v1107_v35 = vpop.f32.mrb[1].mxu1 }
 0x1e2   : > { %v1108_v36 = vadd.f32 %v4627_v32, %v1107_v35  ;;  %v3954_v37 = vpop.f32.mrb[2].mxu1 }
 0x1e3   : > { %v1119_v38 = vadd.f32 %v3954_v37, %v4627_v32  ;;  %v1110_v40 = vpop.f32.mrb[3].mxu1  ;;  %v1236_v42 = vmax.f32 %v1116_v34, 0.0 }
 0x1e4   : > { %v1111_v41 = vadd.f32 %v4627_v32, %v1110_v40  ;;  %v1234_v44 = vmax.f32 %v1108_v36, 0.0 }
 0x1e5   : > { %v1237_v43 = vmax.f32 %v1119_v38, 0.0 }
 0x1e6   : > { %v1235_v45 = vmax.f32 %v1111_v41, 0.0 }
 0x1e7   : > { %v1267_v46 = vpack.c.bf16 %v1237_v43, %v1236_v42 }
 0x1e8   : > { %v1266_v47 = vpack.c.bf16 %v1235_v45, %v1234_v44  ;;  %v3957_v48 = vpop.f32.mrb[4].mxu1 }
 0x1e9   : > { %v1132_v49 = vadd.f32 %v3957_v48, %v4627_v32  ;;  %v1123_v50 = vpop.f32.mrb[5].mxu1 }
 0x1ea   : > { %v1124_v51 = vadd.f32 %v4627_v32, %v1123_v50  ;;  %v3958_v52 = vpop.f32.mrb[6].mxu1  ;;  %3999 = vmatprep.mubr.bf16.mxu0 %v1266_v47 }
 0x1eb   : > { %v1135_v53 = vadd.f32 %v3958_v52, %v4627_v32  ;;  %v1126_v54 = vpop.f32.mrb[7].mxu1  ;;  %4000 = vmatmul.mubr.bf16.vlgmr.msra.gmra.mrb[32].mxu0 %v1267_v46  ;;  %v1240_v56 = vmax.f32 %v1132_v49, 0.0 }
 0x1ec   : > { %v1127_v55 = vadd.f32 %v4627_v32, %v1126_v54  ;;  %v1238_v58 = vmax.f32 %v1124_v51, 0.0 }
 0x1ed   : > { %v1241_v57 = vmax.f32 %v1135_v53, 0.0 }
 0x1ee   : > { %v1239_v59 = vmax.f32 %v1127_v55, 0.0 }
 0x1ef   : > { %v1269_v60 = vpack.c.bf16 %v1241_v57, %v1240_v56 }
 0x1f0   : > { %v1268_v61 = vpack.c.bf16 %v1239_v59, %v1238_v58  ;;  %v3961_v62 = vpop.f32.mrb[8].mxu1 }
 0x1f1   : > { %v1148_v63 = vadd.f32 %v3961_v62, %v4627_v32  ;;  %v1139_v0 = vpop.f32.mrb[9].mxu1 }
 0x1f2   : > { %v1140_v1 = vadd.f32 %v4627_v32, %v1139_v0  ;;  %v3962_v2 = vpop.f32.mrb[10].mxu1  ;;  %4003 = vmatprep.mubr.bf16.mxu0 %v1268_v61 }
 0x1f3   : > { %v1151_v3 = vadd.f32 %v3962_v2, %v4627_v32  ;;  %v1142_v4 = vpop.f32.mrb[11].mxu1  ;;  %4004 = vmatmul.mubr.bf16.gmra.mrb[36].mxu0 %v1269_v60  ;;  %v1244_v6 = vmax.f32 %v1148_v63, 0.0 }
 0x1f4   : > { %v1143_v5 = vadd.f32 %v4627_v32, %v1142_v4  ;;  %v1242_v8 = vmax.f32 %v1140_v1, 0.0 }
 0x1f5   : > { %v1245_v7 = vmax.f32 %v1151_v3, 0.0 }
 0x1f6   : > { %v1243_v9 = vmax.f32 %v1143_v5, 0.0 }
 0x1f7   : > { %v1271_v10 = vpack.c.bf16 %v1245_v7, %v1244_v6 }
 0x1f8   : > { %v1270_v11 = vpack.c.bf16 %v1243_v9, %v1242_v8  ;;  %v3965_v12 = vpop.f32.mrb[12].mxu1 }
 0x1f9   : > { %v1164_v13 = vadd.f32 %v3965_v12, %v4627_v32  ;;  %v1155_v14 = vpop.f32.mrb[13].mxu1 }
 0x1fa   : > { %v1156_v15 = vadd.f32 %v4627_v32, %v1155_v14  ;;  %v3966_v16 = vpop.f32.mrb[14].mxu1  ;;  %4007 = vmatprep.mubr.bf16.mxu0 %v1270_v11 }
 0x1fb   : > { %v1167_v17 = vadd.f32 %v3966_v16, %v4627_v32  ;;  %v1158_v18 = vpop.f32.mrb[15].mxu1  ;;  %4008 = vmatmul.mubr.bf16.gmra.mrb[40].mxu0 %v1271_v10  ;;  %v1248_v20 = vmax.f32 %v1164_v13, 0.0 }
 0x1fc   : > { %v1159_v19 = vadd.f32 %v4627_v32, %v1158_v18  ;;  %v1246_v22 = vmax.f32 %v1156_v15, 0.0 }
 0x1fd   : > { %v1249_v21 = vmax.f32 %v1167_v17, 0.0 }
 0x1fe   : > { %v1247_v23 = vmax.f32 %v1159_v19, 0.0  ;;  %v4326_v19 = vld [vmem:[%s5036_s7 + $0x38] sm:$0xff]  }
 0x1ff   : > { %v1273_v24 = vpack.c.bf16 %v1249_v21, %v1248_v20  ;;  %4045 = vmatprep.subr.bf16.mxu1 %v4326_v19  ;;  %v4327_v20 = vld [vmem:[%s5038_s9] sm:$0xff]   ;;  %v4329_v21 = vld [vmem:[%s5038_s9 + $0x10] sm:$0xff]  }
 0x200   : > { %v1272_v25 = vpack.c.bf16 %v1247_v23, %v1246_v22  ;;  %v3969_v26 = vpop.f32.mrb[16].mxu1  ;;  %4046 = vmatpush3.bf16.msra.mxu1 %v4326_v19  ;;  %4079 = vmatprep.subr.bf16.mxu0 %v4327_v20  ;;  %v4330_v22 = vld [vmem:[%s5038_s9 + $0x18] sm:$0xff]   ;;  %v4331_v23 = vld [vmem:[%s5038_s9 + $0x20] sm:$0xff]  }
 0x201   : > { %v1180_v39 = vadd.f32 %v3969_v26, %v4627_v32  ;;  %v1171_v27 = vpop.f32.mrb[17].mxu1  ;;  %4080 = vmatpush3.bf16.msra.mxu0 %v4327_v20  ;;  %v4688_v26 = vld [vmem:[%s5035_s6] ss:$0 sm:$0xff] }
 0x202   : > { %v1172_v28 = vadd.f32 %v4627_v32, %v1171_v27  ;;  %v3970_v29 = vpop.f32.mrb[18].mxu1  ;;  %4011 = vmatprep.mubr.bf16.mxu0 %v1272_v25  ;;  %v4333_v25 = vld [vmem:[%s5038_s9 + $0x30] sm:$0xff]  }
 0x203   : > { %v1183_v30 = vadd.f32 %v3970_v29, %v4627_v32  ;;  %v1174_v31 = vpop.f32.mrb[19].mxu1  ;;  %4012 = vmatmul.mubr.bf16.gmra.mrb[44].mxu0 %v1273_v24  ;;  %v1252_v34 = vmax.f32 %v1180_v39, 0.0  ;;  %v4332_v24 = vld [vmem:[%s5038_s9 + $0x28] sm:$0xff]  }
 0x204   : > { %v1175_v33 = vadd.f32 %v4627_v32, %v1174_v31  ;;  %v1250_v36 = vmax.f32 %v1172_v28, 0.0 }
 0x205   : > { %v1253_v35 = vmax.f32 %v1183_v30, 0.0 }
 0x206   : > { %v1251_v37 = vmax.f32 %v1175_v33, 0.0 }
 0x207   : > { %v1275_v38 = vpack.c.bf16 %v1253_v35, %v1252_v34 }
 0x208   : > { %v1274_v40 = vpack.c.bf16 %v1251_v37, %v1250_v36  ;;  %v3973_v41 = vpop.f32.mrb[20].mxu1 }
 0x209   : > { %v1196_v42 = vadd.f32 %v3973_v41, %v4627_v32  ;;  %v1187_v43 = vpop.f32.mrb[21].mxu1 }
 0x20a   : > { %v1188_v44 = vadd.f32 %v4627_v32, %v1187_v43  ;;  %v3974_v45 = vpop.f32.mrb[22].mxu1  ;;  %4015 = vmatprep.mubr.bf16.mxu0 %v1274_v40 }
 0x20b   : > { %v1199_v46 = vadd.f32 %v3974_v45, %v4627_v32  ;;  %v1190_v47 = vpop.f32.mrb[23].mxu1  ;;  %4016 = vmatmul.mubr.bf16.gmra.mrb[48].mxu0 %v1275_v38  ;;  %v1256_v49 = vmax.f32 %v1196_v42, 0.0 }
 0x20c   : > { %v1191_v48 = vadd.f32 %v4627_v32, %v1190_v47  ;;  %v1254_v51 = vmax.f32 %v1188_v44, 0.0 }
 0x20d   : > { %v1257_v50 = vmax.f32 %v1199_v46, 0.0 }
 0x20e   : > { %v1255_v52 = vmax.f32 %v1191_v48, 0.0 }
 0x20f   : > { %v1277_v53 = vpack.c.bf16 %v1257_v50, %v1256_v49 }
 0x210   : > { %v1276_v54 = vpack.c.bf16 %v1255_v52, %v1254_v51  ;;  %v3977_v55 = vpop.f32.mrb[24].mxu1 }
 0x211   : > { %v1212_v56 = vadd.f32 %v3977_v55, %v4627_v32  ;;  %v1203_v57 = vpop.f32.mrb[25].mxu1 }
 0x212   : > { %v1204_v58 = vadd.f32 %v4627_v32, %v1203_v57  ;;  %v3978_v59 = vpop.f32.mrb[26].mxu1  ;;  %4019 = vmatprep.mubr.bf16.mxu0 %v1276_v54 }
 0x213   : > { %v1215_v60 = vadd.f32 %v3978_v59, %v4627_v32  ;;  %v1206_v61 = vpop.f32.mrb[27].mxu1  ;;  %4020 = vmatmul.mubr.bf16.gmra.mrb[52].mxu0 %v1277_v53  ;;  %v1260_v63 = vmax.f32 %v1212_v56, 0.0 }
 0x214   : > { %v1207_v62 = vadd.f32 %v4627_v32, %v1206_v61  ;;  %v1258_v1 = vmax.f32 %v1204_v58, 0.0 }
 0x215   : > { %v1261_v0 = vmax.f32 %v1215_v60, 0.0 }
 0x216   : > { %v1259_v2 = vmax.f32 %v1207_v62, 0.0 }
 0x217   : > { %v1279_v3 = vpack.c.bf16 %v1261_v0, %v1260_v63 }
 0x218   : > { %v1278_v4 = vpack.c.bf16 %v1259_v2, %v1258_v1  ;;  %v3981_v5 = vpop.f32.mrb[28].mxu1 }
 0x219   : > { %v1228_v6 = vadd.f32 %v3981_v5, %v4627_v32  ;;  %v1219_v7 = vpop.f32.mrb[29].mxu1 }
 0x21a   : > { %v1220_v8 = vadd.f32 %v4627_v32, %v1219_v7  ;;  %v3982_v9 = vpop.f32.mrb[30].mxu1  ;;  %4023 = vmatprep.mubr.bf16.mxu0 %v1278_v4 }
 0x21b   : > { %v1231_v10 = vadd.f32 %v3982_v9, %v4627_v32  ;;  %v1222_v11 = vpop.f32.mrb[31].mxu1  ;;  %4024 = vmatmul.mubr.bf16.gmra.mrb[56].mxu0 %v1279_v3  ;;  %v1264_v13 = vmax.f32 %v1228_v6, 0.0 }
 0x21c   : > { %v1223_v12 = vadd.f32 %v4627_v32, %v1222_v11  ;;  %v1262_v15 = vmax.f32 %v1220_v8, 0.0  ;;  %v4328_v32 = vld [vmem:[%s5038_s9 + $0x8] sm:$0xff]  }
 0x21d   : > { %v1265_v14 = vmax.f32 %v1231_v10, 0.0  ;;  %4081 = vmatprep.subr.bf16.mxu0 %v4328_v32 }
 0x21e   : > { %v1263_v16 = vmax.f32 %v1223_v12, 0.0  ;;  %4082 = vmatpush3.bf16.msra.mxu0 %v4328_v32 }
 0x21f   : > { %v1281_v17 = vpack.c.bf16 %v1265_v14, %v1264_v13  ;;  %4083 = vmatprep.subr.bf16.mxu0 %v4329_v21 }
 0x220   : > { %v1280_v18 = vpack.c.bf16 %v1263_v16, %v1262_v15 }
 0x222   : > { %4027 = vmatprep.mubr.bf16.mxu0 %v1280_v18  ;;  %4084 = vmatpush3.bf16.msra.mxu0 %v4329_v21 }
 0x223   : > { %4028 = vmatmul.mubr.bf16.gmra.mrb[60].mxu0 %v1281_v17  ;;  %4085 = vmatprep.subr.bf16.mxu0 %v4330_v22 }
 0x226   : > { %4086 = vmatpush3.bf16.msra.mxu0 %v4330_v22 }
 0x227   : > { %4087 = vmatprep.subr.bf16.mxu0 %v4331_v23 }
 0x22a   : > { %4088 = vmatpush3.bf16.msra.mxu0 %v4331_v23 }
 0x22b   : > { %4089 = vmatprep.subr.bf16.mxu0 %v4332_v24 }
 0x22e   : > { %4090 = vmatpush3.bf16.msra.mxu0 %v4332_v24 }
 0x22f   : > { %4091 = vmatprep.subr.bf16.mxu0 %v4333_v25 }
 0x232   : > { %4092 = vmatpush3.bf16.msra.mxu0 %v4333_v25 }
 0x2be   : > { %v4001_v39 = vpop.f32.mrb[32].mxu0 }
 0x2bf   : > { %v1396_v27 = vadd.f32 %v4001_v39, %v4688_v26  ;;  %v1387_v28 = vpop.f32.mrb[33].mxu0 }
 0x2c0   : > { %v1388_v29 = vadd.f32 %v4688_v26, %v1387_v28  ;;  %v4002_v30 = vpop.f32.mrb[34].mxu0 }
 0x2c1   : > { %v1399_v31 = vadd.f32 %v4002_v30, %v4688_v26  ;;  %v1390_v33 = vpop.f32.mrb[35].mxu0  ;;  %v1516_v35 = vmax.f32 %v1396_v27, 0.0 }
 0x2c2   : > { %v1391_v34 = vadd.f32 %v4688_v26, %v1390_v33  ;;  %v1514_v37 = vmax.f32 %v1388_v29, 0.0 }
 0x2c3   : > { %v1517_v36 = vmax.f32 %v1399_v31, 0.0 }
 0x2c4   : > { %v1515_v38 = vmax.f32 %v1391_v34, 0.0 }
 0x2c5   : > { %v1547_v40 = vpack.c.bf16 %v1517_v36, %v1516_v35 }
 0x2c6   : > { %v1546_v41 = vpack.c.bf16 %v1515_v38, %v1514_v37  ;;  %v4005_v42 = vpop.f32.mrb[36].mxu0 }
 0x2c7   : > { %v1412_v43 = vadd.f32 %v4005_v42, %v4688_v26  ;;  %v1403_v44 = vpop.f32.mrb[37].mxu0 }
 0x2c8   : > { %v1404_v45 = vadd.f32 %v4688_v26, %v1403_v44  ;;  %v4006_v46 = vpop.f32.mrb[38].mxu0  ;;  %4047 = vmatprep.mubr.bf16.mxu1 %v1546_v41 }
 0x2c9   : > { %v1415_v47 = vadd.f32 %v4006_v46, %v4688_v26  ;;  %v1406_v48 = vpop.f32.mrb[39].mxu0  ;;  %4048 = vmatmul.mubr.bf16.vlgmr.msra.gmra.mrb[32].mxu1 %v1547_v40  ;;  %v1520_v50 = vmax.f32 %v1412_v43, 0.0 }
 0x2ca   : > { %v1407_v49 = vadd.f32 %v4688_v26, %v1406_v48  ;;  %v1518_v52 = vmax.f32 %v1404_v45, 0.0 }
 0x2cb   : > { %v1521_v51 = vmax.f32 %v1415_v47, 0.0 }
 0x2cc   : > { %v1519_v53 = vmax.f32 %v1407_v49, 0.0 }
 0x2cd   : > { %v1549_v54 = vpack.c.bf16 %v1521_v51, %v1520_v50 }
 0x2ce   : > { %v1548_v55 = vpack.c.bf16 %v1519_v53, %v1518_v52  ;;  %v4009_v56 = vpop.f32.mrb[40].mxu0 }
 0x2cf   : > { %v1428_v57 = vadd.f32 %v4009_v56, %v4688_v26  ;;  %v1419_v58 = vpop.f32.mrb[41].mxu0 }
 0x2d0   : > { %v1420_v59 = vadd.f32 %v4688_v26, %v1419_v58  ;;  %v4010_v60 = vpop.f32.mrb[42].mxu0  ;;  %4051 = vmatprep.mubr.bf16.mxu1 %v1548_v55 }
 0x2d1   : > { %v1431_v61 = vadd.f32 %v4010_v60, %v4688_v26  ;;  %v1422_v62 = vpop.f32.mrb[43].mxu0  ;;  %4052 = vmatmul.mubr.bf16.gmra.mrb[36].mxu1 %v1549_v54  ;;  %v1524_v0 = vmax.f32 %v1428_v57, 0.0 }
 0x2d2   : > { %v1423_v63 = vadd.f32 %v4688_v26, %v1422_v62  ;;  %v1522_v2 = vmax.f32 %v1420_v59, 0.0 }
 0x2d3   : > { %v1525_v1 = vmax.f32 %v1431_v61, 0.0 }
 0x2d4   : > { %v1523_v3 = vmax.f32 %v1423_v63, 0.0 }
 0x2d5   : > { %v1551_v4 = vpack.c.bf16 %v1525_v1, %v1524_v0 }
 0x2d6   : > { %v1550_v5 = vpack.c.bf16 %v1523_v3, %v1522_v2  ;;  %v4013_v6 = vpop.f32.mrb[44].mxu0 }
 0x2d7   : > { %v1444_v7 = vadd.f32 %v4013_v6, %v4688_v26  ;;  %v1435_v8 = vpop.f32.mrb[45].mxu0 }
 0x2d8   : > { %v1436_v9 = vadd.f32 %v4688_v26, %v1435_v8  ;;  %v4014_v10 = vpop.f32.mrb[46].mxu0  ;;  %4055 = vmatprep.mubr.bf16.mxu1 %v1550_v5 }
 0x2d9   : > { %v1447_v11 = vadd.f32 %v4014_v10, %v4688_v26  ;;  %v1438_v12 = vpop.f32.mrb[47].mxu0  ;;  %4056 = vmatmul.mubr.bf16.gmra.mrb[40].mxu1 %v1551_v4  ;;  %v1528_v14 = vmax.f32 %v1444_v7, 0.0 }
 0x2da   : > { %v1439_v13 = vadd.f32 %v4688_v26, %v1438_v12  ;;  %v1526_v16 = vmax.f32 %v1436_v9, 0.0 }
 0x2db   : > { %v1529_v15 = vmax.f32 %v1447_v11, 0.0 }
 0x2dc   : > { %v1527_v17 = vmax.f32 %v1439_v13, 0.0  ;;  %v4334_v13 = vld [vmem:[%s5038_s9 + $0x38] sm:$0xff]  }
 0x2dd   : > { %v1553_v18 = vpack.c.bf16 %v1529_v15, %v1528_v14  ;;  %4093 = vmatprep.subr.bf16.mxu0 %v4334_v13  ;;  %v4335_v14 = vld [vmem:[%s5040_s11] sm:$0xff]   ;;  %v4337_v15 = vld [vmem:[%s5040_s11 + $0x10] sm:$0xff]  }
 0x2de   : > { %v1552_v19 = vpack.c.bf16 %v1527_v17, %v1526_v16  ;;  %v4017_v20 = vpop.f32.mrb[48].mxu0  ;;  %4094 = vmatpush3.bf16.msra.mxu0 %v4334_v13  ;;  %4127 = vmatprep.subr.bf16.mxu1 %v4335_v14  ;;  %v4338_v16 = vld [vmem:[%s5040_s11 + $0x18] sm:$0xff]   ;;  %v4339_v17 = vld [vmem:[%s5040_s11 + $0x20] sm:$0xff]  }
 0x2df   : > { %v1460_v32 = vadd.f32 %v4017_v20, %v4688_v26  ;;  %v1451_v21 = vpop.f32.mrb[49].mxu0  ;;  %4128 = vmatpush3.bf16.msra.mxu1 %v4335_v14 }
 0x2e0   : > { %v1452_v22 = vadd.f32 %v4688_v26, %v1451_v21  ;;  %v4018_v23 = vpop.f32.mrb[50].mxu0  ;;  %4059 = vmatprep.mubr.bf16.mxu1 %v1552_v19  ;;  %v4341_v19 = vld [vmem:[%s5040_s11 + $0x30] sm:$0xff]  }
 0x2e1   : > { %v1463_v24 = vadd.f32 %v4018_v23, %v4688_v26  ;;  %v1454_v25 = vpop.f32.mrb[51].mxu0  ;;  %4060 = vmatmul.mubr.bf16.gmra.mrb[44].mxu1 %v1553_v18  ;;  %v1532_v27 = vmax.f32 %v1460_v32, 0.0  ;;  %v4340_v18 = vld [vmem:[%s5040_s11 + $0x28] sm:$0xff]   ;;  %v4749_v32 = vld [vmem:[%s5037_s8] ss:$0 sm:$0xff] }
 0x2e2   : > { %v1455_v39 = vadd.f32 %v4688_v26, %v1454_v25  ;;  %v1530_v29 = vmax.f32 %v1452_v22, 0.0 }
 0x2e3   : > { %v1533_v28 = vmax.f32 %v1463_v24, 0.0 }
 0x2e4   : > { %v1531_v30 = vmax.f32 %v1455_v39, 0.0 }
 0x2e5   : > { %v1555_v31 = vpack.c.bf16 %v1533_v28, %v1532_v27 }
 0x2e6   : > { %v1554_v33 = vpack.c.bf16 %v1531_v30, %v1530_v29  ;;  %v4021_v34 = vpop.f32.mrb[52].mxu0 }
 0x2e7   : > { %v1476_v35 = vadd.f32 %v4021_v34, %v4688_v26  ;;  %v1467_v36 = vpop.f32.mrb[53].mxu0 }
 0x2e8   : > { %v1468_v37 = vadd.f32 %v4688_v26, %v1467_v36  ;;  %v4022_v38 = vpop.f32.mrb[54].mxu0  ;;  %4063 = vmatprep.mubr.bf16.mxu1 %v1554_v33 }
 0x2e9   : > { %v1479_v40 = vadd.f32 %v4022_v38, %v4688_v26  ;;  %v1470_v41 = vpop.f32.mrb[55].mxu0  ;;  %4064 = vmatmul.mubr.bf16.gmra.mrb[48].mxu1 %v1555_v31  ;;  %v1536_v43 = vmax.f32 %v1476_v35, 0.0 }
 0x2ea   : > { %v1471_v42 = vadd.f32 %v4688_v26, %v1470_v41  ;;  %v1534_v45 = vmax.f32 %v1468_v37, 0.0 }
 0x2eb   : > { %v1537_v44 = vmax.f32 %v1479_v40, 0.0 }
 0x2ec   : > { %v1535_v46 = vmax.f32 %v1471_v42, 0.0 }
 0x2ed   : > { %v1557_v47 = vpack.c.bf16 %v1537_v44, %v1536_v43 }
 0x2ee   : > { %v1556_v48 = vpack.c.bf16 %v1535_v46, %v1534_v45  ;;  %v4025_v49 = vpop.f32.mrb[56].mxu0 }
 0x2ef   : > { %v1492_v50 = vadd.f32 %v4025_v49, %v4688_v26  ;;  %v1483_v51 = vpop.f32.mrb[57].mxu0 }
 0x2f0   : > { %v1484_v52 = vadd.f32 %v4688_v26, %v1483_v51  ;;  %v4026_v53 = vpop.f32.mrb[58].mxu0  ;;  %4067 = vmatprep.mubr.bf16.mxu1 %v1556_v48 }
 0x2f1   : > { %v1495_v54 = vadd.f32 %v4026_v53, %v4688_v26  ;;  %v1486_v55 = vpop.f32.mrb[59].mxu0  ;;  %4068 = vmatmul.mubr.bf16.gmra.mrb[52].mxu1 %v1557_v47  ;;  %v1540_v57 = vmax.f32 %v1492_v50, 0.0 }
 0x2f2   : > { %v1487_v56 = vadd.f32 %v4688_v26, %v1486_v55  ;;  %v1538_v59 = vmax.f32 %v1484_v52, 0.0 }
 0x2f3   : > { %v1541_v58 = vmax.f32 %v1495_v54, 0.0 }
 0x2f4   : > { %v1539_v60 = vmax.f32 %v1487_v56, 0.0 }
 0x2f5   : > { %v1559_v61 = vpack.c.bf16 %v1541_v58, %v1540_v57 }
 0x2f6   : > { %v1558_v62 = vpack.c.bf16 %v1539_v60, %v1538_v59  ;;  %v4029_v63 = vpop.f32.mrb[60].mxu0 }
 0x2f7   : > { %v1508_v0 = vadd.f32 %v4029_v63, %v4688_v26  ;;  %v1499_v1 = vpop.f32.mrb[61].mxu0 }
 0x2f8   : > { %v1500_v2 = vadd.f32 %v4688_v26, %v1499_v1  ;;  %v4030_v3 = vpop.f32.mrb[62].mxu0  ;;  %4071 = vmatprep.mubr.bf16.mxu1 %v1558_v62 }
 0x2f9   : > { %v1511_v4 = vadd.f32 %v4030_v3, %v4688_v26  ;;  %v1502_v5 = vpop.f32.mrb[63].mxu0  ;;  %4072 = vmatmul.mubr.bf16.gmra.mrb[56].mxu1 %v1559_v61  ;;  %v1544_v7 = vmax.f32 %v1508_v0, 0.0 }
 0x2fa   : > { %v1503_v6 = vadd.f32 %v4688_v26, %v1502_v5  ;;  %v1542_v9 = vmax.f32 %v1500_v2, 0.0  ;;  %v4336_v26 = vld [vmem:[%s5040_s11 + $0x8] sm:$0xff]  }
 0x2fb   : > { %v1545_v8 = vmax.f32 %v1511_v4, 0.0  ;;  %4129 = vmatprep.subr.bf16.mxu1 %v4336_v26 }
 0x2fc   : > { %v1543_v10 = vmax.f32 %v1503_v6, 0.0  ;;  %4130 = vmatpush3.bf16.msra.mxu1 %v4336_v26 }
 0x2fd   : > { %v1561_v11 = vpack.c.bf16 %v1545_v8, %v1544_v7  ;;  %4131 = vmatprep.subr.bf16.mxu1 %v4337_v15 }
 0x2fe   : > { %v1560_v12 = vpack.c.bf16 %v1543_v10, %v1542_v9 }
 0x300   : > { %4075 = vmatprep.mubr.bf16.mxu1 %v1560_v12  ;;  %4132 = vmatpush3.bf16.msra.mxu1 %v4337_v15 }
 0x301   : > { %4076 = vmatmul.mubr.bf16.gmra.mrb[60].mxu1 %v1561_v11  ;;  %4133 = vmatprep.subr.bf16.mxu1 %v4338_v16 }
 0x304   : > { %4134 = vmatpush3.bf16.msra.mxu1 %v4338_v16 }
 0x305   : > { %4135 = vmatprep.subr.bf16.mxu1 %v4339_v17 }
 0x308   : > { %4136 = vmatpush3.bf16.msra.mxu1 %v4339_v17 }
 0x309   : > { %4137 = vmatprep.subr.bf16.mxu1 %v4340_v18 }
 0x30c   : > { %4138 = vmatpush3.bf16.msra.mxu1 %v4340_v18 }
 0x30d   : > { %4139 = vmatprep.subr.bf16.mxu1 %v4341_v19 }
 0x310   : > { %4140 = vmatpush3.bf16.msra.mxu1 %v4341_v19 }
 0x39c   : > { %v4049_v20 = vpop.f32.mrb[32].mxu1 }
 0x39d   : > { %v1667_v21 = vpop.f32.mrb[33].mxu1  ;;  %v1676_v23 = vadd.f32 %v4049_v20, %v4749_v32 }
 0x39e   : > { %v4050_v22 = vpop.f32.mrb[34].mxu1  ;;  %v1668_v39 = vadd.f32 %v4749_v32, %v1667_v21 }
 0x39f   : > { %v1679_v24 = vadd.f32 %v4050_v22, %v4749_v32  ;;  %v1670_v25 = vpop.f32.mrb[35].mxu1 }
 0x3a0   : > { %v1671_v27 = vadd.f32 %v4749_v32, %v1670_v25 }
 0x3a1   : > { %v1795_v28 = vpack.c.bf16 %v1679_v24, %v1676_v23 }
 0x3a2   : > { %v1794_v29 = vpack.c.bf16 %v1671_v27, %v1668_v39 }
 0x3a3   : > { %3665 = vst [vmem:[%s4758_s20 + $0x8] sm:$0xff] %v1795_v28  }
 0x3a4   : > { %3509 = vst [vmem:[%s4758_s20] sm:$0xff] %v1794_v29   ;;  %v4053_v30 = vpop.f32.mrb[36].mxu1  ;;  %4095 = vmatprep.mubr.bf16.mxu0 %v1794_v29 }
 0x3a5   : > { %v1683_v31 = vpop.f32.mrb[37].mxu1  ;;  %4096 = vmatmul.mubr.bf16.vlgmr.msra.gmra.mrb[64].mxu0 %v1795_v28  ;;  %v1692_v34 = vadd.f32 %v4053_v30, %v4749_v32 }
 0x3a6   : > { %v4054_v33 = vpop.f32.mrb[38].mxu1  ;;  %v1684_v37 = vadd.f32 %v4749_v32, %v1683_v31 }
 0x3a7   : > { %v1695_v35 = vadd.f32 %v4054_v33, %v4749_v32  ;;  %v1686_v36 = vpop.f32.mrb[39].mxu1 }
 0x3a8   : > { %v1687_v38 = vadd.f32 %v4749_v32, %v1686_v36 }
 0x3a9   : > { %v1797_v40 = vpack.c.bf16 %v1695_v35, %v1692_v34 }
 0x3aa   : > { %v1796_v41 = vpack.c.bf16 %v1687_v38, %v1684_v37  ;;  %v4342_v38 = vld [vmem:[%s5040_s11 + $0x38] sm:$0xff]  }
 0x3ab   : > { %3667 = vst [vmem:[%s4758_s20 + $0x18] sm:$0xff] %v1797_v40   ;;  %4141 = vmatprep.subr.bf16.mxu1 %v4342_v38 }
 0x3ac   : > { %3666 = vst [vmem:[%s4758_s20 + $0x10] sm:$0xff] %v1796_v41   ;;  %v4057_v42 = vpop.f32.mrb[40].mxu1  ;;  %4099 = vmatprep.mubr.bf16.mxu0 %v1796_v41  ;;  %4142 = vmatpush3.bf16.msra.mxu1 %v4342_v38  ;;  %v4345_v41 = vld [vmem:[%s5042_s13 + $0x10] sm:$0xff]  }
 0x3ad   : > { %v1699_v43 = vpop.f32.mrb[41].mxu1  ;;  %4100 = vmatmul.mubr.bf16.gmra.mrb[68].mxu0 %v1797_v40  ;;  %v1708_v45 = vadd.f32 %v4057_v42, %v4749_v32  ;;  %v4343_v40 = vld [vmem:[%s5042_s13] sm:$0xff]   ;;  %v4346_v42 = vld [vmem:[%s5042_s13 + $0x18] sm:$0xff]  }
 0x3ae   : > { %v4058_v44 = vpop.f32.mrb[42].mxu1  ;;  %v1700_v48 = vadd.f32 %v4749_v32, %v1699_v43  ;;  %4175 = vmatprep.subr.bf16.mxu0 %v4343_v40  ;;  %v4347_v43 = vld [vmem:[%s5042_s13 + $0x20] sm:$0xff]  }
 0x3af   : > { %v1711_v46 = vadd.f32 %v4058_v44, %v4749_v32  ;;  %v1702_v47 = vpop.f32.mrb[43].mxu1  ;;  %4176 = vmatpush3.bf16.msra.mxu0 %v4343_v40  ;;  %v4348_v44 = vld [vmem:[%s5042_s13 + $0x28] sm:$0xff]  }
 0x3b0   : > { %v1703_v49 = vadd.f32 %v4749_v32, %v1702_v47 }
 0x3b1   : > { %v1799_v50 = vpack.c.bf16 %v1711_v46, %v1708_v45  ;;  %v4349_v45 = vld [vmem:[%s5042_s13 + $0x30] sm:$0xff]   ;;  %v4832_v46 = vld [vmem:[%s5039_s10] ss:$0 sm:$0xff] }
 0x3b2   : > { %v1798_v51 = vpack.c.bf16 %v1703_v49, %v1700_v48 }
 0x3b3   : > { %3669 = vst [vmem:[%s4758_s20 + $0x28] sm:$0xff] %v1799_v50  }
 0x3b4   : > { %3668 = vst [vmem:[%s4758_s20 + $0x20] sm:$0xff] %v1798_v51   ;;  %v4061_v52 = vpop.f32.mrb[44].mxu1  ;;  %4103 = vmatprep.mubr.bf16.mxu0 %v1798_v51 }
 0x3b5   : > { %v1715_v53 = vpop.f32.mrb[45].mxu1  ;;  %4104 = vmatmul.mubr.bf16.gmra.mrb[72].mxu0 %v1799_v50  ;;  %v1724_v55 = vadd.f32 %v4061_v52, %v4749_v32 }
 0x3b6   : > { %v4062_v54 = vpop.f32.mrb[46].mxu1  ;;  %v1716_v58 = vadd.f32 %v4749_v32, %v1715_v53 }
 0x3b7   : > { %v1727_v56 = vadd.f32 %v4062_v54, %v4749_v32  ;;  %v1718_v57 = vpop.f32.mrb[47].mxu1 }
 0x3b8   : > { %v1719_v59 = vadd.f32 %v4749_v32, %v1718_v57 }
 0x3b9   : > { %v1801_v60 = vpack.c.bf16 %v1727_v56, %v1724_v55 }
 0x3ba   : > { %v1800_v61 = vpack.c.bf16 %v1719_v59, %v1716_v58 }
 0x3bb   : > { %3671 = vst [vmem:[%s4758_s20 + $0x38] sm:$0xff] %v1801_v60  }
 0x3bc   : > { %3670 = vst [vmem:[%s4758_s20 + $0x30] sm:$0xff] %v1800_v61   ;;  %v4065_v62 = vpop.f32.mrb[48].mxu1  ;;  %4107 = vmatprep.mubr.bf16.mxu0 %v1800_v61 }
 0x3bd   : > { %v1731_v63 = vpop.f32.mrb[49].mxu1  ;;  %4108 = vmatmul.mubr.bf16.gmra.mrb[76].mxu0 %v1801_v60  ;;  %v1740_v1 = vadd.f32 %v4065_v62, %v4749_v32 }
 0x3be   : > { %v4066_v0 = vpop.f32.mrb[50].mxu1  ;;  %v1732_v4 = vadd.f32 %v4749_v32, %v1731_v63 }
 0x3bf   : > { %v1743_v2 = vadd.f32 %v4066_v0, %v4749_v32  ;;  %v1734_v3 = vpop.f32.mrb[51].mxu1 }
 0x3c0   : > { %v1735_v5 = vadd.f32 %v4749_v32, %v1734_v3 }
 0x3c1   : > { %v1803_v6 = vpack.c.bf16 %v1743_v2, %v1740_v1 }
 0x3c2   : > { %v1802_v7 = vpack.c.bf16 %v1735_v5, %v1732_v4 }
 0x3c3   : > { %3673 = vst [vmem:[%s4758_s20 + $0x48] sm:$0xff] %v1803_v6  }
 0x3c4   : > { %3672 = vst [vmem:[%s4758_s20 + $0x40] sm:$0xff] %v1802_v7   ;;  %v4069_v8 = vpop.f32.mrb[52].mxu1  ;;  %4111 = vmatprep.mubr.bf16.mxu0 %v1802_v7 }
 0x3c5   : > { %v1747_v9 = vpop.f32.mrb[53].mxu1  ;;  %4112 = vmatmul.mubr.bf16.gmra.mrb[80].mxu0 %v1803_v6  ;;  %v1756_v11 = vadd.f32 %v4069_v8, %v4749_v32 }
 0x3c6   : > { %v4070_v10 = vpop.f32.mrb[54].mxu1  ;;  %v1748_v14 = vadd.f32 %v4749_v32, %v1747_v9 }
 0x3c7   : > { %v1759_v12 = vadd.f32 %v4070_v10, %v4749_v32  ;;  %v1750_v13 = vpop.f32.mrb[55].mxu1 }
 0x3c8   : > { %v1751_v26 = vadd.f32 %v4749_v32, %v1750_v13 }
 0x3c9   : > { %v1805_v15 = vpack.c.bf16 %v1759_v12, %v1756_v11 }
 0x3ca   : > { %v1804_v16 = vpack.c.bf16 %v1751_v26, %v1748_v14 }
 0x3cb   : > { %3675 = vst [vmem:[%s4758_s20 + $0x58] sm:$0xff] %v1805_v15  }
 0x3cc   : > { %3674 = vst [vmem:[%s4758_s20 + $0x50] sm:$0xff] %v1804_v16   ;;  %v4073_v17 = vpop.f32.mrb[56].mxu1  ;;  %4115 = vmatprep.mubr.bf16.mxu0 %v1804_v16 }
 0x3cd   : > { %v1763_v18 = vpop.f32.mrb[57].mxu1  ;;  %4116 = vmatmul.mubr.bf16.gmra.mrb[84].mxu0 %v1805_v15  ;;  %v1772_v20 = vadd.f32 %v4073_v17, %v4749_v32 }
 0x3ce   : > { %v4074_v19 = vpop.f32.mrb[58].mxu1  ;;  %v1764_v23 = vadd.f32 %v4749_v32, %v1763_v18 }
 0x3cf   : > { %v1775_v21 = vadd.f32 %v4074_v19, %v4749_v32  ;;  %v1766_v22 = vpop.f32.mrb[59].mxu1 }
 0x3d0   : > { %v1767_v24 = vadd.f32 %v4749_v32, %v1766_v22 }
 0x3d1   : > { %v1807_v25 = vpack.c.bf16 %v1775_v21, %v1772_v20 }
 0x3d2   : > { %v1806_v39 = vpack.c.bf16 %v1767_v24, %v1764_v23 }
 0x3d3   : > { %3677 = vst [vmem:[%s4758_s20 + $0x68] sm:$0xff] %v1807_v25  }
 0x3d4   : > { %3676 = vst [vmem:[%s4758_s20 + $0x60] sm:$0xff] %v1806_v39   ;;  %v4077_v27 = vpop.f32.mrb[60].mxu1  ;;  %4119 = vmatprep.mubr.bf16.mxu0 %v1806_v39 }
 0x3d5   : > { %v1779_v28 = vpop.f32.mrb[61].mxu1  ;;  %4120 = vmatmul.mubr.bf16.gmra.mrb[88].mxu0 %v1807_v25  ;;  %v1788_v30 = vadd.f32 %v4077_v27, %v4749_v32 }
 0x3d6   : > { %v4078_v29 = vpop.f32.mrb[62].mxu1  ;;  %v1780_v34 = vadd.f32 %v4749_v32, %v1779_v28 }
 0x3d7   : > { %v1791_v31 = vadd.f32 %v4078_v29, %v4749_v32  ;;  %v1782_v33 = vpop.f32.mrb[63].mxu1 }
 0x3d8   : > { %v1783_v35 = vadd.f32 %v4749_v32, %v1782_v33  ;;  %v4344_v32 = vld [vmem:[%s5042_s13 + $0x8] sm:$0xff]  }
 0x3d9   : > { %v1809_v36 = vpack.c.bf16 %v1791_v31, %v1788_v30  ;;  %4177 = vmatprep.subr.bf16.mxu0 %v4344_v32 }
 0x3da   : > { %v1808_v37 = vpack.c.bf16 %v1783_v35, %v1780_v34  ;;  %4178 = vmatpush3.bf16.msra.mxu0 %v4344_v32 }
 0x3db   : > { %3679 = vst [vmem:[%s4758_s20 + $0x78] sm:$0xff] %v1809_v36   ;;  %4179 = vmatprep.subr.bf16.mxu0 %v4345_v41 }
 0x3dc   : > { %3678 = vst [vmem:[%s4758_s20 + $0x70] sm:$0xff] %v1808_v37   ;;  %4123 = vmatprep.mubr.bf16.mxu0 %v1808_v37 }
 0x3dd   : > { %4124 = vmatmul.mubr.bf16.gmra.mrb[92].mxu0 %v1809_v36 }
 0x3de   : > { %4180 = vmatpush3.bf16.msra.mxu0 %v4345_v41 }
 0x3df   : > { %4181 = vmatprep.subr.bf16.mxu0 %v4346_v42 }
 0x3e2   : > { %4182 = vmatpush3.bf16.msra.mxu0 %v4346_v42 }
 0x3e3   : > { %4183 = vmatprep.subr.bf16.mxu0 %v4347_v43 }
 0x3e6   : > { %4184 = vmatpush3.bf16.msra.mxu0 %v4347_v43 }
 0x3e7   : > { %4185 = vmatprep.subr.bf16.mxu0 %v4348_v44 }
 0x3ea   : > { %4186 = vmatpush3.bf16.msra.mxu0 %v4348_v44 }
 0x3eb   : > { %4187 = vmatprep.subr.bf16.mxu0 %v4349_v45 }
 0x3ee   : > { %4188 = vmatpush3.bf16.msra.mxu0 %v4349_v45 }
 0x478   : > { %v4097_v47 = vpop.f32.mrb[64].mxu0 }
 0x479   : > { %v2068_v48 = vadd.f32 %v4097_v47, %v4832_v46  ;;  %v2059_v49 = vpop.f32.mrb[65].mxu0 }
 0x47a   : > { %v2060_v50 = vadd.f32 %v4832_v46, %v2059_v49  ;;  %v4098_v51 = vpop.f32.mrb[66].mxu0 }
 0x47b   : > { %v2071_v52 = vadd.f32 %v4098_v51, %v4832_v46  ;;  %v2062_v53 = vpop.f32.mrb[67].mxu0  ;;  %v2188_v55 = vmax.f32 %v2068_v48, 0.0 }
 0x47c   : > { %v2063_v54 = vadd.f32 %v4832_v46, %v2062_v53  ;;  %v2186_v57 = vmax.f32 %v2060_v50, 0.0 }
 0x47d   : > { %v2189_v56 = vmax.f32 %v2071_v52, 0.0 }
 0x47e   : > { %v2187_v58 = vmax.f32 %v2063_v54, 0.0 }
 0x47f   : > { %v2219_v59 = vpack.c.bf16 %v2189_v56, %v2188_v55 }
 0x480   : > { %v2218_v60 = vpack.c.bf16 %v2187_v58, %v2186_v57  ;;  %v4101_v61 = vpop.f32.mrb[68].mxu0 }
 0x481   : > { %v2084_v62 = vadd.f32 %v4101_v61, %v4832_v46  ;;  %v2075_v63 = vpop.f32.mrb[69].mxu0 }
 0x482   : > { %v2076_v0 = vadd.f32 %v4832_v46, %v2075_v63  ;;  %v4102_v1 = vpop.f32.mrb[70].mxu0  ;;  %4143 = vmatprep.mubr.bf16.mxu1 %v2218_v60 }
 0x483   : > { %v2087_v2 = vadd.f32 %v4102_v1, %v4832_v46  ;;  %v2078_v3 = vpop.f32.mrb[71].mxu0  ;;  %4144 = vmatmul.mubr.bf16.vlgmr.msra.gmra.mrb[64].mxu1 %v2219_v59  ;;  %v2192_v5 = vmax.f32 %v2084_v62, 0.0 }
 0x484   : > { %v2079_v4 = vadd.f32 %v4832_v46, %v2078_v3  ;;  %v2190_v7 = vmax.f32 %v2076_v0, 0.0 }
 0x485   : > { %v2193_v6 = vmax.f32 %v2087_v2, 0.0 }
 0x486   : > { %v2191_v8 = vmax.f32 %v2079_v4, 0.0 }
 0x487   : > { %v2221_v9 = vpack.c.bf16 %v2193_v6, %v2192_v5 }
 0x488   : > { %v2220_v10 = vpack.c.bf16 %v2191_v8, %v2190_v7  ;;  %v4105_v11 = vpop.f32.mrb[72].mxu0 }
 0x489   : > { %v2100_v12 = vadd.f32 %v4105_v11, %v4832_v46  ;;  %v2091_v13 = vpop.f32.mrb[73].mxu0 }
 0x48a   : > { %v2092_v14 = vadd.f32 %v4832_v46, %v2091_v13  ;;  %v4106_v26 = vpop.f32.mrb[74].mxu0  ;;  %4147 = vmatprep.mubr.bf16.mxu1 %v2220_v10 }
 0x48b   : > { %v2103_v15 = vadd.f32 %v4106_v26, %v4832_v46  ;;  %v2094_v16 = vpop.f32.mrb[75].mxu0  ;;  %4148 = vmatmul.mubr.bf16.gmra.mrb[68].mxu1 %v2221_v9  ;;  %v2196_v18 = vmax.f32 %v2100_v12, 0.0 }
 0x48c   : > { %v2095_v17 = vadd.f32 %v4832_v46, %v2094_v16  ;;  %v2194_v20 = vmax.f32 %v2092_v14, 0.0 }
 0x48d   : > { %v2197_v19 = vmax.f32 %v2103_v15, 0.0 }
 0x48e   : > { %v2195_v21 = vmax.f32 %v2095_v17, 0.0 }
 0x48f   : > { %v2223_v22 = vpack.c.bf16 %v2197_v19, %v2196_v18 }
 0x490   : > { %v2222_v23 = vpack.c.bf16 %v2195_v21, %v2194_v20  ;;  %v4109_v24 = vpop.f32.mrb[76].mxu0 }
 0x491   : > { %v2116_v25 = vadd.f32 %v4109_v24, %v4832_v46  ;;  %v2107_v39 = vpop.f32.mrb[77].mxu0 }
 0x492   : > { %v2108_v27 = vadd.f32 %v4832_v46, %v2107_v39  ;;  %v4110_v28 = vpop.f32.mrb[78].mxu0  ;;  %4151 = vmatprep.mubr.bf16.mxu1 %v2222_v23 }
 0x493   : > { %v2119_v29 = vadd.f32 %v4110_v28, %v4832_v46  ;;  %v2110_v30 = vpop.f32.mrb[79].mxu0  ;;  %4152 = vmatmul.mubr.bf16.gmra.mrb[72].mxu1 %v2223_v22  ;;  %v2200_v33 = vmax.f32 %v2116_v25, 0.0 }
 0x494   : > { %v2111_v31 = vadd.f32 %v4832_v46, %v2110_v30  ;;  %v2198_v35 = vmax.f32 %v2108_v27, 0.0 }
 0x495   : > { %v2201_v34 = vmax.f32 %v2119_v29, 0.0 }
 0x496   : > { %v2199_v36 = vmax.f32 %v2111_v31, 0.0  ;;  %v4350_v31 = vld [vmem:[%s5042_s13 + $0x38] sm:$0xff]  }
 0x497   : > { %v2225_v37 = vpack.c.bf16 %v2201_v34, %v2200_v33  ;;  %4189 = vmatprep.subr.bf16.mxu0 %v4350_v31  ;;  %v4351_v33 = vld [vmem:[%s5044_s15] sm:$0xff]   ;;  %v4353_v34 = vld [vmem:[%s5044_s15 + $0x10] sm:$0xff]  }
 0x498   : > { %v2224_v38 = vpack.c.bf16 %v2199_v36, %v2198_v35  ;;  %v4113_v40 = vpop.f32.mrb[80].mxu0  ;;  %4190 = vmatpush3.bf16.msra.mxu0 %v4350_v31  ;;  %4223 = vmatprep.subr.bf16.mxu1 %v4351_v33  ;;  %v4354_v35 = vld [vmem:[%s5044_s15 + $0x18] sm:$0xff]   ;;  %v4355_v36 = vld [vmem:[%s5044_s15 + $0x20] sm:$0xff]  }
 0x499   : > { %v2132_v32 = vadd.f32 %v4113_v40, %v4832_v46  ;;  %v2123_v41 = vpop.f32.mrb[81].mxu0  ;;  %4224 = vmatpush3.bf16.msra.mxu1 %v4351_v33  ;;  %v4893_v40 = vld [vmem:[%s5041_s12] ss:$0 sm:$0xff] }
 0x49a   : > { %v2124_v42 = vadd.f32 %v4832_v46, %v2123_v41  ;;  %v4114_v43 = vpop.f32.mrb[82].mxu0  ;;  %4155 = vmatprep.mubr.bf16.mxu1 %v2224_v38  ;;  %v4357_v38 = vld [vmem:[%s5044_s15 + $0x30] sm:$0xff]  }
 0x49b   : > { %v2135_v44 = vadd.f32 %v4114_v43, %v4832_v46  ;;  %v2126_v45 = vpop.f32.mrb[83].mxu0  ;;  %4156 = vmatmul.mubr.bf16.gmra.mrb[76].mxu1 %v2225_v37  ;;  %v2204_v48 = vmax.f32 %v2132_v32, 0.0  ;;  %v4356_v37 = vld [vmem:[%s5044_s15 + $0x28] sm:$0xff]  }
 0x49c   : > { %v2127_v47 = vadd.f32 %v4832_v46, %v2126_v45  ;;  %v2202_v50 = vmax.f32 %v2124_v42, 0.0 }
 0x49d   : > { %v2205_v49 = vmax.f32 %v2135_v44, 0.0 }
 0x49e   : > { %v2203_v51 = vmax.f32 %v2127_v47, 0.0 }
 0x49f   : > { %v2227_v52 = vpack.c.bf16 %v2205_v49, %v2204_v48 }
 0x4a0   : > { %v2226_v53 = vpack.c.bf16 %v2203_v51, %v2202_v50  ;;  %v4117_v54 = vpop.f32.mrb[84].mxu0 }
 0x4a1   : > { %v2148_v55 = vadd.f32 %v4117_v54, %v4832_v46  ;;  %v2139_v56 = vpop.f32.mrb[85].mxu0 }
 0x4a2   : > { %v2140_v57 = vadd.f32 %v4832_v46, %v2139_v56  ;;  %v4118_v58 = vpop.f32.mrb[86].mxu0  ;;  %4159 = vmatprep.mubr.bf16.mxu1 %v2226_v53 }
 0x4a3   : > { %v2151_v59 = vadd.f32 %v4118_v58, %v4832_v46  ;;  %v2142_v60 = vpop.f32.mrb[87].mxu0  ;;  %4160 = vmatmul.mubr.bf16.gmra.mrb[80].mxu1 %v2227_v52  ;;  %v2208_v62 = vmax.f32 %v2148_v55, 0.0 }
 0x4a4   : > { %v2143_v61 = vadd.f32 %v4832_v46, %v2142_v60  ;;  %v2206_v0 = vmax.f32 %v2140_v57, 0.0 }
 0x4a5   : > { %v2209_v63 = vmax.f32 %v2151_v59, 0.0 }
 0x4a6   : > { %v2207_v1 = vmax.f32 %v2143_v61, 0.0 }
 0x4a7   : > { %v2229_v2 = vpack.c.bf16 %v2209_v63, %v2208_v62 }
 0x4a8   : > { %v2228_v3 = vpack.c.bf16 %v2207_v1, %v2206_v0  ;;  %v4121_v4 = vpop.f32.mrb[88].mxu0 }
 0x4a9   : > { %v2164_v5 = vadd.f32 %v4121_v4, %v4832_v46  ;;  %v2155_v6 = vpop.f32.mrb[89].mxu0 }
 0x4aa   : > { %v2156_v7 = vadd.f32 %v4832_v46, %v2155_v6  ;;  %v4122_v8 = vpop.f32.mrb[90].mxu0  ;;  %4163 = vmatprep.mubr.bf16.mxu1 %v2228_v3 }
 0x4ab   : > { %v2167_v9 = vadd.f32 %v4122_v8, %v4832_v46  ;;  %v2158_v10 = vpop.f32.mrb[91].mxu0  ;;  %4164 = vmatmul.mubr.bf16.gmra.mrb[84].mxu1 %v2229_v2  ;;  %v2212_v12 = vmax.f32 %v2164_v5, 0.0 }
 0x4ac   : > { %v2159_v11 = vadd.f32 %v4832_v46, %v2158_v10  ;;  %v2210_v14 = vmax.f32 %v2156_v7, 0.0 }
 0x4ad   : > { %v2213_v13 = vmax.f32 %v2167_v9, 0.0 }
 0x4ae   : > { %v2211_v26 = vmax.f32 %v2159_v11, 0.0 }
 0x4af   : > { %v2231_v15 = vpack.c.bf16 %v2213_v13, %v2212_v12 }
 0x4b0   : > { %v2230_v16 = vpack.c.bf16 %v2211_v26, %v2210_v14  ;;  %v4125_v17 = vpop.f32.mrb[92].mxu0 }
 0x4b1   : > { %v2180_v18 = vadd.f32 %v4125_v17, %v4832_v46  ;;  %v2171_v19 = vpop.f32.mrb[93].mxu0 }
 0x4b2   : > { %v2172_v20 = vadd.f32 %v4832_v46, %v2171_v19  ;;  %v4126_v21 = vpop.f32.mrb[94].mxu0  ;;  %4167 = vmatprep.mubr.bf16.mxu1 %v2230_v16 }
 0x4b3   : > { %v2183_v22 = vadd.f32 %v4126_v21, %v4832_v46  ;;  %v2174_v23 = vpop.f32.mrb[95].mxu0  ;;  %4168 = vmatmul.mubr.bf16.gmra.mrb[88].mxu1 %v2231_v15  ;;  %v2216_v25 = vmax.f32 %v2180_v18, 0.0 }
 0x4b4   : > { %v2175_v24 = vadd.f32 %v4832_v46, %v2174_v23  ;;  %v2214_v27 = vmax.f32 %v2172_v20, 0.0  ;;  %v4352_v46 = vld [vmem:[%s5044_s15 + $0x8] sm:$0xff]  }
 0x4b5   : > { %v2217_v39 = vmax.f32 %v2183_v22, 0.0  ;;  %4225 = vmatprep.subr.bf16.mxu1 %v4352_v46 }
 0x4b6   : > { %v2215_v28 = vmax.f32 %v2175_v24, 0.0  ;;  %4226 = vmatpush3.bf16.msra.mxu1 %v4352_v46 }
 0x4b7   : > { %v2233_v29 = vpack.c.bf16 %v2217_v39, %v2216_v25  ;;  %4227 = vmatprep.subr.bf16.mxu1 %v4353_v34 }
 0x4b8   : > { %v2232_v30 = vpack.c.bf16 %v2215_v28, %v2214_v27 }
 0x4ba   : > { %4171 = vmatprep.mubr.bf16.mxu1 %v2232_v30  ;;  %4228 = vmatpush3.bf16.msra.mxu1 %v4353_v34 }
 0x4bb   : > { %4172 = vmatmul.mubr.bf16.gmra.mrb[92].mxu1 %v2233_v29  ;;  %4229 = vmatprep.subr.bf16.mxu1 %v4354_v35 }
 0x4be   : > { %4230 = vmatpush3.bf16.msra.mxu1 %v4354_v35 }
 0x4bf   : > { %4231 = vmatprep.subr.bf16.mxu1 %v4355_v36 }
 0x4c2   : > { %4232 = vmatpush3.bf16.msra.mxu1 %v4355_v36 }
 0x4c3   : > { %4233 = vmatprep.subr.bf16.mxu1 %v4356_v37 }
 0x4c6   : > { %4234 = vmatpush3.bf16.msra.mxu1 %v4356_v37 }
 0x4c7   : > { %4235 = vmatprep.subr.bf16.mxu1 %v4357_v38 }
 0x4ca   : > { %4236 = vmatpush3.bf16.msra.mxu1 %v4357_v38 }
 0x556   : > { %v4145_v32 = vpop.f32.mrb[64].mxu1 }
 0x557   : > { %v2348_v41 = vadd.f32 %v4145_v32, %v4893_v40  ;;  %v2339_v42 = vpop.f32.mrb[65].mxu1 }
 0x558   : > { %v2340_v43 = vadd.f32 %v4893_v40, %v2339_v42  ;;  %v4146_v44 = vpop.f32.mrb[66].mxu1 }
 0x559   : > { %v2351_v45 = vadd.f32 %v4146_v44, %v4893_v40  ;;  %v2342_v47 = vpop.f32.mrb[67].mxu1  ;;  %v2468_v49 = vmax.f32 %v2348_v41, 0.0 }
 0x55a   : > { %v2343_v48 = vadd.f32 %v4893_v40, %v2342_v47  ;;  %v2466_v51 = vmax.f32 %v2340_v43, 0.0 }
 0x55b   : > { %v2469_v50 = vmax.f32 %v2351_v45, 0.0 }
 0x55c   : > { %v2467_v52 = vmax.f32 %v2343_v48, 0.0 }
 0x55d   : > { %v2499_v53 = vpack.c.bf16 %v2469_v50, %v2468_v49 }
 0x55e   : > { %v2498_v54 = vpack.c.bf16 %v2467_v52, %v2466_v51  ;;  %v4149_v55 = vpop.f32.mrb[68].mxu1 }
 0x55f   : > { %v2364_v56 = vadd.f32 %v4149_v55, %v4893_v40  ;;  %v2355_v57 = vpop.f32.mrb[69].mxu1 }
 0x560   : > { %v2356_v58 = vadd.f32 %v4893_v40, %v2355_v57  ;;  %v4150_v59 = vpop.f32.mrb[70].mxu1  ;;  %4191 = vmatprep.mubr.bf16.mxu0 %v2498_v54 }
 0x561   : > { %v2367_v60 = vadd.f32 %v4150_v59, %v4893_v40  ;;  %v2358_v61 = vpop.f32.mrb[71].mxu1  ;;  %4192 = vmatmul.mubr.bf16.vlgmr.msra.gmra.mrb[96].mxu0 %v2499_v53  ;;  %v2472_v63 = vmax.f32 %v2364_v56, 0.0 }
 0x562   : > { %v2359_v62 = vadd.f32 %v4893_v40, %v2358_v61  ;;  %v2470_v1 = vmax.f32 %v2356_v58, 0.0 }
 0x563   : > { %v2473_v0 = vmax.f32 %v2367_v60, 0.0 }
 0x564   : > { %v2471_v2 = vmax.f32 %v2359_v62, 0.0 }
 0x565   : > { %v2501_v3 = vpack.c.bf16 %v2473_v0, %v2472_v63 }
 0x566   : > { %v2500_v4 = vpack.c.bf16 %v2471_v2, %v2470_v1  ;;  %v4153_v5 = vpop.f32.mrb[72].mxu1 }
 0x567   : > { %v2380_v6 = vadd.f32 %v4153_v5, %v4893_v40  ;;  %v2371_v7 = vpop.f32.mrb[73].mxu1 }
 0x568   : > { %v2372_v8 = vadd.f32 %v4893_v40, %v2371_v7  ;;  %v4154_v9 = vpop.f32.mrb[74].mxu1  ;;  %4195 = vmatprep.mubr.bf16.mxu0 %v2500_v4 }
 0x569   : > { %v2383_v10 = vadd.f32 %v4154_v9, %v4893_v40  ;;  %v2374_v11 = vpop.f32.mrb[75].mxu1  ;;  %4196 = vmatmul.mubr.bf16.gmra.mrb[100].mxu0 %v2501_v3  ;;  %v2476_v13 = vmax.f32 %v2380_v6, 0.0 }
 0x56a   : > { %v2375_v12 = vadd.f32 %v4893_v40, %v2374_v11  ;;  %v2474_v26 = vmax.f32 %v2372_v8, 0.0 }
 0x56b   : > { %v2477_v14 = vmax.f32 %v2383_v10, 0.0 }
 0x56c   : > { %v2475_v15 = vmax.f32 %v2375_v12, 0.0 }
 0x56d   : > { %v2503_v16 = vpack.c.bf16 %v2477_v14, %v2476_v13 }
 0x56e   : > { %v2502_v17 = vpack.c.bf16 %v2475_v15, %v2474_v26  ;;  %v4157_v18 = vpop.f32.mrb[76].mxu1 }
 0x56f   : > { %v2396_v19 = vadd.f32 %v4157_v18, %v4893_v40  ;;  %v2387_v20 = vpop.f32.mrb[77].mxu1 }
 0x570   : > { %v2388_v21 = vadd.f32 %v4893_v40, %v2387_v20  ;;  %v4158_v22 = vpop.f32.mrb[78].mxu1  ;;  %4199 = vmatprep.mubr.bf16.mxu0 %v2502_v17 }
 0x571   : > { %v2399_v23 = vadd.f32 %v4158_v22, %v4893_v40  ;;  %v2390_v24 = vpop.f32.mrb[79].mxu1  ;;  %4200 = vmatmul.mubr.bf16.gmra.mrb[104].mxu0 %v2503_v16  ;;  %v2480_v39 = vmax.f32 %v2396_v19, 0.0 }
 0x572   : > { %v2391_v25 = vadd.f32 %v4893_v40, %v2390_v24  ;;  %v2478_v28 = vmax.f32 %v2388_v21, 0.0 }
 0x573   : > { %v2481_v27 = vmax.f32 %v2399_v23, 0.0 }
 0x574   : > { %v2479_v29 = vmax.f32 %v2391_v25, 0.0  ;;  %v4358_v25 = vld [vmem:[%s5044_s15 + $0x38] sm:$0xff]  }
 0x575   : > { %v2505_v30 = vpack.c.bf16 %v2481_v27, %v2480_v39  ;;  %4237 = vmatprep.subr.bf16.mxu1 %v4358_v25  ;;  %v4933_v39 = vld [vmem:[%s5043_s14] ss:$0 sm:$0xff] }
 0x576   : > { %v2504_v31 = vpack.c.bf16 %v2479_v29, %v2478_v28  ;;  %v4161_v33 = vpop.f32.mrb[80].mxu1  ;;  %4238 = vmatpush3.bf16.msra.mxu1 %v4358_v25 }
 0x577   : > { %v2412_v46 = vadd.f32 %v4161_v33, %v4893_v40  ;;  %v2403_v34 = vpop.f32.mrb[81].mxu1 }
 0x578   : > { %v2404_v35 = vadd.f32 %v4893_v40, %v2403_v34  ;;  %v4162_v36 = vpop.f32.mrb[82].mxu1  ;;  %4203 = vmatprep.mubr.bf16.mxu0 %v2504_v31 }
 0x579   : > { %v2415_v37 = vadd.f32 %v4162_v36, %v4893_v40  ;;  %v2406_v38 = vpop.f32.mrb[83].mxu1  ;;  %4204 = vmatmul.mubr.bf16.gmra.mrb[108].mxu0 %v2505_v30  ;;  %v2484_v41 = vmax.f32 %v2412_v46, 0.0 }
 0x57a   : > { %v2407_v32 = vadd.f32 %v4893_v40, %v2406_v38  ;;  %v2482_v43 = vmax.f32 %v2404_v35, 0.0 }
 0x57b   : > { %v2485_v42 = vmax.f32 %v2415_v37, 0.0 }
 0x57c   : > { %v2483_v44 = vmax.f32 %v2407_v32, 0.0 }
 0x57d   : > { %v2507_v45 = vpack.c.bf16 %v2485_v42, %v2484_v41 }
 0x57e   : > { %v2506_v47 = vpack.c.bf16 %v2483_v44, %v2482_v43  ;;  %v4165_v48 = vpop.f32.mrb[84].mxu1 }
 0x57f   : > { %v2428_v49 = vadd.f32 %v4165_v48, %v4893_v40  ;;  %v2419_v50 = vpop.f32.mrb[85].mxu1 }
 0x580   : > { %v2420_v51 = vadd.f32 %v4893_v40, %v2419_v50  ;;  %v4166_v52 = vpop.f32.mrb[86].mxu1  ;;  %4207 = vmatprep.mubr.bf16.mxu0 %v2506_v47 }
 0x581   : > { %v2431_v53 = vadd.f32 %v4166_v52, %v4893_v40  ;;  %v2422_v54 = vpop.f32.mrb[87].mxu1  ;;  %4208 = vmatmul.mubr.bf16.gmra.mrb[112].mxu0 %v2507_v45  ;;  %v2488_v56 = vmax.f32 %v2428_v49, 0.0 }
 0x582   : > { %v2423_v55 = vadd.f32 %v4893_v40, %v2422_v54  ;;  %v2486_v58 = vmax.f32 %v2420_v51, 0.0 }
 0x583   : > { %v2489_v57 = vmax.f32 %v2431_v53, 0.0 }
 0x584   : > { %v2487_v59 = vmax.f32 %v2423_v55, 0.0 }
 0x585   : > { %v2509_v60 = vpack.c.bf16 %v2489_v57, %v2488_v56 }
 0x586   : > { %v2508_v61 = vpack.c.bf16 %v2487_v59, %v2486_v58  ;;  %v4169_v62 = vpop.f32.mrb[88].mxu1 }
 0x587   : > { %v2444_v63 = vadd.f32 %v4169_v62, %v4893_v40  ;;  %v2435_v0 = vpop.f32.mrb[89].mxu1 }
 0x588   : > { %v2436_v1 = vadd.f32 %v4893_v40, %v2435_v0  ;;  %v4170_v2 = vpop.f32.mrb[90].mxu1  ;;  %4211 = vmatprep.mubr.bf16.mxu0 %v2508_v61 }
 0x589   : > { %v2447_v3 = vadd.f32 %v4170_v2, %v4893_v40  ;;  %v2438_v4 = vpop.f32.mrb[91].mxu1  ;;  %4212 = vmatmul.mubr.bf16.gmra.mrb[116].mxu0 %v2509_v60  ;;  %v2492_v6 = vmax.f32 %v2444_v63, 0.0 }
 0x58a   : > { %v2439_v5 = vadd.f32 %v4893_v40, %v2438_v4  ;;  %v2490_v8 = vmax.f32 %v2436_v1, 0.0 }
 0x58b   : > { %v2493_v7 = vmax.f32 %v2447_v3, 0.0 }
 0x58c   : > { %v2491_v9 = vmax.f32 %v2439_v5, 0.0 }
 0x58d   : > { %v2511_v10 = vpack.c.bf16 %v2493_v7, %v2492_v6 }
 0x58e   : > { %v2510_v11 = vpack.c.bf16 %v2491_v9, %v2490_v8  ;;  %v4173_v12 = vpop.f32.mrb[92].mxu1 }
 0x58f   : > { %v2460_v13 = vadd.f32 %v4173_v12, %v4893_v40  ;;  %v2451_v14 = vpop.f32.mrb[93].mxu1 }
 0x590   : > { %v2452_v26 = vadd.f32 %v4893_v40, %v2451_v14  ;;  %v4174_v15 = vpop.f32.mrb[94].mxu1  ;;  %4215 = vmatprep.mubr.bf16.mxu0 %v2510_v11 }
 0x591   : > { %v2463_v16 = vadd.f32 %v4174_v15, %v4893_v40  ;;  %v2454_v17 = vpop.f32.mrb[95].mxu1  ;;  %4216 = vmatmul.mubr.bf16.gmra.mrb[120].mxu0 %v2511_v10  ;;  %v2496_v19 = vmax.f32 %v2460_v13, 0.0 }
 0x592   : > { %v2455_v18 = vadd.f32 %v4893_v40, %v2454_v17  ;;  %v2494_v21 = vmax.f32 %v2452_v26, 0.0 }
 0x593   : > { %v2497_v20 = vmax.f32 %v2463_v16, 0.0 }
 0x594   : > { %v2495_v22 = vmax.f32 %v2455_v18, 0.0 }
 0x595   : > { %v2513_v23 = vpack.c.bf16 %v2497_v20, %v2496_v19 }
 0x596   : > { %v2512_v24 = vpack.c.bf16 %v2495_v22, %v2494_v21 }
 0x598   : > { %4219 = vmatprep.mubr.bf16.mxu0 %v2512_v24 }
 0x599   : > { %4220 = vmatmul.mubr.bf16.gmra.mrb[124].mxu0 %v2513_v23 }
 0x634   : > { %v4193_v40 = vpop.f32.mrb[96].mxu0 }
 0x635   : > { %v2628_v27 = vadd.f32 %v4193_v40, %v4933_v39  ;;  %v2619_v28 = vpop.f32.mrb[97].mxu0 }
 0x636   : > { %v2620_v29 = vadd.f32 %v4933_v39, %v2619_v28  ;;  %v4194_v30 = vpop.f32.mrb[98].mxu0 }
 0x637   : > { %v2631_v31 = vadd.f32 %v4194_v30, %v4933_v39  ;;  %v2622_v33 = vpop.f32.mrb[99].mxu0  ;;  %v2748_v34 = vmax.f32 %v2628_v27, 0.0 }
 0x638   : > { %v2623_v46 = vadd.f32 %v4933_v39, %v2622_v33  ;;  %v2746_v36 = vmax.f32 %v2620_v29, 0.0 }
 0x639   : > { %v2749_v35 = vmax.f32 %v2631_v31, 0.0 }
 0x63a   : > { %v2747_v37 = vmax.f32 %v2623_v46, 0.0 }
 0x63b   : > { %v2779_v38 = vpack.c.bf16 %v2749_v35, %v2748_v34 }
 0x63c   : > { %v2778_v32 = vpack.c.bf16 %v2747_v37, %v2746_v36  ;;  %v4197_v41 = vpop.f32.mrb[100].mxu0 }
 0x63d   : > { %v2644_v42 = vadd.f32 %v4197_v41, %v4933_v39  ;;  %v2635_v43 = vpop.f32.mrb[101].mxu0 }
 0x63e   : > { %v2636_v44 = vadd.f32 %v4933_v39, %v2635_v43  ;;  %v4198_v45 = vpop.f32.mrb[102].mxu0  ;;  %4239 = vmatprep.mubr.bf16.mxu1 %v2778_v32 }
 0x63f   : > { %v2647_v47 = vadd.f32 %v4198_v45, %v4933_v39  ;;  %v2638_v48 = vpop.f32.mrb[103].mxu0  ;;  %4240 = vmatmul.mubr.bf16.vlgmr.msra.gmra.mrb[96].mxu1 %v2779_v38  ;;  %v2752_v50 = vmax.f32 %v2644_v42, 0.0 }
 0x640   : > { %v2639_v49 = vadd.f32 %v4933_v39, %v2638_v48  ;;  %v2750_v52 = vmax.f32 %v2636_v44, 0.0 }
 0x641   : > { %v2753_v51 = vmax.f32 %v2647_v47, 0.0 }
 0x642   : > { %v2751_v53 = vmax.f32 %v2639_v49, 0.0 }
 0x643   : > { %v2781_v54 = vpack.c.bf16 %v2753_v51, %v2752_v50 }
 0x644   : > { %v2780_v55 = vpack.c.bf16 %v2751_v53, %v2750_v52  ;;  %v4201_v56 = vpop.f32.mrb[104].mxu0 }
 0x645   : > { %v2660_v57 = vadd.f32 %v4201_v56, %v4933_v39  ;;  %v2651_v58 = vpop.f32.mrb[105].mxu0 }
 0x646   : > { %v2652_v59 = vadd.f32 %v4933_v39, %v2651_v58  ;;  %v4202_v60 = vpop.f32.mrb[106].mxu0  ;;  %4243 = vmatprep.mubr.bf16.mxu1 %v2780_v55 }
 0x647   : > { %v2663_v61 = vadd.f32 %v4202_v60, %v4933_v39  ;;  %v2654_v62 = vpop.f32.mrb[107].mxu0  ;;  %4244 = vmatmul.mubr.bf16.gmra.mrb[100].mxu1 %v2781_v54  ;;  %v2756_v0 = vmax.f32 %v2660_v57, 0.0 }
 0x648   : > { %v2655_v63 = vadd.f32 %v4933_v39, %v2654_v62  ;;  %v2754_v2 = vmax.f32 %v2652_v59, 0.0 }
 0x649   : > { %v2757_v1 = vmax.f32 %v2663_v61, 0.0 }
 0x64a   : > { %v2755_v3 = vmax.f32 %v2655_v63, 0.0 }
 0x64b   : > { %v2783_v4 = vpack.c.bf16 %v2757_v1, %v2756_v0 }
 0x64c   : > { %v2782_v5 = vpack.c.bf16 %v2755_v3, %v2754_v2  ;;  %v4205_v6 = vpop.f32.mrb[108].mxu0 }
 0x64d   : > { %v2676_v7 = vadd.f32 %v4205_v6, %v4933_v39  ;;  %v2667_v8 = vpop.f32.mrb[109].mxu0 }
 0x64e   : > { %v2668_v9 = vadd.f32 %v4933_v39, %v2667_v8  ;;  %v4206_v10 = vpop.f32.mrb[110].mxu0  ;;  %4247 = vmatprep.mubr.bf16.mxu1 %v2782_v5 }
 0x64f   : > { %v2679_v11 = vadd.f32 %v4206_v10, %v4933_v39  ;;  %v2670_v12 = vpop.f32.mrb[111].mxu0  ;;  %4248 = vmatmul.mubr.bf16.gmra.mrb[104].mxu1 %v2783_v4  ;;  %v2760_v14 = vmax.f32 %v2676_v7, 0.0 }
 0x650   : > { %v2671_v13 = vadd.f32 %v4933_v39, %v2670_v12  ;;  %v2758_v15 = vmax.f32 %v2668_v9, 0.0 }
 0x651   : > { %v2761_v26 = vmax.f32 %v2679_v11, 0.0 }
 0x652   : > { %v2759_v16 = vmax.f32 %v2671_v13, 0.0 }
 0x653   : > { %v2785_v17 = vpack.c.bf16 %v2761_v26, %v2760_v14  ;;  %v4970_v14 = vld [vmem:[%s5045_s16] ss:$0 sm:$0xff] }
 0x654   : > { %v2784_v18 = vpack.c.bf16 %v2759_v16, %v2758_v15  ;;  %v4209_v19 = vpop.f32.mrb[112].mxu0 }
 0x655   : > { %v2692_v20 = vadd.f32 %v4209_v19, %v4933_v39  ;;  %v2683_v21 = vpop.f32.mrb[113].mxu0 }
 0x656   : > { %v2684_v22 = vadd.f32 %v4933_v39, %v2683_v21  ;;  %v4210_v23 = vpop.f32.mrb[114].mxu0  ;;  %4251 = vmatprep.mubr.bf16.mxu1 %v2784_v18 }
 0x657   : > { %v2695_v24 = vadd.f32 %v4210_v23, %v4933_v39  ;;  %v2686_v25 = vpop.f32.mrb[115].mxu0  ;;  %4252 = vmatmul.mubr.bf16.gmra.mrb[108].mxu1 %v2785_v17  ;;  %v2764_v27 = vmax.f32 %v2692_v20, 0.0 }
 0x658   : > { %v2687_v40 = vadd.f32 %v4933_v39, %v2686_v25  ;;  %v2762_v29 = vmax.f32 %v2684_v22, 0.0 }
 0x659   : > { %v2765_v28 = vmax.f32 %v2695_v24, 0.0 }
 0x65a   : > { %v2763_v30 = vmax.f32 %v2687_v40, 0.0 }
 0x65b   : > { %v2787_v31 = vpack.c.bf16 %v2765_v28, %v2764_v27 }
 0x65c   : > { %v2786_v33 = vpack.c.bf16 %v2763_v30, %v2762_v29  ;;  %v4213_v46 = vpop.f32.mrb[116].mxu0 }
 0x65d   : > { %v2708_v34 = vadd.f32 %v4213_v46, %v4933_v39  ;;  %v2699_v35 = vpop.f32.mrb[117].mxu0 }
 0x65e   : > { %v2700_v36 = vadd.f32 %v4933_v39, %v2699_v35  ;;  %v4214_v37 = vpop.f32.mrb[118].mxu0  ;;  %4255 = vmatprep.mubr.bf16.mxu1 %v2786_v33 }
 0x65f   : > { %v2711_v38 = vadd.f32 %v4214_v37, %v4933_v39  ;;  %v2702_v32 = vpop.f32.mrb[119].mxu0  ;;  %4256 = vmatmul.mubr.bf16.gmra.mrb[112].mxu1 %v2787_v31  ;;  %v2768_v42 = vmax.f32 %v2708_v34, 0.0 }
 0x660   : > { %v2703_v41 = vadd.f32 %v4933_v39, %v2702_v32  ;;  %v2766_v44 = vmax.f32 %v2700_v36, 0.0 }
 0x661   : > { %v2769_v43 = vmax.f32 %v2711_v38, 0.0 }
 0x662   : > { %v2767_v45 = vmax.f32 %v2703_v41, 0.0 }
 0x663   : > { %v2789_v47 = vpack.c.bf16 %v2769_v43, %v2768_v42 }
 0x664   : > { %v2788_v48 = vpack.c.bf16 %v2767_v45, %v2766_v44  ;;  %v4217_v49 = vpop.f32.mrb[120].mxu0 }
 0x665   : > { %v2724_v50 = vadd.f32 %v4217_v49, %v4933_v39  ;;  %v2715_v51 = vpop.f32.mrb[121].mxu0 }
 0x666   : > { %v2716_v52 = vadd.f32 %v4933_v39, %v2715_v51  ;;  %v4218_v53 = vpop.f32.mrb[122].mxu0  ;;  %4259 = vmatprep.mubr.bf16.mxu1 %v2788_v48 }
 0x667   : > { %v2727_v54 = vadd.f32 %v4218_v53, %v4933_v39  ;;  %v2718_v55 = vpop.f32.mrb[123].mxu0  ;;  %4260 = vmatmul.mubr.bf16.gmra.mrb[116].mxu1 %v2789_v47  ;;  %v2772_v57 = vmax.f32 %v2724_v50, 0.0 }
 0x668   : > { %v2719_v56 = vadd.f32 %v4933_v39, %v2718_v55  ;;  %v2770_v59 = vmax.f32 %v2716_v52, 0.0 }
 0x669   : > { %v2773_v58 = vmax.f32 %v2727_v54, 0.0 }
 0x66a   : > { %v2771_v60 = vmax.f32 %v2719_v56, 0.0 }
 0x66b   : > { %v2791_v61 = vpack.c.bf16 %v2773_v58, %v2772_v57 }
 0x66c   : > { %v2790_v62 = vpack.c.bf16 %v2771_v60, %v2770_v59  ;;  %v4221_v63 = vpop.f32.mrb[124].mxu0 }
 0x66d   : > { %v2740_v0 = vadd.f32 %v4221_v63, %v4933_v39  ;;  %v2731_v1 = vpop.f32.mrb[125].mxu0 }
 0x66e   : > { %v2732_v2 = vadd.f32 %v4933_v39, %v2731_v1  ;;  %v4222_v3 = vpop.f32.mrb[126].mxu0  ;;  %4263 = vmatprep.mubr.bf16.mxu1 %v2790_v62 }
 0x66f   : > { %v2743_v4 = vadd.f32 %v4222_v3, %v4933_v39  ;;  %v2734_v5 = vpop.f32.mrb[127].mxu0  ;;  %4264 = vmatmul.mubr.bf16.gmra.mrb[120].mxu1 %v2791_v61  ;;  %v2776_v7 = vmax.f32 %v2740_v0, 0.0 }
 0x670   : > { %v2735_v6 = vadd.f32 %v4933_v39, %v2734_v5  ;;  %v2774_v9 = vmax.f32 %v2732_v2, 0.0 }
 0x671   : > { %v2777_v8 = vmax.f32 %v2743_v4, 0.0 }
 0x672   : > { %v2775_v10 = vmax.f32 %v2735_v6, 0.0 }
 0x673   : > { %v2793_v11 = vpack.c.bf16 %v2777_v8, %v2776_v7 }
 0x674   : > { %v2792_v12 = vpack.c.bf16 %v2775_v10, %v2774_v9 }
 0x676   : > { %4267 = vmatprep.mubr.bf16.mxu1 %v2792_v12 }
 0x677   : > { %4268 = vmatmul.mubr.bf16.gmra.mrb[124].mxu1 %v2793_v11 }
 0x712   : > { %v4241_v13 = vpop.f32.mrb[96].mxu1 }
 0x713   : > { %v2899_v26 = vpop.f32.mrb[97].mxu1  ;;  %v2908_v16 = vadd.f32 %v4241_v13, %v4970_v14 }
 0x714   : > { %v4242_v15 = vpop.f32.mrb[98].mxu1  ;;  %v2900_v18 = vadd.f32 %v4970_v14, %v2899_v26 }
 0x715   : > { %v2911_v39 = vadd.f32 %v4242_v15, %v4970_v14  ;;  %v2902_v17 = vpop.f32.mrb[99].mxu1 }
 0x716   : > { %v2903_v19 = vadd.f32 %v4970_v14, %v2902_v17 }
 0x717   : > { %v3593_v20 = vpack.c.bf16 %v2911_v39, %v2908_v16 }
 0x718   : > { %v3588_v21 = vpack.c.bf16 %v2903_v19, %v2900_v18 }
 0x719   : > { %3680 = vst [vmem:[%s4979_s30 + $0x8] sm:$0xff] %v3593_v20  }
 0x71a   : > { %3589 = vst [vmem:[%s4979_s30] sm:$0xff] %v3588_v21   ;;  %v4245_v22 = vpop.f32.mrb[100].mxu1 }
 0x71b   : > { %v2915_v23 = vpop.f32.mrb[101].mxu1  ;;  %v2924_v25 = vadd.f32 %v4245_v22, %v4970_v14 }
 0x71c   : > { %v4246_v24 = vpop.f32.mrb[102].mxu1  ;;  %v2916_v28 = vadd.f32 %v4970_v14, %v2915_v23 }
 0x71d   : > { %v2927_v40 = vadd.f32 %v4246_v24, %v4970_v14  ;;  %v2918_v27 = vpop.f32.mrb[103].mxu1 }
 0x71e   : > { %v2919_v29 = vadd.f32 %v4970_v14, %v2918_v27 }
 0x71f   : > { %v3603_v30 = vpack.c.bf16 %v2927_v40, %v2924_v25 }
 0x720   : > { %v3598_v31 = vpack.c.bf16 %v2919_v29, %v2916_v28 }
 0x721   : > { %3682 = vst [vmem:[%s4979_s30 + $0x18] sm:$0xff] %v3603_v30  }
 0x722   : > { %3681 = vst [vmem:[%s4979_s30 + $0x10] sm:$0xff] %v3598_v31   ;;  %v4249_v33 = vpop.f32.mrb[104].mxu1 }
 0x723   : > { %v2931_v46 = vpop.f32.mrb[105].mxu1  ;;  %v2940_v35 = vadd.f32 %v4249_v33, %v4970_v14 }
 0x724   : > { %v4250_v34 = vpop.f32.mrb[106].mxu1  ;;  %v2932_v38 = vadd.f32 %v4970_v14, %v2931_v46 }
 0x725   : > { %v2943_v36 = vadd.f32 %v4250_v34, %v4970_v14  ;;  %v2934_v37 = vpop.f32.mrb[107].mxu1 }
 0x726   : > { %v2935_v32 = vadd.f32 %v4970_v14, %v2934_v37 }
 0x727   : > { %v3613_v41 = vpack.c.bf16 %v2943_v36, %v2940_v35 }
 0x728   : > { %v3608_v42 = vpack.c.bf16 %v2935_v32, %v2932_v38 }
 0x729   : > { %3684 = vst [vmem:[%s4979_s30 + $0x28] sm:$0xff] %v3613_v41  }
 0x72a   : > { %3683 = vst [vmem:[%s4979_s30 + $0x20] sm:$0xff] %v3608_v42   ;;  %v4253_v43 = vpop.f32.mrb[108].mxu1 }
 0x72b   : > { %v2947_v44 = vpop.f32.mrb[109].mxu1  ;;  %v2956_v47 = vadd.f32 %v4253_v43, %v4970_v14 }
 0x72c   : > { %v4254_v45 = vpop.f32.mrb[110].mxu1  ;;  %v2948_v50 = vadd.f32 %v4970_v14, %v2947_v44 }
 0x72d   : > { %v2959_v48 = vadd.f32 %v4254_v45, %v4970_v14  ;;  %v2950_v49 = vpop.f32.mrb[111].mxu1 }
 0x72e   : > { %v2951_v51 = vadd.f32 %v4970_v14, %v2950_v49 }
 0x72f   : > { %v3623_v52 = vpack.c.bf16 %v2959_v48, %v2956_v47 }
 0x730   : > { %v3618_v53 = vpack.c.bf16 %v2951_v51, %v2948_v50 }
 0x731   : > { %3686 = vst [vmem:[%s4979_s30 + $0x38] sm:$0xff] %v3623_v52  }
 0x732   : > { %3685 = vst [vmem:[%s4979_s30 + $0x30] sm:$0xff] %v3618_v53   ;;  %v4257_v54 = vpop.f32.mrb[112].mxu1 }
 0x733   : > { %v2963_v55 = vpop.f32.mrb[113].mxu1  ;;  %v2972_v57 = vadd.f32 %v4257_v54, %v4970_v14 }
 0x734   : > { %v4258_v56 = vpop.f32.mrb[114].mxu1  ;;  %v2964_v60 = vadd.f32 %v4970_v14, %v2963_v55 }
 0x735   : > { %v2975_v58 = vadd.f32 %v4258_v56, %v4970_v14  ;;  %v2966_v59 = vpop.f32.mrb[115].mxu1 }
 0x736   : > { %v2967_v61 = vadd.f32 %v4970_v14, %v2966_v59 }
 0x737   : > { %v3633_v62 = vpack.c.bf16 %v2975_v58, %v2972_v57 }
 0x738   : > { %v3628_v63 = vpack.c.bf16 %v2967_v61, %v2964_v60 }
 0x739   : > { %3688 = vst [vmem:[%s4979_s30 + $0x48] sm:$0xff] %v3633_v62  }
 0x73a   : > { %3687 = vst [vmem:[%s4979_s30 + $0x40] sm:$0xff] %v3628_v63   ;;  %v4261_v0 = vpop.f32.mrb[116].mxu1 }
 0x73b   : > { %v2979_v1 = vpop.f32.mrb[117].mxu1  ;;  %v2988_v3 = vadd.f32 %v4261_v0, %v4970_v14 }
 0x73c   : > { %v4262_v2 = vpop.f32.mrb[118].mxu1  ;;  %v2980_v6 = vadd.f32 %v4970_v14, %v2979_v1 }
 0x73d   : > { %v2991_v4 = vadd.f32 %v4262_v2, %v4970_v14  ;;  %v2982_v5 = vpop.f32.mrb[119].mxu1 }
 0x73e   : > { %v2983_v7 = vadd.f32 %v4970_v14, %v2982_v5 }
 0x73f   : > { %v3643_v8 = vpack.c.bf16 %v2991_v4, %v2988_v3 }
 0x740   : > { %v3638_v9 = vpack.c.bf16 %v2983_v7, %v2980_v6 }
 0x741   : > { %3690 = vst [vmem:[%s4979_s30 + $0x58] sm:$0xff] %v3643_v8  }
 0x742   : > { %3689 = vst [vmem:[%s4979_s30 + $0x50] sm:$0xff] %v3638_v9   ;;  %v4265_v10 = vpop.f32.mrb[120].mxu1 }
 0x743   : > { %v2995_v11 = vpop.f32.mrb[121].mxu1  ;;  %v3004_v13 = vadd.f32 %v4265_v10, %v4970_v14 }
 0x744   : > { %v4266_v12 = vpop.f32.mrb[122].mxu1  ;;  %v2996_v16 = vadd.f32 %v4970_v14, %v2995_v11 }
 0x745   : > { %v3007_v26 = vadd.f32 %v4266_v12, %v4970_v14  ;;  %v2998_v15 = vpop.f32.mrb[123].mxu1 }
 0x746   : > { %v2999_v39 = vadd.f32 %v4970_v14, %v2998_v15 }
 0x747   : > { %v3653_v17 = vpack.c.bf16 %v3007_v26, %v3004_v13 }
 0x748   : > { %v3648_v18 = vpack.c.bf16 %v2999_v39, %v2996_v16 }
 0x749   : > { %3692 = vst [vmem:[%s4979_s30 + $0x68] sm:$0xff] %v3653_v17  }
 0x74a   : > { %3691 = vst [vmem:[%s4979_s30 + $0x60] sm:$0xff] %v3648_v18   ;;  %v4269_v19 = vpop.f32.mrb[124].mxu1 }
 0x74b   : > { %v3011_v20 = vpop.f32.mrb[125].mxu1  ;;  %v3020_v22 = vadd.f32 %v4269_v19, %v4970_v14 }
 0x74c   : > { %v4270_v21 = vpop.f32.mrb[126].mxu1  ;;  %v3012_v25 = vadd.f32 %v4970_v14, %v3011_v20 }
 0x74d   : > { %v3023_v23 = vadd.f32 %v4270_v21, %v4970_v14  ;;  %v3014_v24 = vpop.f32.mrb[127].mxu1 }
 0x74e   : > { %v3015_v40 = vadd.f32 %v4970_v14, %v3014_v24 }
 0x74f   : > { %v3663_v27 = vpack.c.bf16 %v3023_v23, %v3020_v22 }
 0x750   : > { %v3658_v28 = vpack.c.bf16 %v3015_v40, %v3012_v25 }
 0x751   : > { %3694 = vst [vmem:[%s4979_s30 + $0x78] sm:$0xff] %v3663_v27  }
 0x752   : > { %3693 = vst [vmem:[%s4979_s30 + $0x70] sm:$0xff] %v3658_v28  }
 0x753 PF: > { %s29_s27 = sadd.s32 1, %s4365_s27  }
 0x754   : > { %p26_p4 = scmp.ge.s32.totalorder %s29_s27, 4  }
 0x756   :  { %28 = sbr.rel (!%p26_p4) target bundleno = 4 (0x4), region = 130 }

</bundles_post_ra>
